<compile_context>
chip_gen: v6e
topology: v6e:2x2x1
jax: 0.10.0
libtpu: 0.0.40
codegen_flags: <defaults>
</compile_context>

<pallas_src>
import functools

import jax
import jax.numpy as jnp
from jax.experimental import pallas as pl
from jax.experimental.pallas import tpu as pltpu

NEG_SLOPE = 0.2  # GATConv default LeakyReLU negative slope


def _gat_net_kernel(x_ref, adj_ref, w1_ref, s1_ref, d1_ref, b1_ref,
                    w2_ref, s2_ref, d2_ref, b2_ref, o_ref, *, heads1, heads2):
    """Fused GAT_NET forward. All refs are whole-array VMEM blocks."""
    mask = adj_ref[...].astype(jnp.int32) > 0            # [N, N] edge mask (int8 adj in HBM)
    big_neg = jnp.float32(-1e30)

    def gat_layer(feat, w, asrc_bd, adst_bd, bias, heads):
        f_out = w.shape[1] // heads
        # One lane-dense feature transform for ALL heads (bf16 MXU, f32 accumulate).
        xh = jnp.dot(feat.astype(jnp.bfloat16), w.astype(jnp.bfloat16),
                     preferred_element_type=jnp.float32)                 # [N, heads*f_out]
        # All-head attention logits via two small f32 matmuls (block-diag att vectors).
        alpha_src = jnp.dot(xh, asrc_bd, preferred_element_type=jnp.float32)  # [N, heads]
        alpha_dst = jnp.dot(xh, adst_bd, preferred_element_type=jnp.float32)  # [N, heads]
        alpha_src_t = jnp.transpose(alpha_src)            # [heads, N]; single XLU transpose/layer

        outs = []
        for h in range(heads):                            # static unroll (heads <= 4)
            # e[i, j] = a_dst[i] + a_src[j]  (edge j -> i)
            e = alpha_dst[:, h:h + 1] + alpha_src_t[h:h + 1, :]          # [N, N]
            e = jnp.where(e > 0, e, NEG_SLOPE * e)                       # LeakyReLU(0.2)
            e = jnp.where(mask, e, big_neg)                              # mask non-edges
            e = e - jnp.max(e, axis=-1, keepdims=True)
            # Masked entries are ~ -1e30 after the shift, so exp underflows to 0.
            # Self-loops guarantee every row has >= 1 valid edge, so no 2nd select needed.
            p = jnp.exp(e)
            denom = jnp.sum(p, axis=-1, keepdims=True)
            attn = p * pl.reciprocal(denom, approx=True)                 # EUP vrcp (free slot)
            xh_h = xh[:, h * f_out:(h + 1) * f_out]
            outs.append(jnp.dot(attn.astype(jnp.bfloat16), xh_h.astype(jnp.bfloat16),
                                preferred_element_type=jnp.float32))     # [N, f_out]
        out = outs[0] if heads == 1 else jnp.concatenate(outs, axis=-1)  # [N, heads*f_out]
        return out + bias                                                # post-concat bias (PyG)

    # gat1 (4 heads, concat) + fused ReLU epilogue
    h1 = gat_layer(x_ref[...], w1_ref[...], s1_ref[...], d1_ref[...], b1_ref[...], heads1)
    h1 = jnp.maximum(h1, 0.0)
    # TODO(synk): training-mode dropout (Bernoulli mask) not implemented; eval dropout = identity.
    # gat2 (1 head)
    h2 = gat_layer(h1, w2_ref[...], s2_ref[...], d2_ref[...], b2_ref[...], heads2)
    # fused log_softmax(dim=1)
    m = jnp.max(h2, axis=-1, keepdims=True)
    s = h2 - m
    lse = jnp.log(jnp.sum(jnp.exp(s), axis=-1, keepdims=True))
    o_ref[...] = (s - lse).astype(o_ref.dtype)


def gat_net_pallas(x, adj_i8, w1, s1, d1, b1, w2, s2, d2, b2):
    """Single fused pallas_call for the whole GAT_NET forward. Returns [N, classes]."""
    N = x.shape[0]
    n_out = w2.shape[1]            # heads2 * classes (heads2 == 1 here)
    heads1 = s1.shape[1]
    heads2 = s2.shape[1]
    kernel = functools.partial(_gat_net_kernel, heads1=heads1, heads2=heads2)
    vmem = lambda: pl.BlockSpec(memory_space=pltpu.MemorySpace.VMEM)
    return pl.pallas_call(
        kernel,
        out_shape=jax.ShapeDtypeStruct((N, n_out), jnp.float32),
        in_specs=[vmem() for _ in range(10)],
        out_specs=vmem(),
        # Note: no grid — the whole problem is one VMEM-resident block at these
        # sizes.  For large N, tile destination rows on a "parallel" grid axis
        # (v7x: 2 TCs) with an online softmax over source-column blocks.
    )(x, adj_i8, w1, s1, d1, b1, w2, s2, d2, b2)


def _att_block_diag(att):
    """[H, F_out] per-head attention vectors -> block-diagonal [H*F_out, H]."""
    H, F = att.shape
    eye = jnp.eye(H, dtype=att.dtype)
    return (att[:, :, None] * eye[:, None, :]).reshape(H * F, H)


def init_gat_params(key, f_in, f_out, heads):
    """Deterministic synthetic params in GATConv layout (concat=True)."""
    k1, k2, k3 = jax.random.split(key, 3)
    scale = 1.0 / jnp.sqrt(jnp.float32(f_in))
    return dict(
        w=jax.random.normal(k1, (f_in, heads * f_out), jnp.float32) * scale,  # lin weight
        att_src=jax.random.normal(k2, (heads, f_out), jnp.float32) * 0.1,
        att_dst=jax.random.normal(k3, (heads, f_out), jnp.float32) * 0.1,
        bias=jnp.zeros((1, heads * f_out), jnp.float32),                      # post-concat bias
    )


@jax.jit
def gat_net_forward(x, adj_i8, p1, p2):
    return gat_net_pallas(
        x, adj_i8,
        p1["w"], _att_block_diag(p1["att_src"]), _att_block_diag(p1["att_dst"]), p1["bias"],
        p2["w"], _att_block_diag(p2["att_src"]), _att_block_diag(p2["att_dst"]), p2["bias"],
    )


if __name__ == "__main__":
    N = 128          # nodes
    FEATURES = 32    # input feature dim
    HIDDEN = 16      # hidden units per head
    CLASSES = 8      # output classes
    HEADS = 4        # gat1 heads

    key = jax.random.PRNGKey(0)
    kx, ke, kp1, kp2 = jax.random.split(key, 4)

    x = jax.random.normal(kx, (N, FEATURES), jnp.float32)
    # random directed graph (~5% density) + self loops (GATConv add_self_loops=True),
    # stored as int8 to cut adjacency DMA/VMEM bytes 4x vs f32.
    adj_bool = jax.random.uniform(ke, (N, N)) < 0.05
    adj_bool = jnp.logical_or(adj_bool, jnp.eye(N, dtype=bool))
    adj = adj_bool.astype(jnp.int8)

    p1 = init_gat_params(kp1, FEATURES, HIDDEN, HEADS)      # gat1(features, hidden, heads=4)
    p2 = init_gat_params(kp2, HIDDEN * HEADS, CLASSES, 1)   # gat2(hidden*heads, classes)

    out = gat_net_forward(x, adj, p1, p2)
    jax.block_until_ready(out)

    assert out.shape == (N, CLASSES)
    # log_softmax rows must exponentiate-sum to ~1 and be finite
    row_sums = jnp.exp(out).sum(axis=-1)
    assert bool(jnp.all(jnp.isfinite(out)))
    assert bool(jnp.all(jnp.abs(row_sums - 1.0) < 1e-3))
    print("KERNEL_OK")
</pallas_src>

<mosaic_0001>
module attributes {stable_mosaic.version = 11 : i64} {
  func.func @_gat_net_kernel(%arg0: memref<128x32xf32, #tpu.memory_space<vmem>>, %arg1: memref<128x128xi8, #tpu.memory_space<vmem>>, %arg2: memref<32x64xf32, #tpu.memory_space<vmem>>, %arg3: memref<64x4xf32, #tpu.memory_space<vmem>>, %arg4: memref<64x4xf32, #tpu.memory_space<vmem>>, %arg5: memref<1x64xf32, #tpu.memory_space<vmem>>, %arg6: memref<64x8xf32, #tpu.memory_space<vmem>>, %arg7: memref<8x1xf32, #tpu.memory_space<vmem>>, %arg8: memref<8x1xf32, #tpu.memory_space<vmem>>, %arg9: memref<1x8xf32, #tpu.memory_space<vmem>>, %arg10: memref<128x8xf32, #tpu.memory_space<vmem>>) attributes {dimension_semantics = [], scalar_prefetch = 0 : i64, scratch_operands = 0 : i64, tpu.core_type = #tpu.core_type<tc>} {
    %c0 = arith.constant 0 : index
    %c0_0 = arith.constant 0 : index
    %0 = vector.load %arg1[%c0, %c0_0] : memref<128x128xi8, #tpu.memory_space<vmem>>, vector<128x128xi8>
    %1 = arith.extsi %0 : vector<128x128xi8> to vector<128x128xi32>
    %c0_i32 = arith.constant 0 : i32
    %2 = vector.broadcast %c0_i32 : i32 to vector<128x128xi32>
    %3 = arith.cmpi sgt, %1, %2 : vector<128x128xi32>
    %c0_1 = arith.constant 0 : index
    %c0_2 = arith.constant 0 : index
    %4 = vector.load %arg0[%c0_1, %c0_2] : memref<128x32xf32, #tpu.memory_space<vmem>>, vector<128x32xf32>
    %c0_3 = arith.constant 0 : index
    %c0_4 = arith.constant 0 : index
    %5 = vector.load %arg2[%c0_3, %c0_4] : memref<32x64xf32, #tpu.memory_space<vmem>>, vector<32x64xf32>
    %c0_5 = arith.constant 0 : index
    %c0_6 = arith.constant 0 : index
    %6 = vector.load %arg3[%c0_5, %c0_6] : memref<64x4xf32, #tpu.memory_space<vmem>>, vector<64x4xf32>
    %c0_7 = arith.constant 0 : index
    %c0_8 = arith.constant 0 : index
    %7 = vector.load %arg4[%c0_7, %c0_8] : memref<64x4xf32, #tpu.memory_space<vmem>>, vector<64x4xf32>
    %c0_9 = arith.constant 0 : index
    %c0_10 = arith.constant 0 : index
    %8 = vector.load %arg5[%c0_9, %c0_10] : memref<1x64xf32, #tpu.memory_space<vmem>>, vector<1x64xf32>
    %9 = arith.truncf %4 : vector<128x32xf32> to vector<128x32xbf16>
    %10 = arith.truncf %5 : vector<32x64xf32> to vector<32x64xbf16>
    %cst = arith.constant dense<0.000000e+00> : vector<128x64xf32>
    %11 = tpu.matmul %9, %10, %cst {dimension_numbers = #tpu.dot_dimension_numbers<[1], [0], [0], [1], [0, 0, 1, 1], [], []>} : vector<128x32xbf16>, vector<32x64xbf16>, vector<128x64xf32> -> vector<128x64xf32>
    %cst_11 = arith.constant dense<0.000000e+00> : vector<128x4xf32>
    %12 = tpu.matmul %11, %6, %cst_11 {dimension_numbers = #tpu.dot_dimension_numbers<[1], [0], [0], [1], [0, 0, 1, 1], [], []>} : vector<128x64xf32>, vector<64x4xf32>, vector<128x4xf32> -> vector<128x4xf32>
    %cst_12 = arith.constant dense<0.000000e+00> : vector<128x4xf32>
    %13 = tpu.matmul %11, %7, %cst_12 {dimension_numbers = #tpu.dot_dimension_numbers<[1], [0], [0], [1], [0, 0, 1, 1], [], []>} : vector<128x64xf32>, vector<64x4xf32>, vector<128x4xf32> -> vector<128x4xf32>
    %14 = tpu.transpose %12, [1, 0] : vector<128x4xf32> -> vector<4x128xf32>
    %15 = vector.extract_strided_slice %13 {offsets = [0, 0], sizes = [128, 1], strides = [1, 1]} : vector<128x4xf32> to vector<128x1xf32>
    %16 = vector.extract_strided_slice %14 {offsets = [0, 0], sizes = [1, 128], strides = [1, 1]} : vector<4x128xf32> to vector<1x128xf32>
    %17 = vector.broadcast %15 : vector<128x1xf32> to vector<128x128xf32>
    %18 = vector.broadcast %16 : vector<1x128xf32> to vector<128x128xf32>
    %19 = arith.addf %17, %18 : vector<128x128xf32>
    %cst_13 = arith.constant 0.000000e+00 : f32
    %20 = vector.broadcast %cst_13 : f32 to vector<128x128xf32>
    %21 = arith.cmpf ogt, %19, %20 : vector<128x128xf32>
    %cst_14 = arith.constant 2.000000e-01 : f32
    %22 = vector.broadcast %cst_14 : f32 to vector<128x128xf32>
    %23 = arith.mulf %22, %19 : vector<128x128xf32>
    %24 = arith.select %21, %19, %23 : vector<128x128xi1>, vector<128x128xf32>
    %cst_15 = arith.constant -1.000000e+30 : f32
    %25 = vector.broadcast %cst_15 : f32 to vector<128x128xf32>
    %26 = arith.select %3, %24, %25 : vector<128x128xi1>, vector<128x128xf32>
    %cst_16 = arith.constant dense<0xFF800000> : vector<128xf32>
    %27 = vector.multi_reduction <maximumf>, %26, %cst_16 [1] : vector<128x128xf32> to vector<128xf32>
    %28 = vector.shape_cast %27 : vector<128xf32> to vector<128x1xf32>
    %29 = vector.broadcast %28 : vector<128x1xf32> to vector<128x128xf32>
    %30 = arith.subf %26, %29 : vector<128x128xf32>
    %31 = math.exp %30 : vector<128x128xf32>
    %cst_17 = arith.constant dense<0.000000e+00> : vector<128xf32>
    %32 = vector.multi_reduction <add>, %31, %cst_17 [1] : vector<128x128xf32> to vector<128xf32>
    %33 = vector.shape_cast %32 : vector<128xf32> to vector<128x1xf32>
    %34 = tpu.reciprocal %33 {approx = true} : vector<128x1xf32> -> vector<128x1xf32>
    %35 = vector.broadcast %34 : vector<128x1xf32> to vector<128x128xf32>
    %36 = arith.mulf %31, %35 : vector<128x128xf32>
    %37 = vector.extract_strided_slice %11 {offsets = [0, 0], sizes = [128, 16], strides = [1, 1]} : vector<128x64xf32> to vector<128x16xf32>
    %38 = arith.truncf %36 : vector<128x128xf32> to vector<128x128xbf16>
    %39 = arith.truncf %37 : vector<128x16xf32> to vector<128x16xbf16>
    %cst_18 = arith.constant dense<0.000000e+00> : vector<128x16xf32>
    %40 = tpu.matmul %38, %39, %cst_18 {dimension_numbers = #tpu.dot_dimension_numbers<[1], [0], [0], [1], [0, 0, 1, 1], [], []>} : vector<128x128xbf16>, vector<128x16xbf16>, vector<128x16xf32> -> vector<128x16xf32>
    %41 = vector.extract_strided_slice %13 {offsets = [0, 1], sizes = [128, 1], strides = [1, 1]} : vector<128x4xf32> to vector<128x1xf32>
    %42 = vector.extract_strided_slice %14 {offsets = [1, 0], sizes = [1, 128], strides = [1, 1]} : vector<4x128xf32> to vector<1x128xf32>
    %43 = vector.broadcast %41 : vector<128x1xf32> to vector<128x128xf32>
    %44 = vector.broadcast %42 : vector<1x128xf32> to vector<128x128xf32>
    %45 = arith.addf %43, %44 : vector<128x128xf32>
    %cst_19 = arith.constant 0.000000e+00 : f32
    %46 = vector.broadcast %cst_19 : f32 to vector<128x128xf32>
    %47 = arith.cmpf ogt, %45, %46 : vector<128x128xf32>
    %cst_20 = arith.constant 2.000000e-01 : f32
    %48 = vector.broadcast %cst_20 : f32 to vector<128x128xf32>
    %49 = arith.mulf %48, %45 : vector<128x128xf32>
    %50 = arith.select %47, %45, %49 : vector<128x128xi1>, vector<128x128xf32>
    %cst_21 = arith.constant -1.000000e+30 : f32
    %51 = vector.broadcast %cst_21 : f32 to vector<128x128xf32>
    %52 = arith.select %3, %50, %51 : vector<128x128xi1>, vector<128x128xf32>
    %cst_22 = arith.constant dense<0xFF800000> : vector<128xf32>
    %53 = vector.multi_reduction <maximumf>, %52, %cst_22 [1] : vector<128x128xf32> to vector<128xf32>
    %54 = vector.shape_cast %53 : vector<128xf32> to vector<128x1xf32>
    %55 = vector.broadcast %54 : vector<128x1xf32> to vector<128x128xf32>
    %56 = arith.subf %52, %55 : vector<128x128xf32>
    %57 = math.exp %56 : vector<128x128xf32>
    %cst_23 = arith.constant dense<0.000000e+00> : vector<128xf32>
    %58 = vector.multi_reduction <add>, %57, %cst_23 [1] : vector<128x128xf32> to vector<128xf32>
    %59 = vector.shape_cast %58 : vector<128xf32> to vector<128x1xf32>
    %60 = tpu.reciprocal %59 {approx = true} : vector<128x1xf32> -> vector<128x1xf32>
    %61 = vector.broadcast %60 : vector<128x1xf32> to vector<128x128xf32>
    %62 = arith.mulf %57, %61 : vector<128x128xf32>
    %63 = vector.extract_strided_slice %11 {offsets = [0, 16], sizes = [128, 16], strides = [1, 1]} : vector<128x64xf32> to vector<128x16xf32>
    %64 = arith.truncf %62 : vector<128x128xf32> to vector<128x128xbf16>
    %65 = arith.truncf %63 : vector<128x16xf32> to vector<128x16xbf16>
    %cst_24 = arith.constant dense<0.000000e+00> : vector<128x16xf32>
    %66 = tpu.matmul %64, %65, %cst_24 {dimension_numbers = #tpu.dot_dimension_numbers<[1], [0], [0], [1], [0, 0, 1, 1], [], []>} : vector<128x128xbf16>, vector<128x16xbf16>, vector<128x16xf32> -> vector<128x16xf32>
    %67 = vector.extract_strided_slice %13 {offsets = [0, 2], sizes = [128, 1], strides = [1, 1]} : vector<128x4xf32> to vector<128x1xf32>
    %68 = vector.extract_strided_slice %14 {offsets = [2, 0], sizes = [1, 128], strides = [1, 1]} : vector<4x128xf32> to vector<1x128xf32>
    %69 = vector.broadcast %67 : vector<128x1xf32> to vector<128x128xf32>
    %70 = vector.broadcast %68 : vector<1x128xf32> to vector<128x128xf32>
    %71 = arith.addf %69, %70 : vector<128x128xf32>
    %cst_25 = arith.constant 0.000000e+00 : f32
    %72 = vector.broadcast %cst_25 : f32 to vector<128x128xf32>
    %73 = arith.cmpf ogt, %71, %72 : vector<128x128xf32>
    %cst_26 = arith.constant 2.000000e-01 : f32
    %74 = vector.broadcast %cst_26 : f32 to vector<128x128xf32>
    %75 = arith.mulf %74, %71 : vector<128x128xf32>
    %76 = arith.select %73, %71, %75 : vector<128x128xi1>, vector<128x128xf32>
    %cst_27 = arith.constant -1.000000e+30 : f32
    %77 = vector.broadcast %cst_27 : f32 to vector<128x128xf32>
    %78 = arith.select %3, %76, %77 : vector<128x128xi1>, vector<128x128xf32>
    %cst_28 = arith.constant dense<0xFF800000> : vector<128xf32>
    %79 = vector.multi_reduction <maximumf>, %78, %cst_28 [1] : vector<128x128xf32> to vector<128xf32>
    %80 = vector.shape_cast %79 : vector<128xf32> to vector<128x1xf32>
    %81 = vector.broadcast %80 : vector<128x1xf32> to vector<128x128xf32>
    %82 = arith.subf %78, %81 : vector<128x128xf32>
    %83 = math.exp %82 : vector<128x128xf32>
    %cst_29 = arith.constant dense<0.000000e+00> : vector<128xf32>
    %84 = vector.multi_reduction <add>, %83, %cst_29 [1] : vector<128x128xf32> to vector<128xf32>
    %85 = vector.shape_cast %84 : vector<128xf32> to vector<128x1xf32>
    %86 = tpu.reciprocal %85 {approx = true} : vector<128x1xf32> -> vector<128x1xf32>
    %87 = vector.broadcast %86 : vector<128x1xf32> to vector<128x128xf32>
    %88 = arith.mulf %83, %87 : vector<128x128xf32>
    %89 = vector.extract_strided_slice %11 {offsets = [0, 32], sizes = [128, 16], strides = [1, 1]} : vector<128x64xf32> to vector<128x16xf32>
    %90 = arith.truncf %88 : vector<128x128xf32> to vector<128x128xbf16>
    %91 = arith.truncf %89 : vector<128x16xf32> to vector<128x16xbf16>
    %cst_30 = arith.constant dense<0.000000e+00> : vector<128x16xf32>
    %92 = tpu.matmul %90, %91, %cst_30 {dimension_numbers = #tpu.dot_dimension_numbers<[1], [0], [0], [1], [0, 0, 1, 1], [], []>} : vector<128x128xbf16>, vector<128x16xbf16>, vector<128x16xf32> -> vector<128x16xf32>
    %93 = vector.extract_strided_slice %13 {offsets = [0, 3], sizes = [128, 1], strides = [1, 1]} : vector<128x4xf32> to vector<128x1xf32>
    %94 = vector.extract_strided_slice %14 {offsets = [3, 0], sizes = [1, 128], strides = [1, 1]} : vector<4x128xf32> to vector<1x128xf32>
    %95 = vector.broadcast %93 : vector<128x1xf32> to vector<128x128xf32>
    %96 = vector.broadcast %94 : vector<1x128xf32> to vector<128x128xf32>
    %97 = arith.addf %95, %96 : vector<128x128xf32>
    %cst_31 = arith.constant 0.000000e+00 : f32
    %98 = vector.broadcast %cst_31 : f32 to vector<128x128xf32>
    %99 = arith.cmpf ogt, %97, %98 : vector<128x128xf32>
    %cst_32 = arith.constant 2.000000e-01 : f32
    %100 = vector.broadcast %cst_32 : f32 to vector<128x128xf32>
    %101 = arith.mulf %100, %97 : vector<128x128xf32>
    %102 = arith.select %99, %97, %101 : vector<128x128xi1>, vector<128x128xf32>
    %cst_33 = arith.constant -1.000000e+30 : f32
    %103 = vector.broadcast %cst_33 : f32 to vector<128x128xf32>
    %104 = arith.select %3, %102, %103 : vector<128x128xi1>, vector<128x128xf32>
    %cst_34 = arith.constant dense<0xFF800000> : vector<128xf32>
    %105 = vector.multi_reduction <maximumf>, %104, %cst_34 [1] : vector<128x128xf32> to vector<128xf32>
    %106 = vector.shape_cast %105 : vector<128xf32> to vector<128x1xf32>
    %107 = vector.broadcast %106 : vector<128x1xf32> to vector<128x128xf32>
    %108 = arith.subf %104, %107 : vector<128x128xf32>
    %109 = math.exp %108 : vector<128x128xf32>
    %cst_35 = arith.constant dense<0.000000e+00> : vector<128xf32>
    %110 = vector.multi_reduction <add>, %109, %cst_35 [1] : vector<128x128xf32> to vector<128xf32>
    %111 = vector.shape_cast %110 : vector<128xf32> to vector<128x1xf32>
    %112 = tpu.reciprocal %111 {approx = true} : vector<128x1xf32> -> vector<128x1xf32>
    %113 = vector.broadcast %112 : vector<128x1xf32> to vector<128x128xf32>
    %114 = arith.mulf %109, %113 : vector<128x128xf32>
    %115 = vector.extract_strided_slice %11 {offsets = [0, 48], sizes = [128, 16], strides = [1, 1]} : vector<128x64xf32> to vector<128x16xf32>
    %116 = arith.truncf %114 : vector<128x128xf32> to vector<128x128xbf16>
    %117 = arith.truncf %115 : vector<128x16xf32> to vector<128x16xbf16>
    %cst_36 = arith.constant dense<0.000000e+00> : vector<128x16xf32>
    %118 = tpu.matmul %116, %117, %cst_36 {dimension_numbers = #tpu.dot_dimension_numbers<[1], [0], [0], [1], [0, 0, 1, 1], [], []>} : vector<128x128xbf16>, vector<128x16xbf16>, vector<128x16xf32> -> vector<128x16xf32>
    %119 = tpu.concatenate %40, %66, %92, %118 in 1 : vector<128x16xf32>, vector<128x16xf32>, vector<128x16xf32>, vector<128x16xf32> -> vector<128x64xf32>
    %120 = vector.broadcast %8 : vector<1x64xf32> to vector<128x64xf32>
    %121 = arith.addf %119, %120 : vector<128x64xf32>
    %cst_37 = arith.constant 0.000000e+00 : f32
    %122 = vector.broadcast %cst_37 : f32 to vector<128x64xf32>
    %123 = arith.maximumf %121, %122 : vector<128x64xf32>
    %c0_38 = arith.constant 0 : index
    %c0_39 = arith.constant 0 : index
    %124 = vector.load %arg6[%c0_38, %c0_39] : memref<64x8xf32, #tpu.memory_space<vmem>>, vector<64x8xf32>
    %c0_40 = arith.constant 0 : index
    %c0_41 = arith.constant 0 : index
    %125 = vector.load %arg7[%c0_40, %c0_41] : memref<8x1xf32, #tpu.memory_space<vmem>>, vector<8x1xf32>
    %c0_42 = arith.constant 0 : index
    %c0_43 = arith.constant 0 : index
    %126 = vector.load %arg8[%c0_42, %c0_43] : memref<8x1xf32, #tpu.memory_space<vmem>>, vector<8x1xf32>
    %c0_44 = arith.constant 0 : index
    %c0_45 = arith.constant 0 : index
    %127 = vector.load %arg9[%c0_44, %c0_45] : memref<1x8xf32, #tpu.memory_space<vmem>>, vector<1x8xf32>
    %128 = arith.truncf %123 : vector<128x64xf32> to vector<128x64xbf16>
    %129 = arith.truncf %124 : vector<64x8xf32> to vector<64x8xbf16>
    %cst_46 = arith.constant dense<0.000000e+00> : vector<128x8xf32>
    %130 = tpu.matmul %128, %129, %cst_46 {dimension_numbers = #tpu.dot_dimension_numbers<[1], [0], [0], [1], [0, 0, 1, 1], [], []>} : vector<128x64xbf16>, vector<64x8xbf16>, vector<128x8xf32> -> vector<128x8xf32>
    %cst_47 = arith.constant dense<0.000000e+00> : vector<128x1xf32>
    %131 = tpu.matmul %130, %125, %cst_47 {dimension_numbers = #tpu.dot_dimension_numbers<[1], [0], [0], [1], [0, 0, 1, 1], [], []>} : vector<128x8xf32>, vector<8x1xf32>, vector<128x1xf32> -> vector<128x1xf32>
    %cst_48 = arith.constant dense<0.000000e+00> : vector<128x1xf32>
    %132 = tpu.matmul %130, %126, %cst_48 {dimension_numbers = #tpu.dot_dimension_numbers<[1], [0], [0], [1], [0, 0, 1, 1], [], []>} : vector<128x8xf32>, vector<8x1xf32>, vector<128x1xf32> -> vector<128x1xf32>
    %133 = tpu.transpose %131, [1, 0] : vector<128x1xf32> -> vector<1x128xf32>
    %134 = vector.broadcast %132 : vector<128x1xf32> to vector<128x128xf32>
    %135 = vector.broadcast %133 : vector<1x128xf32> to vector<128x128xf32>
    %136 = arith.addf %134, %135 : vector<128x128xf32>
    %cst_49 = arith.constant 0.000000e+00 : f32
    %137 = vector.broadcast %cst_49 : f32 to vector<128x128xf32>
    %138 = arith.cmpf ogt, %136, %137 : vector<128x128xf32>
    %cst_50 = arith.constant 2.000000e-01 : f32
    %139 = vector.broadcast %cst_50 : f32 to vector<128x128xf32>
    %140 = arith.mulf %139, %136 : vector<128x128xf32>
    %141 = arith.select %138, %136, %140 : vector<128x128xi1>, vector<128x128xf32>
    %cst_51 = arith.constant -1.000000e+30 : f32
    %142 = vector.broadcast %cst_51 : f32 to vector<128x128xf32>
    %143 = arith.select %3, %141, %142 : vector<128x128xi1>, vector<128x128xf32>
    %cst_52 = arith.constant dense<0xFF800000> : vector<128xf32>
    %144 = vector.multi_reduction <maximumf>, %143, %cst_52 [1] : vector<128x128xf32> to vector<128xf32>
    %145 = vector.shape_cast %144 : vector<128xf32> to vector<128x1xf32>
    %146 = vector.broadcast %145 : vector<128x1xf32> to vector<128x128xf32>
    %147 = arith.subf %143, %146 : vector<128x128xf32>
    %148 = math.exp %147 : vector<128x128xf32>
    %cst_53 = arith.constant dense<0.000000e+00> : vector<128xf32>
    %149 = vector.multi_reduction <add>, %148, %cst_53 [1] : vector<128x128xf32> to vector<128xf32>
    %150 = vector.shape_cast %149 : vector<128xf32> to vector<128x1xf32>
    %151 = tpu.reciprocal %150 {approx = true} : vector<128x1xf32> -> vector<128x1xf32>
    %152 = vector.broadcast %151 : vector<128x1xf32> to vector<128x128xf32>
    %153 = arith.mulf %148, %152 : vector<128x128xf32>
    %154 = arith.truncf %153 : vector<128x128xf32> to vector<128x128xbf16>
    %155 = arith.truncf %130 : vector<128x8xf32> to vector<128x8xbf16>
    %cst_54 = arith.constant dense<0.000000e+00> : vector<128x8xf32>
    %156 = tpu.matmul %154, %155, %cst_54 {dimension_numbers = #tpu.dot_dimension_numbers<[1], [0], [0], [1], [0, 0, 1, 1], [], []>} : vector<128x128xbf16>, vector<128x8xbf16>, vector<128x8xf32> -> vector<128x8xf32>
    %157 = vector.broadcast %127 : vector<1x8xf32> to vector<128x8xf32>
    %158 = arith.addf %156, %157 : vector<128x8xf32>
    %cst_55 = arith.constant dense<0xFF800000> : vector<128xf32>
    %159 = vector.multi_reduction <maximumf>, %158, %cst_55 [1] : vector<128x8xf32> to vector<128xf32>
    %160 = vector.shape_cast %159 : vector<128xf32> to vector<128x1xf32>
    %161 = vector.broadcast %160 : vector<128x1xf32> to vector<128x8xf32>
    %162 = arith.subf %158, %161 : vector<128x8xf32>
    %163 = math.exp %162 : vector<128x8xf32>
    %cst_56 = arith.constant dense<0.000000e+00> : vector<128xf32>
    %164 = vector.multi_reduction <add>, %163, %cst_56 [1] : vector<128x8xf32> to vector<128xf32>
    %165 = vector.shape_cast %164 : vector<128xf32> to vector<128x1xf32>
    %166 = math.log %165 : vector<128x1xf32>
    %167 = vector.broadcast %166 : vector<128x1xf32> to vector<128x8xf32>
    %168 = arith.subf %162, %167 : vector<128x8xf32>
    %c0_57 = arith.constant 0 : index
    %c0_58 = arith.constant 0 : index
    %169 = vector.load %arg10[%c0_57, %c0_58] : memref<128x8xf32, #tpu.memory_space<vmem>>, vector<128x8xf32>
    tpu.vector_store %arg10[%c0_57, %c0_58], %168 {strides = array<i32>} : memref<128x8xf32, #tpu.memory_space<vmem>>, vector<128x8xf32>,
    return
  }
}

</mosaic_0001>

<bundles_post_ra>
// kernel: gat_net_forward.1
= control target key start
LH: loop header
LB: loop body
LE: loop exit
PB: predicated region body
PF: predicated region fallthrough
CT: control target
= control target key end

     0   :  { %vm7081_vm0 = vcmask 261120   ;;  %vm7078_vm1 = vcmask 523264   ;;  %s4799_s21 = smov 80   ;;  %s4806_s15 = smov 48   ;;  %s7033_s2 = inlined_call_operand.vmem [shape: f32[32,64], index: 2, kind: input, shape index: {}]   ;;  %s7034_s0 = inlined_call_operand.vmem [shape: f32[128,32], index: 0, kind: input, shape index: {}]   ;;  %s7035_s3 = inlined_call_operand.vmem [shape: f32[64,4], index: 3, kind: input, shape index: {}]   ;;  %s7036_s4 = inlined_call_operand.vmem [shape: f32[64,4], index: 4, kind: input, shape index: {}]   ;;  %s7037_s1 = inlined_call_operand.vmem [shape: s8[128,128], index: 1, kind: input, shape index: {}]   ;;  %s7038_s6 = inlined_call_operand.vmem [shape: f32[64,8], index: 6, kind: input, shape index: {}]   ;;  %s7039_s8 = inlined_call_operand.vmem [shape: f32[8,1], index: 8, kind: input, shape index: {}]   ;;  %s7040_s5 = inlined_call_operand.vmem [shape: f32[1,64], index: 5, kind: input, shape index: {}]   ;;  %s7041_s7 = inlined_call_operand.vmem [shape: f32[8,1], index: 7, kind: input, shape index: {}]   ;;  %s7042_s9 = inlined_call_operand.vmem [shape: f32[1,8], index: 9, kind: input, shape index: {}]   ;;  %s7043_s10 = inlined_call_operand.vmem [shape: f32[128,8], index: 10, kind: output, shape index: {}]  }
   0x1   :  { %v90_v0 = vld [vmem:[%s7033_s2 + $0x10] sm:$0xff]  ;;  %v91_v1 = vld [vmem:[%s7033_s2 + $0x18] sm:$0xff]  ;;  %v88_v2 = vld [vmem:[%s7033_s2] sm:$0xff] }
   0x2   :  { %v118_v3 = vpack.c.bf16 %v91_v1, %v90_v0  ;;  %v89_v4 = vld [vmem:[%s7033_s2 + $0x8] sm:$0xff]  ;;  %v72_v5 = vld [vmem:[%s7034_s0] sm:$0xff]  ;;  %v74_v12 = vld [vmem:[%s7034_s0 + $0x10] sm:$0xff]  ;;  %s4805_s2 = smov 32  }
   0x3   :  { %v73_v6 = vld [vmem:[%s7034_s0 + $0x8] sm:$0xff]  ;;  %v117_v7 = vpack.c.bf16 %v89_v4, %v88_v2  ;;  %v80_v9 = vld [vmem:[%s7034_s0 + $0x40] sm:$0xff]  ;;  %v75_v13 = vld [vmem:[%s7034_s0 + $0x18] sm:$0xff] }
   0x4   :  { %v109_v8 = vpack.c.bf16 %v73_v6, %v72_v5  ;;  %v81_v10 = vld [vmem:[%s7034_s0 + $0x48] sm:$0xff]  ;;  %4004 = vmatprep.subr.bf16.mxu0 %v118_v3  ;;  %4340 = vmatprep.subr.bf16.mxu1 %v118_v3  ;;  %v82_v14 = vld [vmem:[%s7034_s0 + $0x50] sm:$0xff]  ;;  %v83_v15 = vld [vmem:[%s7034_s0 + $0x58] sm:$0xff]  ;;  %v110_v21 = vpack.c.bf16 %v75_v13, %v74_v12  ;;  %v4800_v6 = vmov 1  }
   0x5   :  { %v113_v11 = vpack.c.bf16 %v81_v10, %v80_v9  ;;  %4005 = vmatpush3.bf16.msra.mxu0 %v118_v3  ;;  %4342 = vmatpush3.bf16.msra.mxu1 %v118_v3  ;;  %v76_v16 = vld [vmem:[%s7034_s0 + $0x20] sm:$0xff]  ;;  %v77_v17 = vld [vmem:[%s7034_s0 + $0x28] sm:$0xff]  ;;  %v99_v20 = vld [vmem:[%s7035_s3 + $0x38] sm:$0xff]  ;;  %v114_v22 = vpack.c.bf16 %v83_v15, %v82_v14 }
   0x6   :  { %4006 = vmatprep.subr.bf16.mxu0 %v117_v7  ;;  %4341 = vmatprep.subr.bf16.mxu1 %v117_v7  ;;  %v84_v18 = vld [vmem:[%s7034_s0 + $0x60] sm:$0xff]  ;;  %v85_v19 = vld [vmem:[%s7034_s0 + $0x68] sm:$0xff]  ;;  %v107_v23 = vld [vmem:[%s7036_s4 + $0x38] sm:$0xff]  ;;  %v111_v24 = vpack.c.bf16 %v77_v17, %v76_v16 }
   0x7   :  { %4008 = vmatprep.mubr.msk.bf16.mxu0 %vm7081_vm0, %v109_v8  ;;  %4016 = vmatprep.mubr.msk.bf16.mxu1 %vm7081_vm0, %v113_v11  ;;  %v115_v25 = vpack.c.bf16 %v85_v19, %v84_v18  ;;  %v78_v26 = vld [vmem:[%s7034_s0 + $0x30] sm:$0xff]  ;;  %v79_v29 = vld [vmem:[%s7034_s0 + $0x38] sm:$0xff]  ;;  %v97_v32 = vld [vmem:[%s7035_s3 + $0x28] sm:$0xff] }
   0x8   :  { %v98_v27 = vld [vmem:[%s7035_s3 + $0x30] sm:$0xff]  ;;  %v87_v31 = vld [vmem:[%s7034_s0 + $0x78] sm:$0xff]  ;;  %v105_v33 = vld [vmem:[%s7036_s4 + $0x28] sm:$0xff]  ;;  %v112_v34 = vpack.c.bf16 %v79_v29, %v78_v26  ;;  %4355 = vset.pattern.permute.xlu1 %v4800_v6 }
   0x9   :  { %4007 = vmatpush3.bf16.msra.mxu0 %v117_v7  ;;  %4343 = vmatpush3.bf16.msra.mxu1 %v117_v7  ;;  %v106_v28 = vld [vmem:[%s7036_s4 + $0x30] sm:$0xff]  ;;  %v96_v36 = vld [vmem:[%s7035_s3 + $0x20] sm:$0xff]  ;;  %v95_v38 = vld [vmem:[%s7035_s3 + $0x18] sm:$0xff]  ;;  %v4801_v7 = vmov 0  }
   0xa   :  { %4024 = vmatprep.subr.mxu1 %v99_v20  ;;  %4064 = vmatprep.subr.mxu0 %v107_v23  ;;  %v86_v30 = vld [vmem:[%s7034_s0 + $0x70] sm:$0xff]  ;;  %v104_v37 = vld [vmem:[%s7036_s4 + $0x20] sm:$0xff]  ;;  %v103_v39 = vld [vmem:[%s7036_s4 + $0x18] sm:$0xff] }
   0xb   :  { %v116_v35 = vpack.c.bf16 %v87_v31, %v86_v30  ;;  %v94_v40 = vld [vmem:[%s7035_s3 + $0x10] sm:$0xff]  ;;  %v93_v42 = vld [vmem:[%s7035_s3 + $0x8] sm:$0xff]  ;;  %v92_v44 = vld [vmem:[%s7035_s3] sm:$0xff]  ;;  %s4797_s3 = smov 112   ;;  %4354 = vset.pattern.permute.xlu0 %v4801_v7 }
   0xc   :  { %4009 = vmatmul.mubr.msk.bf16.vlgmr.msra.gmra.mxu0 %vm7081_vm0, %v110_v21  ;;  %4017 = vmatmul.mubr.msk.bf16.vlgmr.msra.gmra.mxu1 %vm7081_vm0, %v114_v22  ;;  %v102_v41 = vld [vmem:[%s7036_s4 + $0x10] sm:$0xff]  ;;  %v101_v43 = vld [vmem:[%s7036_s4 + $0x8] sm:$0xff]  ;;  %v100_v45 = vld [vmem:[%s7036_s4] sm:$0xff]  ;;  %s4798_s4 = smov 96   ;;  %v4802_v22 = vmov 2  }
   0xd   :  { %4012 = vmatprep.mubr.msk.bf16.mxu0 %vm7081_vm0, %v111_v24  ;;  %4020 = vmatprep.mubr.msk.bf16.mxu1 %vm7081_vm0, %v115_v25  ;;  %v4803_v24 = vmov 3  }
   0xe   :  { %4025 = vmatpush3.msra.mxu1 %v99_v20  ;;  %4065 = vmatpush3.msra.mxu0 %v107_v23 }
   0xf   :  { %4026 = vmatprep.subr.mxu1 %v98_v27  ;;  %4066 = vmatprep.subr.mxu0 %v106_v28 }
  0x10   :  { %4027 = vmatpush3.msra.mxu1 %v98_v27  ;;  %4067 = vmatpush3.msra.mxu0 %v106_v28 }
  0x11   :  { %4028 = vmatprep.subr.mxu1 %v97_v32  ;;  %4068 = vmatprep.subr.mxu0 %v105_v33 }
  0x12   :  { %4029 = vmatpush3.msra.mxu1 %v97_v32  ;;  %4069 = vmatpush3.msra.mxu0 %v105_v33 }
  0x13   :  { %4030 = vmatprep.subr.mxu1 %v96_v36  ;;  %4070 = vmatprep.subr.mxu0 %v104_v37 }
  0x14   :  { %4013 = vmatmul.mubr.msk.bf16.gmra.mxu0 %vm7081_vm0, %v112_v34  ;;  %4021 = vmatmul.mubr.msk.bf16.gmra.mxu1 %vm7081_vm0, %v116_v35 }
  0x15   :  { %4031 = vmatpush3.msra.mxu1 %v96_v36  ;;  %4071 = vmatpush3.msra.mxu0 %v104_v37 }
  0x16   :  { %4032 = vmatprep.subr.mxu1 %v95_v38  ;;  %4072 = vmatprep.subr.mxu0 %v103_v39 }
  0x17   :  { %4033 = vmatpush3.msra.mxu1 %v95_v38  ;;  %4073 = vmatpush3.msra.mxu0 %v103_v39 }
  0x18   :  { %4034 = vmatprep.subr.mxu1 %v94_v40  ;;  %4074 = vmatprep.subr.mxu0 %v102_v41 }
  0x19   :  { %4035 = vmatpush3.msra.mxu1 %v94_v40  ;;  %4075 = vmatpush3.msra.mxu0 %v102_v41 }
  0x1a   :  { %4036 = vmatprep.subr.mxu1 %v93_v42  ;;  %4076 = vmatprep.subr.mxu0 %v101_v43 }
  0x1b   :  { %4037 = vmatpush3.msra.mxu1 %v93_v42  ;;  %4077 = vmatpush3.msra.mxu0 %v101_v43 }
  0x1c   :  { %4038 = vmatprep.subr.mxu1 %v92_v44  ;;  %4078 = vmatprep.subr.mxu0 %v100_v45 }
  0x1d   :  { %4039 = vmatpush3.msra.mxu1 %v92_v44  ;;  %4079 = vmatpush3.msra.mxu0 %v100_v45 }
  0xcc   :  { %v4010_v46 = vpop.f32.mrf.mxu0  ;;  %v4978_v47 = vpop.f32.mrf.mxu1 }
  0xce   :  { %v178_v48 = vpop.f32.mrf.mxu0  ;;  %v210_v49 = vpop.f32.mrf.mxu1 }
  0xcf   :  { %4040 = vmatprep.mubr.msk.f32.mxu1 %vm7078_vm1, %v178_v48  ;;  %4080 = vmatprep.mubr.msk.f32.mxu0 %vm7078_vm1, %v178_v48 }
  0xd0   :  { %v4011_v50 = vpop.f32.mrf.mxu0  ;;  %v4019_v51 = vpop.f32.mrf.mxu1 }
  0xd1   :  { %v4982_v52 = vpack.c.bf16 %v4011_v50, %v4010_v46  ;;  %v4985_v53 = vpack.c.bf16 %v4019_v51, %v4978_v47 }
  0xd2   :  { %v181_v54 = vpop.f32.mrf.mxu0  ;;  %v213_v55 = vpop.f32.mrf.mxu1 }
  0xd3   :  { %7126 = vst [vmem:[#allocation2_spill] sm:$0xff] %v4982_v52  ;;  %7127 = vst [vmem:[#allocation3_spill] sm:$0xff] %v4985_v53  ;;  %1351 = vrot.lane.b32.xlu1 %v4985_v53, %s4797_s3  ;;  %1343 = vrot.lane.b32.xlu0 %v4982_v52, %s4797_s3  ;;  %v4993_v58 = vpack.c.bf16 %v181_v54, %v178_v48  ;;  %v4997_v61 = vpack.c.bf16 %v213_v55, %v210_v49 }
  0xd4   :  { %4041 = vmatmul.mubr.msk.f32.vlgmr.msra.gmra.mxu1 %vm7078_vm1, %v181_v54  ;;  %4081 = vmatmul.mubr.msk.f32.vlgmr.msra.gmra.mxu0 %vm7078_vm1, %v181_v54  ;;  %v4014_v56 = vpop.f32.mrf.mxu0  ;;  %v4022_v57 = vpop.f32.mrf.mxu1 }
  0xd5   :  { %7128 = vst [vmem:[#allocation4_spill] sm:$0xff] %v4993_v58  ;;  %4043 = vmatprep.mubr.msk.f32.mxu1 %vm7078_vm1, %v4010_v46  ;;  %4083 = vmatprep.mubr.msk.f32.mxu0 %vm7078_vm1, %v4010_v46  ;;  %7129 = vst [vmem:[#allocation5_spill] sm:$0xff] %v4997_v61 }
  0xd6   :  { %v194_v59 = vpop.f32.mrf.mxu0  ;;  %v226_v60 = vpop.f32.mrf.mxu1 }
  0xd7   :  { %1772 = vrot.lane.b32.xlu0 %v4985_v53, %s4798_s4  ;;  %1341 = vrot.lane.b32.xlu1 %v4993_v58, %s4797_s3 }
  0xd8   :  { %4044 = vmatmul.mubr.msk.f32.gmra.mxu1 %vm7078_vm1, %v4011_v50  ;;  %4084 = vmatmul.mubr.msk.f32.gmra.mxu0 %vm7078_vm1, %v4011_v50  ;;  %v4015_v62 = vpop.f32.mrf.mxu0  ;;  %v4023_v63 = vpop.f32.mrf.mxu1 }
  0xd9   :  { %v5005_v0 = vpack.c.bf16 %v4015_v62, %v4014_v56  ;;  %v935_v1 = vpack.c.bf16 %v4023_v63, %v4022_v57  ;;  %4046 = vmatprep.mubr.msk.f32.mxu1 %vm7078_vm1, %v194_v59  ;;  %4086 = vmatprep.mubr.msk.f32.mxu0 %vm7078_vm1, %v194_v59 }
  0xda   :  { %v197_v2 = vpop.f32.mrf.mxu0  ;;  %v229_v3 = vpop.f32.mrf.mxu1 }
  0xdb   :  { %7130 = vst [vmem:[#allocation6_spill] sm:$0xff] %v5005_v0  ;;  %4104 = vmatprep.subr.bf16.mxu1 %v935_v1  ;;  %1349 = vrot.lane.b32.xlu0 %v4997_v61, %s4797_s3  ;;  %v934_v4 = vpack.c.bf16 %v229_v3, %v226_v60  ;;  %v5021_v5 = vpack.c.bf16 %v197_v2, %v194_v59 }
  0xdc   :  { %1347 = vrot.lane.b32.xlu1 %v5005_v0, %s4797_s3  ;;  %4047 = vmatmul.mubr.msk.f32.gmra.mxu1 %vm7078_vm1, %v197_v2 }
  0xdd   :  { %4087 = vmatmul.mubr.msk.f32.gmra.mxu0 %vm7078_vm1, %v197_v2  ;;  %4105 = vmatpush3.bf16.msra.mxu1 %v935_v1  ;;  %7131 = vst [vmem:[#allocation7_spill] sm:$0xff] %v5021_v5 }
  0xde   :  { %4049 = vmatprep.mubr.msk.f32.mxu1 %vm7078_vm1, %v4014_v56  ;;  %4089 = vmatprep.mubr.msk.f32.mxu0 %vm7078_vm1, %v4014_v56 }
  0xdf   :  { %1355 = vrot.lane.b32.xlu0 %v935_v1, %s4797_s3  ;;  %4106 = vmatprep.subr.bf16.mxu1 %v934_v4 }
  0xe0   :  { %2197 = vrot.lane.b32.xlu1 %v935_v1, %s4799_s21  ;;  %4050 = vmatmul.mubr.msk.f32.gmra.mxu1 %vm7078_vm1, %v4015_v62 }
  0xe1   :  { %4090 = vmatmul.mubr.msk.f32.gmra.mxu0 %vm7078_vm1, %v4015_v62  ;;  %4107 = vmatpush3.bf16.msra.mxu1 %v934_v4 }
  0xe2   :  { %4108 = vmatprep.subr.bf16.mxu1 %v4985_v53  ;;  %4052 = vmatprep.mubr.msk.f32.mxu1 %vm7078_vm1, %v210_v49 }
  0xe3   :  { %1776 = vrot.lane.b32.xlu0 %v935_v1, %s4798_s4  ;;  %4092 = vmatprep.mubr.msk.f32.mxu0 %vm7078_vm1, %v210_v49 }
  0xe4   :  { %1345 = vrot.lane.b32.xlu1 %v5021_v5, %s4797_s3  ;;  %4053 = vmatmul.mubr.msk.f32.gmra.mxu1 %vm7078_vm1, %v213_v55 }
  0xe5   :  { %4109 = vmatpush3.bf16.msra.mxu1 %v4985_v53  ;;  %4093 = vmatmul.mubr.msk.f32.gmra.mxu0 %vm7078_vm1, %v213_v55 }
  0xe6   :  { %4110 = vmatprep.subr.bf16.mxu1 %v4997_v61  ;;  %4055 = vmatprep.mubr.msk.f32.mxu1 %vm7078_vm1, %v4978_v47 }
  0xe7   :  { %1353 = vrot.lane.b32.xlu0 %v934_v4, %s4797_s3  ;;  %4095 = vmatprep.mubr.msk.f32.mxu0 %vm7078_vm1, %v4978_v47 }
  0xe8   :  { %4056 = vmatmul.mubr.msk.f32.gmra.mxu1 %vm7078_vm1, %v4019_v51 }
  0xe9   :  { %4111 = vmatpush3.bf16.msra.mxu1 %v4997_v61  ;;  %4096 = vmatmul.mubr.msk.f32.gmra.mxu0 %vm7078_vm1, %v4019_v51 }
  0xea   :  { %4112 = vmatprep.subr.bf16.mxu1 %v5005_v0  ;;  %4058 = vmatprep.mubr.msk.f32.mxu1 %vm7078_vm1, %v226_v60 }
  0xeb   :  { %4098 = vmatprep.mubr.msk.f32.mxu0 %vm7078_vm1, %v226_v60  ;;  %1774 = vrot.lane.b32.xlu0 %v934_v4, %s4798_s4 }
  0xec   :  { %4059 = vmatmul.mubr.msk.f32.gmra.mxu1 %vm7078_vm1, %v229_v3 }
  0xed   :  { %4113 = vmatpush3.bf16.msra.mxu1 %v5005_v0  ;;  %4099 = vmatmul.mubr.msk.f32.gmra.mxu0 %vm7078_vm1, %v229_v3 }
  0xee   :  { %4114 = vmatprep.subr.bf16.mxu1 %v5021_v5  ;;  %4061 = vmatprep.mubr.msk.f32.mxu1 %vm7078_vm1, %v4022_v57 }
  0xef   :  { %4101 = vmatprep.mubr.msk.f32.mxu0 %vm7078_vm1, %v4022_v57  ;;  %2195 = vrot.lane.b32.xlu0 %v934_v4, %s4799_s21 }
  0xf0   :  { %4062 = vmatmul.mubr.msk.f32.gmra.mxu1 %vm7078_vm1, %v4023_v63 }
  0xf1   :  { %4115 = vmatpush3.bf16.msra.mxu1 %v5021_v5  ;;  %4102 = vmatmul.mubr.msk.f32.gmra.mxu0 %vm7078_vm1, %v4023_v63 }
  0xf2   :  { %4116 = vmatprep.subr.bf16.mxu1 %v4982_v52 }
  0xf5   :  { %4117 = vmatpush3.bf16.msra.mxu1 %v4982_v52 }
  0xf6   :  { %4118 = vmatprep.subr.bf16.mxu1 %v4993_v58 }
  0xf9   :  { %4119 = vmatpush3.bf16.msra.mxu1 %v4993_v58 }
 0x145   :  { %v1344_v8 = vpop.permute.xlu0 %1343  ;;  %v1352_v11 = vpop.permute.xlu1 %1351 }
 0x149   :  { %v5061_v9 = vpop.permute.xlu0 %1772  ;;  %v1342_v13 = vpop.permute.xlu1 %1341 }
 0x14a   :  { %7132 = vst [vmem:[#allocation8_spill] sm:$0xff] %v5061_v9 }
 0x14d   :  { %v1350_v10 = vpop.permute.xlu0 %1349 }
 0x14e   :  { %v1348_v16 = vpop.permute.xlu1 %1347 }
 0x151   :  { %v1356_v12 = vpop.permute.xlu0 %1355 }
 0x152   :  { %4136 = vmatprep.subr.bf16.mxu0 %v1356_v12  ;;  %v5066_v17 = vpop.permute.xlu1 %2197 }
 0x153   :  { %4137 = vmatpush3.bf16.msra.mxu0 %v1356_v12  ;;  %7134 = vst [vmem:[#allocation10_spill] sm:$0xff] %v5066_v17 }
 0x155   :  { %v5063_v14 = vpop.permute.xlu0 %1776 }
 0x156   :  { %7133 = vst [vmem:[#allocation9_spill] sm:$0xff] %v5063_v14  ;;  %4168 = vmatprep.subr.bf16.mxu1 %v5063_v14  ;;  %v1346_v18 = vpop.permute.xlu1 %1345 }
 0x159   :  { %v1354_v15 = vpop.permute.xlu0 %1353 }
 0x15a   :  { %4138 = vmatprep.subr.bf16.mxu0 %v1354_v15 }
 0x15b   :  { %4139 = vmatpush3.bf16.msra.mxu0 %v1354_v15 }
 0x15c   :  { %4140 = vmatprep.subr.bf16.mxu0 %v1352_v11 }
 0x15d   :  { %v5156_v38 = vpop.permute.xlu0 %1774 }
 0x15e   :  { %7135 = vst [vmem:[#allocation11_spill] sm:$0xff] %v5156_v38 }
 0x15f   :  { %4141 = vmatpush3.bf16.msra.mxu0 %v1352_v11 }
 0x160   :  { %4142 = vmatprep.subr.bf16.mxu0 %v1350_v10 }
 0x161   :  { %v5162_v40 = vpop.permute.xlu0 %2195 }
 0x162   :  { %7136 = vst [vmem:[#allocation12_spill] sm:$0xff] %v5162_v40 }
 0x163   :  { %4143 = vmatpush3.bf16.msra.mxu0 %v1350_v10 }
 0x164   :  { %4144 = vmatprep.subr.bf16.mxu0 %v1348_v16 }
 0x167   :  { %4145 = vmatpush3.bf16.msra.mxu0 %v1348_v16 }
 0x168   :  { %4146 = vmatprep.subr.bf16.mxu0 %v1346_v18 }
 0x16b   :  { %4147 = vmatpush3.bf16.msra.mxu0 %v1346_v18 }
 0x16c   :  { %4148 = vmatprep.subr.bf16.mxu0 %v1344_v8 }
 0x16f   :  { %4149 = vmatpush3.bf16.msra.mxu0 %v1344_v8 }
 0x170   :  { %4150 = vmatprep.subr.bf16.mxu0 %v1342_v13 }
 0x173   :  { %4151 = vmatpush3.bf16.msra.mxu0 %v1342_v13 }
 0x174   :  { %4200 = vmatprep.subr.bf16.mxu0 %v5066_v17  ;;  %v7142_v17 = vmov 0 }
 0x194   :  { %v4082_v19 = vpop.f32.mrf.mxu0  ;;  %v4042_v42 = vpop.f32.mrf.mxu1 }
 0x195   :  { %1038 = vperm.xlu1 %4355, %v4082_v19   ;;  %619 = vperm.xlu0 %4354, %v4082_v19  }
 0x196   :  { %v501_v20 = vpop.f32.mrf.mxu0  ;;  %v356_v44 = vpop.f32.mrf.mxu1 }
 0x198   :  { %v4085_v21 = vpop.f32.mrf.mxu0  ;;  %v4045_v46 = vpop.f32.mrf.mxu1 }
 0x199   :  { %4362 = vset.pattern.permute.xlu1 %v4801_v7  ;;  %4356 = vset.pattern.permute.xlu0 %v4802_v22 }
 0x19a   :  { %1467 = vperm.xlu0 %4356, %v4082_v19   ;;  %629 = vperm.xlu1 %4362, %v4085_v21   ;;  %v511_v23 = vpop.f32.mrf.mxu0  ;;  %v366_v49 = vpop.f32.mrf.mxu1 }
 0x19c   :  { %v4048_v51 = vpop.f32.mrf.mxu1 }
 0x19d   :  { %v4088_v25 = vpop.f32.mrf.mxu0 }
 0x19e   :  { %4357 = vset.pattern.permute.xlu0 %v4803_v24  ;;  %624 = vperm.xlu1 %4362, %v511_v23   ;;  %v376_v55 = vpop.f32.mrf.mxu1 }
 0x19f   :  { %1888 = vperm.xlu0 %4357, %v4082_v19   ;;  %v521_v26 = vpop.f32.mrf.mxu0 }
 0x1a0   :  { %v4051_v59 = vpop.f32.mrf.mxu1 }
 0x1a1   :  { %v5077_v27 = vpop.f32.mrf.mxu0 }
 0x1a2   :  { %4366 = vset.pattern.permute.xlu1 %v4800_v6  ;;  %v386_v62 = vpop.f32.mrf.mxu1 }
 0x1a3   :  { %4358 = vset.pattern.permute.xlu0 %v4801_v7  ;;  %1042 = vperm.xlu1 %4366, %v511_v23   ;;  %v5081_v28 = vpop.f32.mrf.mxu0 }
 0x1a4   :  { %614 = vperm.xlu0 %4358, %v501_v20   ;;  %v4054_v1 = vpop.f32.mrf.mxu1 }
 0x1a5   :  { %v5087_v29 = vpop.f32.mrf.mxu0 }
 0x1a6   :  { %v396_v4 = vpop.f32.mrf.mxu1 }
 0x1a7   :  { %1054 = vperm.xlu1 %4366, %v4088_v25   ;;  %v5091_v30 = vpop.f32.mrf.mxu0 }
 0x1a8   :  { %4359 = vset.pattern.permute.xlu0 %v4800_v6  ;;  %v4057_v10 = vpop.f32.mrf.mxu1 }
 0x1a9   :  { %1034 = vperm.xlu0 %4359, %v501_v20   ;;  %v5099_v31 = vpop.f32.mrf.mxu0 }
 0x1aa   :  { %v406_v12 = vpop.f32.mrf.mxu1 }
 0x1ab   :  { %4372 = vset.pattern.permute.xlu1 %v4801_v7  ;;  %v5104_v32 = vpop.f32.mrf.mxu0 }
 0x1ac   :  { %634 = vperm.xlu1 %4372, %v521_v26   ;;  %v4060_v16 = vpop.f32.mrf.mxu1 }
 0x1ad   :  { %4360 = vset.pattern.permute.xlu0 %v4802_v22  ;;  %v5111_v33 = vpop.f32.mrf.mxu0 }
 0x1ae   :  { %1463 = vperm.xlu0 %4360, %v501_v20   ;;  %v416_v19 = vpop.f32.mrf.mxu1 }
 0x1af   :  { %v5115_v34 = vpop.f32.mrf.mxu0 }
 0x1b0   :  { %649 = vperm.xlu1 %4372, %v5077_v27  }
 0x1b1   :  { %v5123_v35 = vpop.f32.mrf.mxu0 }
 0x1b2   :  { %4361 = vset.pattern.permute.xlu0 %v4803_v24 }
 0x1b3   :  { %1884 = vperm.xlu0 %4361, %v501_v20   ;;  %v571_v36 = vpop.f32.mrf.mxu0 }
 0x1b4   :  { %644 = vperm.xlu1 %4372, %v5081_v28  }
 0x1b7   :  { %4363 = vset.pattern.permute.xlu0 %v4800_v6 }
 0x1b8   :  { %1046 = vperm.xlu0 %4363, %v4085_v21   ;;  %4379 = vset.pattern.permute.xlu1 %v4800_v6 }
 0x1b9   :  { %1058 = vperm.xlu1 %4379, %v5081_v28  }
 0x1bc   :  { %4364 = vset.pattern.permute.xlu0 %v4802_v22 }
 0x1bd   :  { %1475 = vperm.xlu0 %4364, %v4085_v21   ;;  %1070 = vperm.xlu1 %4379, %v5087_v29  }
 0x1c1   :  { %4365 = vset.pattern.permute.xlu0 %v4803_v24  ;;  %4385 = vset.pattern.permute.xlu1 %v4801_v7 }
 0x1c2   :  { %1896 = vperm.xlu0 %4365, %v4085_v21   ;;  %654 = vperm.xlu1 %4385, %v5091_v30  }
 0x1c6   :  { %4367 = vset.pattern.permute.xlu0 %v4802_v22  ;;  %4388 = vset.pattern.permute.xlu1 %v4803_v24 }
 0x1c7   :  { %1471 = vperm.xlu0 %4367, %v511_v23   ;;  %1916 = vperm.xlu1 %4388, %v5091_v30  }
 0x1cb   :  { %4368 = vset.pattern.permute.xlu0 %v4803_v24  ;;  %4389 = vset.pattern.permute.xlu1 %v4801_v7 }
 0x1cc   :  { %1892 = vperm.xlu0 %4368, %v511_v23   ;;  %669 = vperm.xlu1 %4389, %v5099_v31  }
 0x1d0   :  { %4369 = vset.pattern.permute.xlu0 %v4801_v7  ;;  %664 = vperm.xlu1 %4389, %v5104_v32  }
 0x1d1   :  { %639 = vperm.xlu0 %4369, %v4088_v25  }
 0x1d4   :  { %4393 = vset.pattern.permute.xlu1 %v4800_v6 }
 0x1d5   :  { %4370 = vset.pattern.permute.xlu0 %v4802_v22  ;;  %1074 = vperm.xlu1 %4393, %v5104_v32  }
 0x1d6   :  { %1483 = vperm.xlu0 %4370, %v4088_v25  }
 0x1d9   :  { %1086 = vperm.xlu1 %4393, %v5111_v33  }
 0x1da   :  { %4371 = vset.pattern.permute.xlu0 %v4803_v24 }
 0x1db   :  { %1904 = vperm.xlu0 %4371, %v4088_v25  }
 0x1dd   :  { %4399 = vset.pattern.permute.xlu1 %v4801_v7 }
 0x1de   :  { %674 = vperm.xlu1 %4399, %v5115_v34  }
 0x1df   :  { %4373 = vset.pattern.permute.xlu0 %v4800_v6 }
 0x1e0   :  { %1050 = vperm.xlu0 %4373, %v521_v26  }
 0x1e2   :  { %4402 = vset.pattern.permute.xlu1 %v4803_v24 }
 0x1e3   :  { %1932 = vperm.xlu1 %4402, %v5115_v34  }
 0x1e4   :  { %4374 = vset.pattern.permute.xlu0 %v4802_v22 }
 0x1e5   :  { %1479 = vperm.xlu0 %4374, %v521_v26  }
 0x1e7   :  { %4403 = vset.pattern.permute.xlu1 %v4801_v7 }
 0x1e8   :  { %689 = vperm.xlu1 %4403, %v5123_v35  }
 0x1e9   :  { %4375 = vset.pattern.permute.xlu0 %v4803_v24 }
 0x1ea   :  { %1900 = vperm.xlu0 %4375, %v521_v26  }
 0x1ec   :  { %4406 = vset.pattern.permute.xlu1 %v4803_v24 }
 0x1ed   :  { %1944 = vperm.xlu1 %4406, %v5123_v35  }
 0x1ee   :  { %4376 = vset.pattern.permute.xlu0 %v4800_v6 }
 0x1ef   :  { %1062 = vperm.xlu0 %4376, %v5077_v27  }
 0x1f1   :  { %4407 = vset.pattern.permute.xlu1 %v4801_v7 }
 0x1f2   :  { %684 = vperm.xlu1 %4407, %v571_v36  }
 0x1f3   :  { %4377 = vset.pattern.permute.xlu0 %v4802_v22 }
 0x1f4   :  { %1491 = vperm.xlu0 %4377, %v5077_v27  }
 0x1f6   :  { %4408 = vset.pattern.permute.xlu1 %v4800_v6 }
 0x1f7   :  { %1090 = vperm.xlu1 %4408, %v571_v36  }
 0x1f8   :  { %4378 = vset.pattern.permute.xlu0 %v4803_v24 }
 0x1f9   :  { %1912 = vperm.xlu0 %4378, %v5077_v27  }
 0x1fb   :  { %4409 = vset.pattern.permute.xlu1 %v4802_v22 }
 0x1fc   :  { %1519 = vperm.xlu1 %4409, %v571_v36  }
 0x1fd   :  { %4380 = vset.pattern.permute.xlu0 %v4802_v22 }
 0x1fe   :  { %1487 = vperm.xlu0 %4380, %v5081_v28  }
 0x200   :  { %4410 = vset.pattern.permute.xlu1 %v4803_v24 }
 0x201   :  { %1940 = vperm.xlu1 %4410, %v571_v36  }
 0x202   :  { %4381 = vset.pattern.permute.xlu0 %v4803_v24 }
 0x203   :  { %1908 = vperm.xlu0 %4381, %v5081_v28  }
 0x207   :  { %4382 = vset.pattern.permute.xlu0 %v4801_v7 }
 0x208   :  { %659 = vperm.xlu0 %4382, %v5087_v29  }
 0x20c   :  { %4383 = vset.pattern.permute.xlu0 %v4802_v22 }
 0x20d   :  { %1499 = vperm.xlu0 %4383, %v5087_v29  }
 0x210   :  { %v5152_v37 = vpop.permute.xlu1 %1038  ;;  %v5168_v43 = vpop.permute.xlu0 %619 }
 0x211   :  { %4384 = vset.pattern.permute.xlu0 %v4803_v24 }
 0x212   :  { %1920 = vperm.xlu0 %4384, %v5087_v29  }
 0x215   :  { %v5158_v39 = vpop.permute.xlu1 %629  ;;  %v5174_v47 = vpop.permute.xlu0 %1467 }
 0x216   :  { %4386 = vset.pattern.permute.xlu0 %v4800_v6 }
 0x217   :  { %1066 = vperm.xlu0 %4386, %v5091_v30  }
 0x219   :  { %v5164_v41 = vpop.permute.xlu1 %624 }
 0x21a   :  { %v5180_v50 = vpop.permute.xlu0 %1888 }
 0x21b   :  { %4387 = vset.pattern.permute.xlu0 %v4802_v22 }
 0x21c   :  { %1495 = vperm.xlu0 %4387, %v5091_v30  }
 0x21e   :  { %v5170_v45 = vpop.permute.xlu1 %1042 }
 0x21f   :  { %v5187_v56 = vpop.permute.xlu0 %614 }
 0x220   :  { %4390 = vset.pattern.permute.xlu0 %v4800_v6 }
 0x221   :  { %1078 = vperm.xlu0 %4390, %v5099_v31  }
 0x222   :  { %v5177_v48 = vpop.permute.xlu1 %1054 }
 0x224   :  { %v5194_v60 = vpop.permute.xlu0 %1034 }
 0x225   :  { %4391 = vset.pattern.permute.xlu0 %v4802_v22 }
 0x226   :  { %1507 = vperm.xlu0 %4391, %v5099_v31  }
 0x227   :  { %v5184_v54 = vpop.permute.xlu1 %634 }
 0x229   :  { %v5200_v2 = vpop.permute.xlu0 %1463 }
 0x22a   :  { %4392 = vset.pattern.permute.xlu0 %v4803_v24  ;;  %580 = vxpose.xlu1.b32.start [1/16] (narrow) %v356_v44, 8 }
 0x22b   :  { %1928 = vperm.xlu0 %4392, %v5099_v31   ;;  %v5190_v57 = vpop.permute.xlu1 %649 }
 0x22e   :  { %581 = vxpose.xlu1.b32.cont [2/16] (narrow) %v4042_v42, 8  ;;  %v5206_v8 = vpop.permute.xlu0 %1884 }
 0x22f   :  { %4394 = vset.pattern.permute.xlu0 %v4802_v22  ;;  %v5196_v63 = vpop.permute.xlu1 %644 }
 0x230   :  { %1503 = vperm.xlu0 %4394, %v5104_v32  }
 0x232   :  { %582 = vxpose.xlu1.b32.cont [3/16] (narrow) %v366_v49, 8 }
 0x233   :  { %v5212_v13 = vpop.permute.xlu0 %1046 }
 0x234   :  { %4395 = vset.pattern.permute.xlu0 %v4803_v24  ;;  %v5202_v3 = vpop.permute.xlu1 %1058 }
 0x235   :  { %1924 = vperm.xlu0 %4395, %v5104_v32  }
 0x236   :  { %583 = vxpose.xlu1.b32.cont [4/16] (narrow) %v4045_v46, 8 }
 0x238   :  { %v5209_v11 = vpop.permute.xlu1 %1070  ;;  %v5219_v18 = vpop.permute.xlu0 %1475 }
 0x239   :  { %4396 = vset.pattern.permute.xlu0 %v4801_v7 }
 0x23a   :  { %679 = vperm.xlu0 %4396, %v5111_v33   ;;  %584 = vxpose.xlu1.b32.cont [5/16] (narrow) %v376_v55, 8 }
 0x23d   :  { %v5216_v15 = vpop.permute.xlu1 %654  ;;  %v5225_v21 = vpop.permute.xlu0 %1896 }
 0x23e   :  { %4397 = vset.pattern.permute.xlu0 %v4802_v22  ;;  %585 = vxpose.xlu1.b32.cont [6/16] (narrow) %v4048_v51, 8 }
 0x23f   :  { %1515 = vperm.xlu0 %4397, %v5111_v33  }
 0x242   :  { %586 = vxpose.xlu1.b32.cont [7/16] (narrow) %v386_v62, 8  ;;  %v5222_v20 = vpop.permute.xlu1 %1916  ;;  %v5229_v25 = vpop.permute.xlu0 %1471 }
 0x243   :  { %4398 = vset.pattern.permute.xlu0 %v4803_v24 }
 0x244   :  { %1936 = vperm.xlu0 %4398, %v5111_v33  }
 0x246   :  { %587 = vxpose.xlu1.b32.cont [8/16] (narrow) %v4051_v59, 8  ;;  %v692_v59 = vlaneseq }
 0x247   :  { %v5227_v23 = vpop.permute.xlu1 %669  ;;  %v5233_v26 = vpop.permute.xlu0 %1892 }
 0x248   :  { %4400 = vset.pattern.permute.xlu0 %v4800_v6 }
 0x249   :  { %1082 = vperm.xlu0 %4400, %v5115_v34  }
 0x24a   :  { %588 = vxpose.xlu1.b32.cont [9/16] (narrow) %v396_v4, 8  ;;  %v5277_v4 = vld [vmem:[%s7037_s1] sm:$0xff] }
 0x24b   :  { %v40_v58 = vunpack.c.0.s8 %v5277_v4  ;;  %v43_v52 = vunpack.c.3.s8 %v5277_v4 }
 0x24c   :  { %v5237_v28 = vpop.permute.xlu0 %639 }
 0x24d   :  { %4401 = vset.pattern.permute.xlu0 %v4802_v22  ;;  %vm5310_vm3 = vcmp.gt.s32.totalorder %v40_v58, 0  ;;  %vm5314_vm4 = vcmp.gt.s32.totalorder %v43_v52, 0 }
 0x24e   :  { %1511 = vperm.xlu0 %4401, %v5115_v34   ;;  %589 = vxpose.xlu1.b32.cont [10/16] (narrow) %v4054_v1, 8  ;;  %v5270_v1 = vshrl.u32 %v692_v59, 7 }
 0x250   :  { %7140 = vst [vmem:[#allocation16_spill] sm:$0xff] %v5270_v1  ;;  %v1949_v9 = vsub.s32 3, %v5270_v1 }
 0x251   :  { %v5241_v30 = vpop.permute.xlu0 %1483 }
 0x252   :  { %4404 = vset.pattern.permute.xlu0 %v4800_v6  ;;  %590 = vxpose.xlu1.b32.cont [11/16] (narrow) %v406_v12, 8  ;;  %v4063_v6 = vpop.f32.mrf.mxu1  ;;  %v7057_v12 = vsub.s32 0, %v5270_v1 }
 0x253   :  { %1094 = vperm.xlu0 %4404, %v5123_v35  }
 0x254   :  { %v426_v24 = vpop.f32.mrf.mxu1 }
 0x256   :  { %591 = vxpose.xlu1.b32.cont [12/16] (narrow) %v4057_v10, 8  ;;  %v5245_v32 = vpop.permute.xlu0 %1904 }
 0x257   :  { %4405 = vset.pattern.permute.xlu0 %v4802_v22  ;;  %v5231_v22 = vpop.permute.xlu1 %664 }
 0x258   :  { %1523 = vperm.xlu0 %4405, %v5123_v35  }
 0x25a   :  { %592 = vxpose.xlu1.b32.cont [13/16] (narrow) %v416_v19, 8  ;;  %v41_v19 = vunpack.c.1.s8 %v5277_v4 }
 0x25b   :  { %v5235_v27 = vpop.permute.xlu1 %1074  ;;  %v5249_v34 = vpop.permute.xlu0 %1050 }
 0x25c   :  { %4412 = vset.pattern.permute.xlu0 %v4801_v7  ;;  %vm5296_vm2 = vcmp.gt.s32.totalorder %v41_v19, 0  ;;  %v7148_v19 = vmov 0 }
 0x25d   :  { %v7143_v17 = vsel %vm5296_vm2, 4294967295, %v7142_v17  ;;  %v7149_v19 = vsel %vm5314_vm4, 4294967295, %v7148_v19 }
 0x25e   :  { %593 = vxpose.xlu1.b32.cont [14/16] (narrow) %v4060_v16, 8  ;;  %v1099_v16 = vsub.s32 1, %v5270_v1  ;;  %7144 = vst [vmem:[#allocation18_spill] sm:$0xff] %v7143_v17  ;;  %7150 = vst [vmem:[#allocation20_spill] sm:$0xff] %v7149_v19 }
 0x25f   :  { %v5239_v29 = vpop.permute.xlu1 %1086 }
 0x260   :  { %v5254_v36 = vpop.permute.xlu0 %1479 }
 0x262   :  { %594 = vxpose.xlu1.b32.cont [15/16] (narrow) %v426_v24, 8  ;;  %v1528_v24 = vsub.s32 2, %v5270_v1  ;;  %v7145_v1 = vmov 0 }
 0x263   :  { %v5243_v31 = vpop.permute.xlu1 %674  ;;  %v7146_v1 = vsel %vm5310_vm3, 4294967295, %v7145_v1 }
 0x264   :  { %7147 = vst [vmem:[#allocation19_spill] sm:$0xff] %v7146_v1 }
 0x265   :  { %v5258_v44 = vpop.permute.xlu0 %1900 }
 0x266   :  { %595 = vxpose.xlu1.b32.end [16/16] (narrow) %v4063_v6, 8 }
 0x267   :  { %v5247_v33 = vpop.permute.xlu1 %1932 }
 0x26a   :  { %v5262_v49 = vpop.permute.xlu0 %1062 }
 0x26b   :  { %v5251_v35 = vpop.permute.xlu1 %689 }
 0x26f   :  { %v5256_v42 = vpop.permute.xlu1 %1944  ;;  %v5266_v55 = vpop.permute.xlu0 %1491 }
 0x270   :  { %7137 = vst [vmem:[#allocation13_spill] sm:$0xff] %v5256_v42 }
 0x273   :  { %v5260_v46 = vpop.permute.xlu1 %684 }
 0x277   :  { %v5264_v51 = vpop.permute.xlu1 %1090 }
 0x278   :  { %7138 = vst [vmem:[#allocation14_spill] sm:$0xff] %v5264_v51 }
 0x27b   :  { %v5268_v62 = vpop.permute.xlu1 %1519 }
 0x27c   :  { %7139 = vst [vmem:[#allocation15_spill] sm:$0xff] %v5268_v62 }
 0x27f   :  { %v5279_v10 = vpop.permute.xlu1 %1940 }
 0x280   :  { %7141 = vst [vmem:[#allocation17_spill] sm:$0xff] %v5279_v10 }
 0x284   :  { %4411 = vset.pattern.permute.xlu1 %v4801_v7  ;;  %v5272_v7 = vpop.permute.xlu0 %1912 }
 0x288   :  { %v5284_v6 = vpop.permute.xlu0 %1487 }
 0x28c   :  { %v5320_v61 = vpop.permute.xlu0 %1908 }
 0x2a6   :  { %v596_v59 = vpop.trf.xlu1 }
 0x2a7   :  { %v5291_v5 = vrot.slane %v596_v59, %v7057_v12  ;;  %v5293_v40 = vrot.slane %v596_v59, %v1099_v16  ;;  %v5308_v16 = vrot.slane %v596_v59, %v1528_v24  ;;  %v5324_v24 = vrot.slane %v596_v59, %v1949_v9 }
 0x2a9   :  { %v697_v38 = vadd.f32 %v5291_v5, %v5168_v43  ;;  %v696_v14 = vadd.f32 %v5291_v5, %v5187_v56  ;;  %v1102_v0 = vadd.f32 %v5293_v40, %v5152_v37  ;;  %v699_v12 = vadd.f32 %v5291_v5, %v5158_v39 }
 0x2aa   :  { %v1104_v43 = vadd.f32 %v5293_v40, %v5212_v13  ;;  %v1101_v58 = vadd.f32 %v5293_v40, %v5194_v60  ;;  %v1531_v42 = vadd.f32 %v5308_v16, %v5174_v47 }
 0x2ab   :  { %vm713_vm5 = vcmp.gt.f32.partialorder %v697_v38, 0.0  ;;  %v729_v56 = vmul.f32 0.2, %v697_v38  ;;  %vm712_vm6 = vcmp.gt.f32.partialorder %v696_v14, 0.0  ;;  %v728_v37 = vmul.f32 0.2, %v696_v14 }
 0x2ac   :  { %vm1118_vm7 = vcmp.gt.f32.partialorder %v1102_v0, 0.0  ;;  %v1134_v39 = vmul.f32 0.2, %v1102_v0  ;;  %vm715_vm8 = vcmp.gt.f32.partialorder %v699_v12, 0.0  ;;  %v731_v10 = vmul.f32 0.2, %v699_v12 }
 0x2ad   :  { %v745_v52 = vsel %vm713_vm5, %v697_v38, %v729_v56  ;;  %v744_v53 = vsel %vm712_vm6, %v696_v14, %v728_v37  ;;  %vm1120_vm9 = vcmp.gt.f32.partialorder %v1104_v43, 0.0  ;;  %v1136_v14 = vmul.f32 0.2, %v1104_v43 }
 0x2ae   :  { %v5328_v13 = vsel %vm5296_vm2, %v745_v52, -1e+30  ;;  %v5332_v62 = vsel %vm5310_vm3, %v744_v53, -1e+30  ;;  %v1150_v51 = vsel %vm1118_vm7, %v1102_v0, %v1134_v39  ;;  %v747_v9 = vsel %vm715_vm8, %v699_v12, %v731_v10  ;;  %v5344_v0 = vpop.permute.xlu0 %659 }
 0x2af   :  { %778 = vmax.xlane.f32.xlu1 %v5328_v13  ;;  %776 = vmax.xlane.f32.xlu0 %v5332_v62  ;;  %v1530_v38 = vadd.f32 %v5308_v16, %v5200_v2  ;;  %vm1117_vm10 = vcmp.gt.f32.partialorder %v1101_v58, 0.0  ;;  %v1133_v60 = vmul.f32 0.2, %v1101_v58  ;;  %v5342_v53 = vsel %vm5296_vm2, %v1150_v51, -1e+30 }
 0x2b0   :  { %v5348_v47 = vsel %vm5314_vm4, %v747_v9, -1e+30  ;;  %v1152_v59 = vsel %vm1120_vm9, %v1104_v43, %v1136_v14  ;;  %vm1547_vm11 = vcmp.gt.f32.partialorder %v1531_v42, 0.0  ;;  %v1563_v10 = vmul.f32 0.2, %v1531_v42 }
 0x2b1   :  { %v1149_v2 = vsel %vm1117_vm10, %v1101_v58, %v1133_v60  ;;  %v1562_v12 = vmul.f32 0.2, %v1530_v38  ;;  %v1533_v56 = vadd.f32 %v5308_v16, %v5219_v18  ;;  %v1951_v51 = vadd.f32 %v5324_v24, %v5206_v8 }
 0x2b2   :  { %vm1546_vm12 = vcmp.gt.f32.partialorder %v1530_v38, 0.0  ;;  %v5358_v37 = vsel %vm5314_vm4, %v1152_v59, -1e+30  ;;  %v5362_v43 = vsel %vm5310_vm3, %v1149_v2, -1e+30  ;;  %v1579_v39 = vsel %vm1547_vm11, %v1531_v42, %v1563_v10  ;;  %v5370_v14 = vpop.permute.xlu0 %1499 }
 0x2b3   :  { %1183 = vmax.xlane.f32.xlu1 %v5342_v53  ;;  %782 = vmax.xlane.f32.xlu0 %v5348_v47  ;;  %v1952_v58 = vadd.f32 %v5324_v24, %v5180_v50  ;;  %v1578_v18 = vsel %vm1546_vm12, %v1530_v38, %v1562_v12  ;;  %v1565_v52 = vmul.f32 0.2, %v1533_v56  ;;  %v1983_v8 = vmul.f32 0.2, %v1951_v51 }
 0x2b4   :  { %v698_v9 = vadd.f32 %v5291_v5, %v5164_v41  ;;  %vm1549_vm13 = vcmp.gt.f32.partialorder %v1533_v56, 0.0  ;;  %vm1967_vm14 = vcmp.gt.f32.partialorder %v1951_v51, 0.0  ;;  %v5374_v42 = vsel %vm5296_vm2, %v1579_v39, -1e+30 }
 0x2b5   :  { %v42_v50 = vunpack.c.2.s8 %v5277_v4  ;;  %v5379_v60 = vsel %vm5310_vm3, %v1578_v18, -1e+30  ;;  %v1984_v38 = vmul.f32 0.2, %v1952_v58  ;;  %v1954_v59 = vadd.f32 %v5324_v24, %v5225_v21  ;;  %v5394_v21 = vld [vmem:[%s7037_s1 + $0x8] sm:$0xff] }
 0x2b6   :  { %v1103_v41 = vadd.f32 %v5293_v40, %v5170_v45  ;;  %v1581_v10 = vsel %vm1549_vm13, %v1533_v56, %v1565_v52  ;;  %v1999_v2 = vsel %vm1967_vm14, %v1951_v51, %v1983_v8  ;;  %vm1968_vm15 = vcmp.gt.f32.partialorder %v1952_v58, 0.0  ;;  %v5398_v39 = vpop.permute.xlu0 %1920 }
 0x2b7   :  { %1187 = vmax.xlane.f32.xlu1 %v5358_v37  ;;  %1181 = vmax.xlane.f32.xlu0 %v5362_v43  ;;  %v730_v12 = vmul.f32 0.2, %v698_v9  ;;  %vm714_vm5 = vcmp.gt.f32.partialorder %v698_v9, 0.0  ;;  %vm5387_vm6 = vcmp.gt.s32.totalorder %v42_v50, 0  ;;  %v7151_v4 = vmov 0 }
 0x2b8   :  { %v7152_v4 = vsel %vm5387_vm6, 4294967295, %v7151_v4  ;;  %v701_v45 = vadd.f32 %v5291_v5, %v5237_v28  ;;  %v5402_v56 = vsel %vm5314_vm4, %v1581_v10, -1e+30  ;;  %v5406_v51 = vsel %vm5310_vm3, %v1999_v2, -1e+30 }
 0x2b9   :  { %7153 = vst [vmem:[#allocation21_spill] sm:$0xff] %v7152_v4  ;;  %v2000_v18 = vsel %vm1968_vm15, %v1952_v58, %v1984_v38  ;;  %v1986_v52 = vmul.f32 0.2, %v1954_v59  ;;  %v746_v8 = vsel %vm714_vm5, %v698_v9, %v730_v12  ;;  %vm1970_vm7 = vcmp.gt.f32.partialorder %v1954_v59, 0.0 }
 0x2ba   :  { %v1135_v50 = vmul.f32 0.2, %v1103_v41  ;;  %v1532_v28 = vadd.f32 %v5308_v16, %v5229_v25  ;;  %vm1119_vm8 = vcmp.gt.f32.partialorder %v1103_v41, 0.0  ;;  %v5414_v10 = vsel %vm5296_vm2, %v2000_v18, -1e+30  ;;  %v5427_v17 = vpop.permute.xlu0 %1066 }
 0x2bb   :  { %1612 = vmax.xlane.f32.xlu1 %v5374_v42  ;;  %1610 = vmax.xlane.f32.xlu0 %v5379_v60  ;;  %v45_v2 = vunpack.c.1.s8 %v5394_v21  ;;  %v5419_v58 = vsel %vm5387_vm6, %v746_v8, -1e+30  ;;  %v2002_v38 = vsel %vm1970_vm7, %v1954_v59, %v1986_v52  ;;  %v733_v1 = vmul.f32 0.2, %v701_v45 }
 0x2bc   :  { %v1106_v9 = vadd.f32 %v5293_v40, %v5177_v48  ;;  %v1151_v25 = vsel %vm1119_vm8, %v1103_v41, %v1135_v50  ;;  %vm717_vm9 = vcmp.gt.f32.partialorder %v701_v45, 0.0  ;;  %v1564_v12 = vmul.f32 0.2, %v1532_v28 }
 0x2bd   :  { %v1953_v18 = vadd.f32 %v5324_v24, %v5233_v26  ;;  %vm1548_vm10 = vcmp.gt.f32.partialorder %v1532_v28, 0.0  ;;  %v5431_v59 = vsel %vm5314_vm4, %v2002_v38, -1e+30  ;;  %vm5433_vm11 = vcmp.gt.s32.totalorder %v45_v2, 0 }
 0x2be   :  { %v7154_v52 = vmov 0  ;;  %v5439_v48 = vsel %vm5387_vm6, %v1151_v25, -1e+30  ;;  %v749_v41 = vsel %vm717_vm9, %v701_v45, %v733_v1  ;;  %v1138_v8 = vmul.f32 0.2, %v1106_v9  ;;  %v5452_v45 = vpop.permute.xlu0 %1495 }
 0x2bf   :  { %1616 = vmax.xlane.f32.xlu1 %v5402_v56  ;;  %2031 = vmax.xlane.f32.xlu0 %v5406_v51  ;;  %v7155_v52 = vsel %vm5433_vm11, 4294967295, %v7154_v52  ;;  %7157 = vst [vmem:[#allocation23_spill] sm:$0xff] %v5439_v48  ;;  %v1535_v26 = vadd.f32 %v5308_v16, %v5241_v30  ;;  %v1580_v50 = vsel %vm1548_vm10, %v1532_v28, %v1564_v12  ;;  %vm1122_vm12 = vcmp.gt.f32.partialorder %v1106_v9, 0.0 }
 0x2c0   :  { %7156 = vst [vmem:[#allocation22_spill] sm:$0xff] %v7155_v52  ;;  %v1985_v38 = vmul.f32 0.2, %v1953_v18  ;;  %v700_v2 = vadd.f32 %v5291_v5, %v5184_v54  ;;  %vm1969_vm13 = vcmp.gt.f32.partialorder %v1953_v18, 0.0  ;;  %v5449_v25 = vsel %vm5433_vm11, %v749_v41, -1e+30 }
 0x2c1   :  { %7158 = vst [vmem:[#allocation24_spill] sm:$0xff] %v5449_v25  ;;  %v44_v1 = vunpack.c.0.s8 %v5394_v21  ;;  %v5456_v30 = vsel %vm5387_vm6, %v1580_v50, -1e+30  ;;  %v1154_v19 = vsel %vm1122_vm12, %v1106_v9, %v1138_v8  ;;  %v1567_v28 = vmul.f32 0.2, %v1535_v26 }
 0x2c2   :  { %v1956_v12 = vadd.f32 %v5324_v24, %v5245_v32  ;;  %v2001_v54 = vsel %vm1969_vm13, %v1953_v18, %v1985_v38  ;;  %vm1551_vm14 = vcmp.gt.f32.partialorder %v1535_v26, 0.0  ;;  %v732_v41 = vmul.f32 0.2, %v700_v2 }
 0x2c3   :  { %2033 = vmax.xlane.f32.xlu1 %v5414_v10  ;;  %780 = vmax.xlane.f32.xlu0 %v5419_v58  ;;  %vm716_vm15 = vcmp.gt.f32.partialorder %v700_v2, 0.0  ;;  %v5466_v50 = vsel %vm5433_vm11, %v1154_v19, -1e+30  ;;  %vm5468_vm5 = vcmp.gt.s32.totalorder %v44_v1, 0  ;;  %v7159_v9 = vmov 0 }
 0x2c4   :  { %v7160_v9 = vsel %vm5468_vm5, 4294967295, %v7159_v9  ;;  %v5474_v32 = vsel %vm5387_vm6, %v2001_v54, -1e+30  ;;  %v1583_v8 = vsel %vm1551_vm14, %v1535_v26, %v1567_v28  ;;  %v1988_v18 = vmul.f32 0.2, %v1956_v12 }
 0x2c5   :  { %7161 = vst [vmem:[#allocation25_spill] sm:$0xff] %v7160_v9  ;;  %v703_v38 = vadd.f32 %v5291_v5, %v5190_v57  ;;  %vm1972_vm7 = vcmp.gt.f32.partialorder %v1956_v12, 0.0  ;;  %v1534_v1 = vadd.f32 %v5308_v16, %v5254_v36  ;;  %v5486_v26 = vsel %vm5433_vm11, %v1583_v8, -1e+30 }
 0x2c6   :  { %7162 = vst [vmem:[#allocation26_spill] sm:$0xff] %v5486_v26  ;;  %v47_v28 = vunpack.c.3.s8 %v5394_v21  ;;  %v2004_v54 = vsel %vm1972_vm7, %v1956_v12, %v1988_v18  ;;  %v1955_v8 = vadd.f32 %v5324_v24, %v5258_v44  ;;  %v7164_v12 = vmov 0 }
 0x2c7   :  { %2037 = vmax.xlane.f32.xlu1 %v5431_v59  ;;  %1185 = vmax.xlane.f32.xlu0 %v5439_v48  ;;  %v1105_v48 = vadd.f32 %v5293_v40, %v5249_v34  ;;  %v748_v34 = vsel %vm716_vm15, %v700_v2, %v732_v41  ;;  %v735_v2 = vmul.f32 0.2, %v703_v38  ;;  %v1108_v41 = vadd.f32 %v5293_v40, %v5262_v49 }
 0x2c8   :  { %v5491_v57 = vsel %vm5468_vm5, %v748_v34, -1e+30  ;;  %vm719_vm9 = vcmp.gt.f32.partialorder %v703_v38, 0.0  ;;  %v1566_v4 = vmul.f32 0.2, %v1534_v1  ;;  %vm1550_vm10 = vcmp.gt.f32.partialorder %v1534_v1, 0.0 }
 0x2c9   :  { %v1137_v19 = vmul.f32 0.2, %v1105_v48  ;;  %vm1121_vm8 = vcmp.gt.f32.partialorder %v1105_v48, 0.0  ;;  %v5501_v34 = vsel %vm5433_vm11, %v2004_v54, -1e+30  ;;  %vm5503_vm12 = vcmp.gt.s32.totalorder %v47_v28, 0 }
 0x2ca   :  { %7163 = vst [vmem:[#allocation27_spill] sm:$0xff] %v5501_v34  ;;  %v7165_v12 = vsel %vm5503_vm12, 4294967295, %v7164_v12  ;;  %v1537_v44 = vadd.f32 %v5308_v16, %v5266_v55  ;;  %v1582_v54 = vsel %vm1550_vm10, %v1534_v1, %v1566_v4  ;;  %vm1124_vm13 = vcmp.gt.f32.partialorder %v1108_v41, 0.0 }
 0x2cb   :  { %786 = vmax.xlane.f32.xlu1 %v5449_v25  ;;  %1614 = vmax.xlane.f32.xlu0 %v5456_v30  ;;  %v5482_v25 = vpop.permute.xlu0 %1078  ;;  %v1153_v36 = vsel %vm1121_vm8, %v1105_v48, %v1137_v19  ;;  %7166 = vst [vmem:[#allocation28_spill] sm:$0xff] %v7165_v12  ;;  %v751_v48 = vsel %vm719_vm9, %v703_v38, %v735_v2  ;;  %v1140_v19 = vmul.f32 0.2, %v1108_v41  ;;  %v1987_v28 = vmul.f32 0.2, %v1955_v8 }
 0x2cc   :  { %v5511_v18 = vsel %vm5468_vm5, %v1153_v36, -1e+30  ;;  %v702_v52 = vadd.f32 %v5291_v5, %v5196_v63  ;;  %vm1971_vm14 = vcmp.gt.f32.partialorder %v1955_v8, 0.0  ;;  %v5521_v36 = vsel %vm5503_vm12, %v751_v48, -1e+30 }
 0x2cd   :  { %v46_v38 = vunpack.c.2.s8 %v5394_v21  ;;  %v5526_v55 = vsel %vm5468_vm5, %v1582_v54, -1e+30  ;;  %v1156_v2 = vsel %vm1124_vm13, %v1108_v41, %v1140_v19  ;;  %v1958_v4 = vadd.f32 %v5324_v24, %v5272_v7 }
 0x2ce   :  { %v2003_v63 = vsel %vm1971_vm14, %v1955_v8, %v1987_v28  ;;  %vm1553_vm15 = vcmp.gt.f32.partialorder %v1537_v44, 0.0  ;;  %v734_v1 = vmul.f32 0.2, %v702_v52  ;;  %v1107_v48 = vadd.f32 %v5293_v40, %v5202_v3  ;;  %v5551_v3 = vld [vmem:[%s7037_s1 + $0x10] sm:$0xff] }
 0x2cf   :  { %1191 = vmax.xlane.f32.xlu1 %v5466_v50  ;;  %2035 = vmax.xlane.f32.xlu0 %v5474_v32  ;;  %v5507_v49 = vpop.permute.xlu0 %1507  ;;  %vm718_vm7 = vcmp.gt.f32.partialorder %v702_v52, 0.0  ;;  %v5538_v41 = vsel %vm5503_vm12, %v1156_v2, -1e+30  ;;  %vm5540_vm8 = vcmp.gt.s32.totalorder %v46_v38, 0  ;;  %v7167_v19 = vmov 0 }
 0x2d0   :  { %v7168_v19 = vsel %vm5540_vm8, 4294967295, %v7167_v19  ;;  %v5546_v7 = vsel %vm5468_vm5, %v2003_v63, -1e+30  ;;  %v1990_v54 = vmul.f32 0.2, %v1958_v4  ;;  %v705_v28 = vadd.f32 %v5291_v5, %v5344_v0 }
 0x2d1   :  { %7169 = vst [vmem:[#allocation29_spill] sm:$0xff] %v7168_v19  ;;  %7170 = vst [vmem:[#allocation30_spill] sm:$0xff] %v5546_v7  ;;  %v750_v38 = vsel %vm718_vm7, %v702_v52, %v734_v1  ;;  %vm1974_vm9 = vcmp.gt.f32.partialorder %v1958_v4, 0.0  ;;  %v1139_v2 = vmul.f32 0.2, %v1107_v48  ;;  %v1536_v63 = vadd.f32 %v5308_v16, %v5284_v6 }
 0x2d2   :  { %vm1123_vm10 = vcmp.gt.f32.partialorder %v1107_v48, 0.0  ;;  %v5568_v0 = vsel %vm5540_vm8, %v750_v38, -1e+30  ;;  %v737_v52 = vmul.f32 0.2, %v705_v28  ;;  %v1110_v1 = vadd.f32 %v5293_v40, %v5209_v11 }
 0x2d3   :  { %1620 = vmax.xlane.f32.xlu1 %v5486_v26  ;;  %784 = vmax.xlane.f32.xlu0 %v5491_v57  ;;  %v5534_v21 = vpop.permute.xlu0 %1928  ;;  %v1155_v6 = vsel %vm1123_vm10, %v1107_v48, %v1139_v2  ;;  %vm721_vm13 = vcmp.gt.f32.partialorder %v705_v28, 0.0  ;;  %v1957_v26 = vadd.f32 %v5324_v24, %v5320_v61  ;;  %vm1552_vm14 = vcmp.gt.f32.partialorder %v1536_v63, 0.0 }
 0x2d4   :  { %v5586_v11 = vsel %vm5540_vm8, %v1155_v6, -1e+30  ;;  %v1142_v48 = vmul.f32 0.2, %v1110_v1  ;;  %v1539_v2 = vadd.f32 %v5308_v16, %v5370_v14  ;;  %vm1126_vm7 = vcmp.gt.f32.partialorder %v1110_v1, 0.0 }
 0x2d6   :  { %v1158_v6 = vsel %vm1126_vm7, %v1110_v1, %v1142_v48  ;;  %vm1555_vm10 = vcmp.gt.f32.partialorder %v1539_v2, 0.0  ;;  %v7176_v1 = vmov 0 }
 0x2d7   :  { %2041 = vmax.xlane.f32.xlu1 %v5501_v34  ;;  %1189 = vmax.xlane.f32.xlu0 %v5511_v18  ;;  %v1569_v34 = vmul.f32 0.2, %v1537_v44  ;;  %v5564_v9 = vpop.permute.xlu0 %1503 }
 0x2d9   :  { %v1585_v8 = vsel %vm1553_vm15, %v1537_v44, %v1569_v34  ;;  %v49_v44 = vunpack.c.1.s8 %v5551_v3 }
 0x2da   :  { %v5561_v34 = vsel %vm5503_vm12, %v1585_v8, -1e+30  ;;  %v1568_v8 = vmul.f32 0.2, %v1536_v63 }
 0x2db   :  { %790 = vmax.xlane.f32.xlu1 %v5521_v36  ;;  %1618 = vmax.xlane.f32.xlu0 %v5526_v55  ;;  %vm5580_vm15 = vcmp.gt.s32.totalorder %v49_v44, 0  ;;  %v704_v44 = vadd.f32 %v5291_v5, %v5216_v15  ;;  %v5594_v12 = vpop.permute.xlu0 %1924 }
 0x2dc   :  { %v1584_v61 = vsel %vm1552_vm14, %v1536_v63, %v1568_v8  ;;  %v1571_v63 = vmul.f32 0.2, %v1539_v2  ;;  %v1960_v8 = vadd.f32 %v5324_v24, %v5398_v39 }
 0x2dd   :  { %v5603_v14 = vsel %vm5540_vm8, %v1584_v61, -1e+30  ;;  %v5613_v61 = vsel %vm5580_vm15, %v1158_v6, -1e+30  ;;  %v1538_v6 = vadd.f32 %v5308_v16, %v5452_v45 }
 0x2de   :  { %7175 = vst [vmem:[#allocation33_spill] sm:$0xff] %v5603_v14  ;;  %vm1976_vm7 = vcmp.gt.f32.partialorder %v1960_v8, 0.0 }
 0x2df   :  { %1195 = vmax.xlane.f32.xlu1 %v5538_v41  ;;  %2039 = vmax.xlane.f32.xlu0 %v5546_v7  ;;  %v2006_v7 = vsel %vm1974_vm9, %v1958_v4, %v1990_v54  ;;  %v7172_v4 = vmov 0  ;;  %v753_v54 = vsel %vm721_vm13, %v705_v28, %v737_v52  ;;  %vm1973_vm9 = vcmp.gt.f32.partialorder %v1957_v26, 0.0  ;;  %v680_v39 = vpop.permute.xlu0 %679 }
 0x2e0   :  { %v5578_v38 = vsel %vm5503_vm12, %v2006_v7, -1e+30  ;;  %v7173_v4 = vsel %vm5580_vm15, 4294967295, %v7172_v4  ;;  %v1989_v7 = vmul.f32 0.2, %v1957_v26  ;;  %v48_v52 = vunpack.c.0.s8 %v5551_v3 }
 0x2e1   :  { %7171 = vst [vmem:[#allocation31_spill] sm:$0xff] %v5578_v38  ;;  %7174 = vst [vmem:[#allocation32_spill] sm:$0xff] %v7173_v4  ;;  %v5598_v28 = vsel %vm5580_vm15, %v753_v54, -1e+30  ;;  %v1109_v54 = vadd.f32 %v5293_v40, %v5427_v17  ;;  %vm720_vm13 = vcmp.gt.f32.partialorder %v704_v44, 0.0  ;;  %v50_v4 = vunpack.c.2.s8 %v5551_v3 }
 0x2e2   :  { %v2005_v15 = vsel %vm1973_vm9, %v1957_v26, %v1989_v7  ;;  %vm5615_vm14 = vcmp.gt.s32.totalorder %v48_v52, 0  ;;  %v1587_v26 = vsel %vm1555_vm10, %v1539_v2, %v1571_v63  ;;  %v1992_v7 = vmul.f32 0.2, %v1960_v8 }
 0x2e3   :  { %1624 = vmax.xlane.f32.xlu1 %v5561_v34  ;;  %788 = vmax.xlane.f32.xlu0 %v5568_v0  ;;  %v7177_v1 = vsel %vm5615_vm14, 4294967295, %v7176_v1  ;;  %v5621_v48 = vsel %vm5540_vm8, %v2005_v15, -1e+30  ;;  %v1141_v52 = vmul.f32 0.2, %v1109_v54  ;;  %vm1125_vm9 = vcmp.gt.f32.partialorder %v1109_v54, 0.0 }
 0x2e4   :  { %7178 = vst [vmem:[#allocation34_spill] sm:$0xff] %v7177_v1  ;;  %7179 = vst [vmem:[#allocation35_spill] sm:$0xff] %v5621_v48  ;;  %v5631_v15 = vsel %vm5580_vm15, %v1587_v26, -1e+30  ;;  %v51_v2 = vunpack.c.3.s8 %v5551_v3  ;;  %v2008_v63 = vsel %vm1976_vm7, %v1960_v8, %v1992_v7  ;;  %v1959_v26 = vadd.f32 %v5324_v24, %v5222_v20 }
 0x2e5   :  { %7180 = vst [vmem:[#allocation36_spill] sm:$0xff] %v5631_v15  ;;  %v1157_v45 = vsel %vm1125_vm9, %v1109_v54, %v1141_v52  ;;  %v7182_v8 = vmov 0  ;;  %vm5677_vm0 = vcmp.gt.s32.totalorder %v50_v4, 0  ;;  %v1114_v1 = vadd.f32 %v5293_v40, %v5239_v29 }
 0x2e6   :  { %vm5648_vm7 = vcmp.gt.s32.totalorder %v51_v2, 0  ;;  %v1991_v52 = vmul.f32 0.2, %v1959_v26  ;;  %v706_v2 = vadd.f32 %v5291_v5, %v5231_v22  ;;  %vm1975_vm1 = vcmp.gt.f32.partialorder %v1959_v26, 0.0 }
 0x2e7   :  { %2045 = vmax.xlane.f32.xlu1 %v5578_v38  ;;  %1193 = vmax.xlane.f32.xlu0 %v5586_v11  ;;  %v736_v38 = vmul.f32 0.2, %v704_v44  ;;  %v7183_v8 = vsel %vm5648_vm7, 4294967295, %v7182_v8 }
 0x2e8   :  { %7184 = vst [vmem:[#allocation38_spill] sm:$0xff] %v7183_v8  ;;  %v2007_v22 = vsel %vm1975_vm1, %v1959_v26, %v1991_v52  ;;  %v738_v3 = vmul.f32 0.2, %v706_v2 }
 0x2e9   :  { %v752_v17 = vsel %vm720_vm13, %v704_v44, %v736_v38  ;;  %v1112_v38 = vadd.f32 %v5293_v40, %v5482_v25  ;;  %v1570_v44 = vmul.f32 0.2, %v1538_v6  ;;  %vm1554_vm13 = vcmp.gt.f32.partialorder %v1538_v6, 0.0 }
 0x2ea   :  { %v5654_v25 = vsel %vm5615_vm14, %v1157_v45, -1e+30  ;;  %v5690_v26 = vsel %vm5615_vm14, %v2007_v22, -1e+30 }
 0x2eb   :  { %794 = vmax.xlane.f32.xlu1 %v5598_v28  ;;  %1622 = vmax.xlane.f32.xlu0 %v5603_v14  ;;  %v707_v14 = vadd.f32 %v5291_v5, %v5227_v23  ;;  %v5636_v23 = vsel %vm5615_vm14, %v752_v17, -1e+30  ;;  %v5646_v17 = vsel %vm5580_vm15, %v2008_v63, -1e+30  ;;  %vm1128_vm9 = vcmp.gt.f32.partialorder %v1112_v38, 0.0  ;;  %7189 = vst [vmem:[#allocation41_spill] sm:$0xff] %v5690_v26 }
 0x2ec   :  { %7181 = vst [vmem:[#allocation37_spill] sm:$0xff] %v5646_v17  ;;  %v1144_v7 = vmul.f32 0.2, %v1112_v38  ;;  %v1586_v20 = vsel %vm1554_vm13, %v1538_v6, %v1570_v44  ;;  %v1541_v63 = vadd.f32 %v5308_v16, %v5507_v49  ;;  %v1962_v44 = vadd.f32 %v5324_v24, %v5534_v21 }
 0x2ed   :  { %v739_v19 = vmul.f32 0.2, %v707_v14  ;;  %vm723_vm10 = vcmp.gt.f32.partialorder %v707_v14, 0.0  ;;  %vm722_vm13 = vcmp.gt.f32.partialorder %v706_v2, 0.0  ;;  %v709_v21 = vadd.f32 %v5291_v5, %v680_v39 }
 0x2ee   :  { %v1160_v6 = vsel %vm1128_vm9, %v1112_v38, %v1144_v7  ;;  %v1573_v49 = vmul.f32 0.2, %v1541_v63  ;;  %v1540_v38 = vadd.f32 %v5308_v16, %v5564_v9  ;;  %v754_v4 = vsel %vm722_vm13, %v706_v2, %v738_v3  ;;  %v5697_v9 = vld [vmem:[%s7037_s1 + $0x18] sm:$0xff]  ;;  %s4804_s1 = smov 16  }
 0x2ef   :  { %1199 = vmax.xlane.f32.xlu1 %v5613_v61  ;;  %2043 = vmax.xlane.f32.xlu0 %v5621_v48  ;;  %v1516_v48 = vpop.permute.xlu0 %1515  ;;  %v755_v54 = vsel %vm723_vm10, %v707_v14, %v739_v19  ;;  %v5669_v14 = vsel %vm5615_vm14, %v1586_v20, -1e+30  ;;  %vm1557_vm10 = vcmp.gt.f32.partialorder %v1541_v63, 0.0  ;;  %v5686_v7 = vsel %vm5648_vm7, %v1160_v6, -1e+30 }
 0x2f0   :  { %v5665_v19 = vsel %vm5648_vm7, %v755_v54, -1e+30  ;;  %7185 = vst [vmem:[#allocation39_spill] sm:$0xff] %v5669_v14  ;;  %v7186_v54 = vmov 0  ;;  %v1994_v20 = vmul.f32 0.2, %v1962_v44  ;;  %v1961_v6 = vadd.f32 %v5324_v24, %v5594_v12 }
 0x2f1   :  { %v7187_v54 = vsel %vm5677_vm0, 4294967295, %v7186_v54  ;;  %vm1978_vm1 = vcmp.gt.f32.partialorder %v1962_v44, 0.0  ;;  %v1572_v39 = vmul.f32 0.2, %v1540_v38  ;;  %v741_v2 = vmul.f32 0.2, %v709_v21 }
 0x2f2   :  { %7188 = vst [vmem:[#allocation40_spill] sm:$0xff] %v7187_v54  ;;  %vm1556_vm13 = vcmp.gt.f32.partialorder %v1540_v38, 0.0  ;;  %v53_v12 = vunpack.c.1.s8 %v5697_v9 }
 0x2f3   :  { %1628 = vmax.xlane.f32.xlu1 %v5631_v15  ;;  %792 = vmax.xlane.f32.xlu0 %v5636_v23  ;;  %v1937_v45 = vpop.permute.xlu0 %1936 }
 0x2f7   :  { %2049 = vmax.xlane.f32.xlu1 %v5646_v17  ;;  %1197 = vmax.xlane.f32.xlu0 %v5654_v25  ;;  %v1111_v17 = vadd.f32 %v5293_v40, %v5235_v27  ;;  %v1589_v27 = vsel %vm1557_vm10, %v1541_v63, %v1573_v49  ;;  %v5707_v63 = vsel %vm5677_vm0, %v754_v4, -1e+30  ;;  %v2010_v49 = vsel %vm1978_vm1, %v1962_v44, %v1994_v20 }
 0x2f8   :  { %v5703_v22 = vsel %vm5648_vm7, %v1589_v27, -1e+30  ;;  %vm725_vm10 = vcmp.gt.f32.partialorder %v709_v21, 0.0  ;;  %v1993_v27 = vmul.f32 0.2, %v1961_v6  ;;  %v708_v20 = vadd.f32 %v5291_v5, %v5243_v31 }
 0x2f9   :  { %v1143_v52 = vmul.f32 0.2, %v1111_v17  ;;  %vm1127_vm9 = vcmp.gt.f32.partialorder %v1111_v17, 0.0  ;;  %7190 = vst [vmem:[#allocation42_spill] sm:$0xff] %v5703_v22  ;;  %v5717_v4 = vsel %vm5648_vm7, %v2010_v49, -1e+30  ;;  %v757_v29 = vsel %vm725_vm10, %v709_v21, %v741_v2 }
 0x2fa   :  { %7191 = vst [vmem:[#allocation43_spill] sm:$0xff] %v5717_v4  ;;  %v1146_v44 = vmul.f32 0.2, %v1114_v1  ;;  %vm1130_vm1 = vcmp.gt.f32.partialorder %v1114_v1, 0.0  ;;  %vm5728_vm7 = vcmp.gt.s32.totalorder %v53_v12, 0  ;;  %v52_v49 = vunpack.c.0.s8 %v5697_v9 }
 0x2fb   :  { %798 = vmax.xlane.f32.xlu1 %v5665_v19  ;;  %1626 = vmax.xlane.f32.xlu0 %v5669_v14  ;;  %v1083_v14 = vpop.permute.xlu0 %1082  ;;  %v1159_v3 = vsel %vm1127_vm9, %v1111_v17, %v1143_v52  ;;  %v1588_v17 = vsel %vm1556_vm13, %v1540_v38, %v1572_v39  ;;  %vm1977_vm9 = vcmp.gt.f32.partialorder %v1961_v6, 0.0  ;;  %v7192_v52 = vmov 0 }
 0x2fc   :  { %v7193_v52 = vsel %vm5728_vm7, 4294967295, %v7192_v52  ;;  %v5736_v21 = vsel %vm5728_vm7, %v757_v29, -1e+30  ;;  %v5740_v38 = vsel %vm5677_vm0, %v1588_v17, -1e+30  ;;  %v2009_v39 = vsel %vm1977_vm9, %v1961_v6, %v1993_v27 }
 0x2fd   :  { %7194 = vst [vmem:[#allocation44_spill] sm:$0xff] %v7193_v52  ;;  %7195 = vst [vmem:[#allocation45_spill] sm:$0xff] %v5740_v38  ;;  %v740_v2 = vmul.f32 0.2, %v708_v20  ;;  %vm724_vm13 = vcmp.gt.f32.partialorder %v708_v20, 0.0  ;;  %vm5745_vm14 = vcmp.gt.s32.totalorder %v52_v49, 0  ;;  %v55_v49 = vunpack.c.3.s8 %v5697_v9 }
 0x2fe   :  { %v7196_v29 = vmov 0 }
 0x2ff   :  { %1203 = vmax.xlane.f32.xlu1 %v5686_v7  ;;  %2047 = vmax.xlane.f32.xlu0 %v5690_v26  ;;  %v1543_v26 = vadd.f32 %v5308_v16, %v1516_v48  ;;  %v1512_v15 = vpop.permute.xlu0 %1511  ;;  %v1964_v48 = vadd.f32 %v5324_v24, %v1937_v45  ;;  %v1162_v45 = vsel %vm1130_vm1, %v1114_v1, %v1146_v44  ;;  %v7197_v29 = vsel %vm5745_vm14, 4294967295, %v7196_v29 }
 0x300   :  { %v1542_v8 = vadd.f32 %v5308_v16, %v1512_v15  ;;  %7198 = vst [vmem:[#allocation46_spill] sm:$0xff] %v7197_v29  ;;  %v5755_v1 = vsel %vm5677_vm0, %v2009_v39, -1e+30  ;;  %v756_v27 = vsel %vm724_vm13, %v708_v20, %v740_v2  ;;  %v711_v15 = vadd.f32 %v5291_v5, %v5251_v35 }
 0x301   :  { %v1575_v31 = vmul.f32 0.2, %v1543_v26  ;;  %vm1559_vm10 = vcmp.gt.f32.partialorder %v1543_v26, 0.0  ;;  %vm1980_vm1 = vcmp.gt.f32.partialorder %v1964_v48, 0.0  ;;  %v5769_v54 = vsel %vm5745_vm14, %v756_v27, -1e+30 }
 0x302   :  { %v1574_v44 = vmul.f32 0.2, %v1542_v8  ;;  %v743_v20 = vmul.f32 0.2, %v711_v15  ;;  %vm727_vm13 = vcmp.gt.f32.partialorder %v711_v15, 0.0 }
 0x303   :  { %1632 = vmax.xlane.f32.xlu1 %v5703_v22  ;;  %796 = vmax.xlane.f32.xlu0 %v5707_v63  ;;  %v5721_v22 = vsel %vm5677_vm0, %v1159_v3, -1e+30  ;;  %v1113_v3 = vadd.f32 %v5293_v40, %v1083_v14  ;;  %v1095_v12 = vpop.permute.xlu0 %1094  ;;  %v1996_v14 = vmul.f32 0.2, %v1964_v48  ;;  %v1591_v6 = vsel %vm1559_vm10, %v1543_v26, %v1575_v31 }
 0x304   :  { %v5765_v39 = vsel %vm5728_vm7, %v1591_v6, -1e+30  ;;  %vm1558_vm10 = vcmp.gt.f32.partialorder %v1542_v8, 0.0  ;;  %v1963_v31 = vadd.f32 %v5324_v24, %v5247_v33  ;;  %vm5776_vm0 = vcmp.gt.s32.totalorder %v55_v49, 0 }
 0x305   :  { %v1145_v17 = vmul.f32 0.2, %v1113_v3  ;;  %vm1129_vm9 = vcmp.gt.f32.partialorder %v1113_v3, 0.0  ;;  %v2012_v26 = vsel %vm1980_vm1, %v1964_v48, %v1996_v14  ;;  %v1590_v14 = vsel %vm1558_vm10, %v1542_v8, %v1574_v44 }
 0x306   :  { %v5782_v48 = vsel %vm5728_vm7, %v2012_v26, -1e+30  ;;  %v759_v33 = vsel %vm727_vm13, %v711_v15, %v743_v20  ;;  %v54_v49 = vunpack.c.2.s8 %v5697_v9  ;;  %v5799_v8 = vsel %vm5745_vm14, %v1590_v14, -1e+30  ;;  %v7203_v9 = vld [vmem:[#allocation14_spill] sm:$0xff] }
 0x307   :  { %2053 = vmax.xlane.f32.xlu1 %v5717_v4  ;;  %1201 = vmax.xlane.f32.xlu0 %v5721_v22  ;;  %v5751_v4 = vsel %vm5728_vm7, %v1162_v45, -1e+30  ;;  %v1116_v45 = vadd.f32 %v5293_v40, %v1095_v12  ;;  %v1161_v35 = vsel %vm1129_vm9, %v1113_v3, %v1145_v17  ;;  %v7199_v12 = vmov 0 }
 0x308   :  { %v7200_v12 = vsel %vm5776_vm0, 4294967295, %v7199_v12  ;;  %v5786_v3 = vsel %vm5745_vm14, %v1161_v35, -1e+30  ;;  %v710_v17 = vadd.f32 %v5291_v5, %v5260_v46  ;;  %vm1979_vm9 = vcmp.gt.f32.partialorder %v1963_v31, 0.0  ;;  %v7202_v46 = vld [vmem:[#allocation13_spill] sm:$0xff] }
 0x309   :  { %7201 = vst [vmem:[#allocation47_spill] sm:$0xff] %v7200_v12  ;;  %v1148_v6 = vmul.f32 0.2, %v1116_v45  ;;  %vm1132_vm1 = vcmp.gt.f32.partialorder %v1116_v45, 0.0  ;;  %v5795_v26 = vsel %vm5776_vm0, %v759_v33, -1e+30  ;;  %v1966_v35 = vadd.f32 %v5324_v24, %v7202_v46 }
 0x30a   :  { %v742_v5 = vmul.f32 0.2, %v710_v17  ;;  %v1115_v20 = vadd.f32 %v5293_v40, %v7203_v9  ;;  %vm726_vm13 = vcmp.gt.f32.partialorder %v710_v17, 0.0  ;;  %v7205_v14 = vmov 0  ;;  %v7208_v46 = vld [vmem:[#allocation15_spill] sm:$0xff] }
 0x30b   :  { %802 = vmax.xlane.f32.xlu1 %v5736_v21  ;;  %1630 = vmax.xlane.f32.xlu0 %v5740_v38  ;;  %v1524_v38 = vpop.permute.xlu0 %1523  ;;  %v1164_v44 = vsel %vm1132_vm1, %v1116_v45, %v1148_v6  ;;  %vm5815_vm1 = vcmp.gt.s32.totalorder %v54_v49, 0  ;;  %v1998_v40 = vmul.f32 0.2, %v1966_v35 }
 0x30c   :  { %v1545_v2 = vadd.f32 %v5308_v16, %v1524_v38  ;;  %v1995_v38 = vmul.f32 0.2, %v1963_v31  ;;  %v5809_v33 = vsel %vm5776_vm0, %v1164_v44, -1e+30  ;;  %v7206_v14 = vsel %vm5815_vm1, 4294967295, %v7205_v14 }
 0x30d   :  { %7207 = vst [vmem:[#allocation14_spill] sm:$0xff] %v7206_v14  ;;  %v1544_v44 = vadd.f32 %v5308_v16, %v7208_v46  ;;  %vm1131_vm7 = vcmp.gt.f32.partialorder %v1115_v20, 0.0 }
 0x30e   :  { %v1577_v27 = vmul.f32 0.2, %v1545_v2  ;;  %vm1561_vm10 = vcmp.gt.f32.partialorder %v1545_v2, 0.0  ;;  %v2011_v15 = vsel %vm1979_vm9, %v1963_v31, %v1995_v38  ;;  %v758_v31 = vsel %vm726_vm13, %v710_v17, %v742_v5  ;;  %v7209_v5 = vld [vmem:[#allocation17_spill] sm:$0xff] }
 0x30f   :  { %1207 = vmax.xlane.f32.xlu1 %v5751_v4  ;;  %2051 = vmax.xlane.f32.xlu0 %v5755_v1  ;;  %v5813_v45 = vsel %vm5745_vm14, %v2011_v15, -1e+30  ;;  %v1147_v38 = vmul.f32 0.2, %v1115_v20  ;;  %vm1982_vm9 = vcmp.gt.f32.partialorder %v1966_v35, 0.0  ;;  %v1965_v16 = vadd.f32 %v5324_v24, %v7209_v5 }
 0x310   :  { %7204 = vst [vmem:[#allocation13_spill] sm:$0xff] %v5813_v45  ;;  %v1593_v6 = vsel %vm1561_vm10, %v1545_v2, %v1577_v27  ;;  %v5829_v2 = vsel %vm5815_vm1, %v758_v31, -1e+30  ;;  %v2014_v17 = vsel %vm1982_vm9, %v1966_v35, %v1998_v40  ;;  %v1576_v49 = vmul.f32 0.2, %v1544_v44 }
 0x311   :  { %v5825_v15 = vsel %vm5776_vm0, %v1593_v6, -1e+30  ;;  %v1163_v27 = vsel %vm1131_vm7, %v1115_v20, %v1147_v38  ;;  %vm1560_vm10 = vcmp.gt.f32.partialorder %v1544_v44, 0.0  ;;  %v5837_v9 = vsel %vm5776_vm0, %v2014_v17, -1e+30 }
 0x312   :  { %7210 = vst [vmem:[#allocation15_spill] sm:$0xff] %v5837_v9  ;;  %v5841_v6 = vsel %vm5815_vm1, %v1163_v27, -1e+30  ;;  %v1592_v31 = vsel %vm1560_vm10, %v1544_v44, %v1576_v49  ;;  %v1997_v35 = vmul.f32 0.2, %v1965_v16  ;;  %vm1981_vm7 = vcmp.gt.f32.partialorder %v1965_v16, 0.0 }
 0x313   :  { %1636 = vmax.xlane.f32.xlu1 %v5765_v39  ;;  %800 = vmax.xlane.f32.xlu0 %v5769_v54  ;;  %v5847_v20 = vsel %vm5815_vm1, %v1592_v31, -1e+30  ;;  %vm2496_vm13 = vcmask 130048   ;;  %vm7123_vm9 = vcmask 392192   ;;  %vm7293_vm10 = vcmask 261120  }
 0x314   :  { %v2013_v24 = vsel %vm1981_vm7, %v1965_v16, %v1997_v35  ;;  %vm7294_vm7 = vmmov %vm7293_vm10 }
 0x315   :  { %v5852_v40 = vsel %vm5815_vm1, %v2013_v24, -1e+30  ;;  %vm7295_vm0 = vmmov %vm7294_vm7  ;;  %vm7300_vm1 = vcmask 392192  }
 0x316   :  { %7211 = vst [vmem:[#allocation17_spill] sm:$0xff] %v5852_v40  ;;  %vm7303_vm14 = vmmov %vm7300_vm1 }
 0x317   :  { %2057 = vmax.xlane.f32.xlu1 %v5782_v48  ;;  %1205 = vmax.xlane.f32.xlu0 %v5786_v3 }
 0x31b   :  { %806 = vmax.xlane.f32.xlu1 %v5795_v26  ;;  %1634 = vmax.xlane.f32.xlu0 %v5799_v8 }
 0x31f   :  { %1211 = vmax.xlane.f32.xlu1 %v5809_v33  ;;  %2055 = vmax.xlane.f32.xlu0 %v5813_v45 }
 0x323   :  { %1640 = vmax.xlane.f32.xlu1 %v5825_v15  ;;  %804 = vmax.xlane.f32.xlu0 %v5829_v2 }
 0x327   :  { %2061 = vmax.xlane.f32.xlu1 %v5837_v9  ;;  %1209 = vmax.xlane.f32.xlu0 %v5841_v6 }
 0x32b   :  { %1638 = vmax.xlane.f32.xlu0 %v5847_v20 }
 0x32f   :  { %2059 = vmax.xlane.f32.xlu0 %v5852_v40  ;;  %v7223_v40 = vld [vmem:[#allocation26_spill] sm:$0xff] }
 0x338   :  { %v779_v38 = vpop.xlane.xlu1 %778  ;;  %v777_v46 = vpop.xlane.xlu0 %776 }
 0x339   :  { %v809_v17 = vsub.f32 %v5328_v13, %v779_v38  ;;  %v808_v44 = vsub.f32 %v5332_v62, %v777_v46 }
 0x33b   :  { %v826_v27 = vmul.f32 1.442695, %v809_v17  ;;  %v824_v49 = vmul.f32 1.442695, %v808_v44 }
 0x33c   :  { %v1184_v5 = vpop.xlane.xlu1 %1183  ;;  %v783_v31 = vpop.xlane.xlu0 %782 }
 0x33d   :  { %4413 = vpow2.f32 %v826_v27  ;;  %v811_v12 = vsub.f32 %v5348_v47, %v783_v31  ;;  %v1214_v29 = vsub.f32 %v5342_v53, %v1184_v5 }
 0x33e   :  { %4415 = vpow2.f32 %v824_v49 }
 0x33f   :  { %v830_v16 = vmul.f32 1.442695, %v811_v12  ;;  %v1231_v46 = vmul.f32 1.442695, %v1214_v29 }
 0x340   :  { %v1188_v35 = vpop.xlane.xlu1 %1187  ;;  %v1182_v24 = vpop.xlane.xlu0 %1181 }
 0x341   :  { %v1213_v14 = vsub.f32 %v5362_v43, %v1182_v24  ;;  %4417 = vpow2.f32 %v830_v16  ;;  %v1216_v17 = vsub.f32 %v5358_v37, %v1188_v35 }
 0x343   :  { %v1229_v52 = vmul.f32 1.442695, %v1213_v14  ;;  %v1235_v53 = vmul.f32 1.442695, %v1216_v17 }
 0x344   :  { %v1613_v13 = vpop.xlane.xlu1 %1612  ;;  %v1611_v38 = vpop.xlane.xlu0 %1610 }
 0x345   :  { %v1643_v62 = vsub.f32 %v5374_v42, %v1613_v13  ;;  %4419 = vpow2.f32 %v1229_v52  ;;  %v1642_v14 = vsub.f32 %v5379_v60, %v1611_v38 }
 0x347   :  { %v1660_v44 = vmul.f32 1.442695, %v1643_v62  ;;  %v7212_v62 = vld [vmem:[#allocation23_spill] sm:$0xff] }
 0x348   :  { %v1617_v47 = vpop.xlane.xlu1 %1616  ;;  %v2032_v27 = vpop.xlane.xlu0 %2031 }
 0x349   :  { %4421 = vpow2.f32 %v1660_v44  ;;  %v1645_v12 = vsub.f32 %v5402_v56, %v1617_v47  ;;  %v2063_v43 = vsub.f32 %v5406_v51, %v2032_v27  ;;  %v1658_v51 = vmul.f32 1.442695, %v1642_v14  ;;  %v7214_v14 = vld [vmem:[#allocation24_spill] sm:$0xff] }
 0x34a   :  { %v5864_v49 = vpop.eup %4413  ;;  %4423 = vpow2.f32 %v1231_v46 }
 0x34b   :  { %v5867_v5 = vpop.eup %4415  ;;  %v1664_v42 = vmul.f32 1.442695, %v1645_v12  ;;  %858 = vadd.xlane.f32.xlu1 %v5864_v49  ;;  %v2079_v29 = vmul.f32 1.442695, %v2063_v43 }
 0x34c   :  { %856 = vadd.xlane.f32.xlu0 %v5867_v5  ;;  %v2034_v37 = vpop.xlane.xlu1 %2033  ;;  %v781_v52 = vpop.xlane.xlu0 %780 }
 0x34d   :  { %4425 = vpow2.f32 %v1664_v42  ;;  %v2064_v56 = vsub.f32 %v5414_v10, %v2034_v37  ;;  %v810_v31 = vsub.f32 %v5419_v58, %v781_v52 }
 0x34e   :  { %4427 = vpow2.f32 %v1235_v53  ;;  %v5873_v16 = vpop.eup %4417 }
 0x34f   :  { %862 = vadd.xlane.f32.xlu1 %v5873_v16  ;;  %4429 = vpow2.f32 %v2079_v29  ;;  %v2081_v24 = vmul.f32 1.442695, %v2064_v56  ;;  %v828_v38 = vmul.f32 1.442695, %v810_v31 }
 0x350   :  { %v2038_v60 = vpop.xlane.xlu1 %2037  ;;  %v1186_v35 = vpop.xlane.xlu0 %1185  ;;  %4431 = vpow2.f32 %v1658_v51 }
 0x351   :  { %v2066_v13 = vsub.f32 %v5431_v59, %v2038_v60  ;;  %v1215_v46 = vsub.f32 %v7212_v62, %v1186_v35  ;;  %4433 = vpow2.f32 %v2081_v24 }
 0x352   :  { %v5878_v17 = vpop.eup %4419  ;;  %4435 = vpow2.f32 %v828_v38 }
 0x353   :  { %1261 = vadd.xlane.f32.xlu1 %v5878_v17  ;;  %v2085_v44 = vmul.f32 1.442695, %v2066_v13  ;;  %v1233_v12 = vmul.f32 1.442695, %v1215_v46 }
 0x354   :  { %v787_v10 = vpop.xlane.xlu1 %786  ;;  %v1615_v58 = vpop.xlane.xlu0 %1614 }
 0x355   :  { %v1644_v47 = vsub.f32 %v5456_v30, %v1615_v58  ;;  %4437 = vpow2.f32 %v2085_v44  ;;  %v813_v42 = vsub.f32 %v7214_v14, %v787_v10 }
 0x356   :  { %v5882_v27 = vpop.eup %4421  ;;  %4439 = vpow2.f32 %v1233_v12 }
 0x357   :  { %7213 = vst [vmem:[#allocation23_spill] sm:$0xff] %v5882_v27  ;;  %v5884_v43 = vpop.eup %4423  ;;  %1692 = vadd.xlane.f32.xlu0 %v5882_v27  ;;  %v1662_v37 = vmul.f32 1.442695, %v1644_v47  ;;  %v834_v60 = vmul.f32 1.442695, %v813_v42 }
 0x358   :  { %1263 = vadd.xlane.f32.xlu1 %v5884_v43  ;;  %v1192_v59 = vpop.xlane.xlu1 %1191  ;;  %v2036_v53 = vpop.xlane.xlu0 %2035 }
 0x359   :  { %v2065_v52 = vsub.f32 %v5474_v32, %v2036_v53  ;;  %4441 = vpow2.f32 %v1662_v37  ;;  %v1218_v35 = vsub.f32 %v5466_v50, %v1192_v59 }
 0x35a   :  { %v5890_v29 = vpop.eup %4425 }
 0x35b   :  { %7215 = vst [vmem:[#allocation24_spill] sm:$0xff] %v5890_v29  ;;  %v5892_v30 = vpop.eup %4427  ;;  %v2083_v56 = vmul.f32 1.442695, %v2065_v52  ;;  %1696 = vadd.xlane.f32.xlu0 %v5890_v29  ;;  %v1239_v10 = vmul.f32 1.442695, %v1218_v35 }
 0x35c   :  { %1267 = vadd.xlane.f32.xlu1 %v5892_v30  ;;  %v5896_v51 = vpop.xlane.xlu1 %1620  ;;  %v785_v31 = vpop.xlane.xlu0 %784 }
 0x35d   :  { %v812_v24 = vsub.f32 %v5491_v57, %v785_v31  ;;  %v5900_v32 = vpop.eup %4429  ;;  %4443 = vpow2.f32 %v2083_v56  ;;  %v1647_v45 = vsub.f32 %v7223_v40, %v5896_v51  ;;  %v7224_v40 = vld [vmem:[#allocation30_spill] sm:$0xff] }
 0x35e   :  { %7216 = vst [vmem:[#allocation48_spill] sm:$0xff] %v5900_v32  ;;  %v5902_v13 = vpop.eup %4431  ;;  %4445 = vpow2.f32 %v834_v60 }
 0x35f   :  { %7217 = vst [vmem:[#allocation49_spill] sm:$0xff] %v5902_v13  ;;  %v832_v38 = vmul.f32 1.442695, %v812_v24  ;;  %2111 = vadd.xlane.f32.xlu0 %v5900_v32  ;;  %v5909_v50 = vpop.eup %4433 }
 0x360   :  { %1690 = vadd.xlane.f32.xlu1 %v5902_v13  ;;  %v5906_v62 = vpop.xlane.xlu1 %2041  ;;  %v1190_v46 = vpop.xlane.xlu0 %1189  ;;  %7218 = vst [vmem:[#allocation50_spill] sm:$0xff] %v5909_v50 }
 0x361   :  { %v1217_v58 = vsub.f32 %v5511_v18, %v1190_v46  ;;  %4447 = vpow2.f32 %v832_v38  ;;  %v5911_v57 = vpop.eup %4435 }
 0x362   :  { %4449 = vpow2.f32 %v1239_v10  ;;  %v5917_v14 = vpop.eup %4437 }
 0x363   :  { %2113 = vadd.xlane.f32.xlu0 %v5909_v50  ;;  %v1237_v12 = vmul.f32 1.442695, %v1217_v58  ;;  %7219 = vst [vmem:[#allocation51_spill] sm:$0xff] %v5917_v14  ;;  %v5919_v18 = vpop.eup %4439 }
 0x364   :  { %860 = vadd.xlane.f32.xlu1 %v5911_v57  ;;  %v791_v44 = vpop.xlane.xlu1 %790  ;;  %v1619_v47 = vpop.xlane.xlu0 %1618 }
 0x365   :  { %v815_v59 = vsub.f32 %v5521_v36, %v791_v44  ;;  %v1646_v53 = vsub.f32 %v5526_v55, %v1619_v47  ;;  %4451 = vpow2.f32 %v1237_v12 }
 0x366   :  { %v5926_v60 = vpop.eup %4441 }
 0x367   :  { %v1666_v42 = vmul.f32 1.442695, %v1646_v53  ;;  %2117 = vadd.xlane.f32.xlu0 %v5917_v14  ;;  %v838_v56 = vmul.f32 1.442695, %v815_v59  ;;  %7220 = vst [vmem:[#allocation52_spill] sm:$0xff] %v5926_v60 }
 0x368   :  { %1265 = vadd.xlane.f32.xlu1 %v5919_v18  ;;  %v1196_v37 = vpop.xlane.xlu1 %1195  ;;  %v5923_v52 = vpop.xlane.xlu0 %2039 }
 0x369   :  { %v1220_v31 = vsub.f32 %v5538_v41, %v1196_v37  ;;  %4453 = vpow2.f32 %v1666_v42  ;;  %v2067_v51 = vsub.f32 %v7224_v40, %v5923_v52  ;;  %v7227_v52 = vld [vmem:[#allocation35_spill] sm:$0xff] }
 0x36a   :  { %v5928_v36 = vpop.eup %4443  ;;  %4455 = vpow2.f32 %v838_v56 }
 0x36b   :  { %7221 = vst [vmem:[#allocation53_spill] sm:$0xff] %v5928_v36  ;;  %1694 = vadd.xlane.f32.xlu0 %v5926_v60  ;;  %v1243_v24 = vmul.f32 1.442695, %v1220_v31  ;;  %v5935_v46 = vpop.eup %4445 }
 0x36c   :  { %2115 = vadd.xlane.f32.xlu1 %v5928_v36  ;;  %v5932_v55 = vpop.xlane.xlu1 %1624  ;;  %v789_v35 = vpop.xlane.xlu0 %788 }
 0x36d   :  { %v814_v38 = vsub.f32 %v5568_v0, %v789_v35  ;;  %4457 = vpow2.f32 %v1243_v24 }
 0x36e   :  { %v5937_v10 = vpop.eup %4447 }
 0x36f   :  { %v836_v41 = vmul.f32 1.442695, %v814_v38  ;;  %866 = vadd.xlane.f32.xlu0 %v5935_v46  ;;  %v5944_v12 = vpop.eup %4449 }
 0x370   :  { %864 = vadd.xlane.f32.xlu1 %v5937_v10  ;;  %v5941_v58 = vpop.xlane.xlu1 %2045  ;;  %v1194_v44 = vpop.xlane.xlu0 %1193 }
 0x371   :  { %v1219_v47 = vsub.f32 %v5586_v11, %v1194_v44  ;;  %4459 = vpow2.f32 %v836_v41 }
 0x372   :  { %v5950_v37 = vpop.eup %4451 }
 0x373   :  { %v1241_v59 = vmul.f32 1.442695, %v1219_v47  ;;  %1271 = vadd.xlane.f32.xlu0 %v5944_v12 }
 0x374   :  { %v795_v0 = vpop.xlane.xlu1 %794  ;;  %v5947_v53 = vpop.xlane.xlu0 %1622 }
 0x375   :  { %v817_v42 = vsub.f32 %v5598_v28, %v795_v0  ;;  %4461 = vpow2.f32 %v1241_v59 }
 0x376   :  { %v5952_v56 = vpop.eup %4453 }
 0x377   :  { %7222 = vst [vmem:[#allocation54_spill] sm:$0xff] %v5952_v56  ;;  %v842_v31 = vmul.f32 1.442695, %v817_v42  ;;  %1269 = vadd.xlane.f32.xlu0 %v5950_v37  ;;  %1698 = vadd.xlane.f32.xlu1 %v5952_v56  ;;  %v5959_v38 = vpop.eup %4455 }
 0x378   :  { %v1200_v11 = vpop.xlane.xlu1 %1199  ;;  %v5956_v35 = vpop.xlane.xlu0 %2043 }
 0x379   :  { %4463 = vpow2.f32 %v842_v31  ;;  %v1222_v24 = vsub.f32 %v5613_v61, %v1200_v11 }
 0x37a   :  { %v5965_v59 = vpop.eup %4457 }
 0x37b   :  { %v1247_v41 = vmul.f32 1.442695, %v1222_v24  ;;  %870 = vadd.xlane.f32.xlu0 %v5959_v38 }
 0x37c   :  { %v5962_v28 = vpop.xlane.xlu1 %1628  ;;  %v793_v44 = vpop.xlane.xlu0 %792 }
 0x37d   :  { %4465 = vpow2.f32 %v1247_v41  ;;  %v816_v47 = vsub.f32 %v5636_v23, %v793_v44 }
 0x37e   :  { %v5967_v0 = vpop.eup %4459 }
 0x37f   :  { %v840_v42 = vmul.f32 1.442695, %v816_v47  ;;  %1275 = vadd.xlane.f32.xlu0 %v5965_v59  ;;  %868 = vadd.xlane.f32.xlu1 %v5967_v0 }
 0x380   :  { %v5971_v61 = vpop.xlane.xlu1 %2049  ;;  %v1198_v31 = vpop.xlane.xlu0 %1197 }
 0x381   :  { %v1221_v11 = vsub.f32 %v5654_v25, %v1198_v31  ;;  %4467 = vpow2.f32 %v840_v42 }
 0x382   :  { %v5974_v24 = vpop.eup %4461 }
 0x383   :  { %v1245_v41 = vmul.f32 1.442695, %v1221_v11  ;;  %1273 = vadd.xlane.f32.xlu0 %v5974_v24 }
 0x384   :  { %v799_v23 = vpop.xlane.xlu1 %798  ;;  %v5977_v44 = vpop.xlane.xlu0 %1626 }
 0x385   :  { %v819_v47 = vsub.f32 %v5665_v19, %v799_v23  ;;  %4469 = vpow2.f32 %v1245_v41 }
 0x386   :  { %v5980_v56 = vpop.eup %4463 }
 0x387   :  { %v846_v29 = vmul.f32 1.442695, %v819_v47  ;;  %874 = vadd.xlane.f32.xlu1 %v5980_v56 }
 0x388   :  { %v1204_v60 = vpop.xlane.xlu1 %1203  ;;  %v5983_v14 = vpop.xlane.xlu0 %2047 }
 0x389   :  { %4471 = vpow2.f32 %v846_v29  ;;  %v1224_v25 = vsub.f32 %v5686_v7, %v1204_v60 }
 0x38a   :  { %v5986_v42 = vpop.eup %4465 }
 0x38b   :  { %v1251_v31 = vmul.f32 1.442695, %v1224_v25  ;;  %1279 = vadd.xlane.f32.xlu0 %v5986_v42 }
 0x38c   :  { %v5989_v11 = vpop.xlane.xlu1 %1632  ;;  %v797_v19 = vpop.xlane.xlu0 %796 }
 0x38d   :  { %4473 = vpow2.f32 %v1251_v31  ;;  %v818_v41 = vsub.f32 %v5707_v63, %v797_v19 }
 0x38e   :  { %v5992_v23 = vpop.eup %4467 }
 0x38f   :  { %v844_v47 = vmul.f32 1.442695, %v818_v41  ;;  %872 = vadd.xlane.f32.xlu1 %v5992_v23 }
 0x390   :  { %v5995_v36 = vpop.xlane.xlu1 %2053  ;;  %v1202_v29 = vpop.xlane.xlu0 %1201 }
 0x391   :  { %v1223_v7 = vsub.f32 %v5721_v22, %v1202_v29  ;;  %4475 = vpow2.f32 %v844_v47 }
 0x392   :  { %v5998_v60 = vpop.eup %4469 }
 0x393   :  { %v1249_v25 = vmul.f32 1.442695, %v1223_v7  ;;  %1277 = vadd.xlane.f32.xlu0 %v5998_v60 }
 0x394   :  { %v803_v32 = vpop.xlane.xlu1 %802  ;;  %v6001_v31 = vpop.xlane.xlu0 %1630 }
 0x395   :  { %v821_v63 = vsub.f32 %v5736_v21, %v803_v32  ;;  %4477 = vpow2.f32 %v1249_v25 }
 0x396   :  { %v6004_v19 = vpop.eup %4471 }
 0x397   :  { %v850_v41 = vmul.f32 1.442695, %v821_v63  ;;  %878 = vadd.xlane.f32.xlu1 %v6004_v19 }
 0x398   :  { %v1208_v50 = vpop.xlane.xlu1 %1207  ;;  %v6007_v27 = vpop.xlane.xlu0 %2051 }
 0x399   :  { %4479 = vpow2.f32 %v850_v41  ;;  %v1226_v22 = vsub.f32 %v5751_v4, %v1208_v50 }
 0x39a   :  { %v6010_v47 = vpop.eup %4473 }
 0x39b   :  { %v1255_v29 = vmul.f32 1.442695, %v1226_v22  ;;  %1283 = vadd.xlane.f32.xlu0 %v6010_v47 }
 0x39c   :  { %v6013_v7 = vpop.xlane.xlu1 %1636  ;;  %v801_v21 = vpop.xlane.xlu0 %800 }
 0x39d   :  { %4481 = vpow2.f32 %v1255_v29  ;;  %v820_v32 = vsub.f32 %v5769_v54, %v801_v21 }
 0x39e   :  { %v6016_v25 = vpop.eup %4475 }
 0x39f   :  { %v848_v63 = vmul.f32 1.442695, %v820_v32  ;;  %876 = vadd.xlane.f32.xlu0 %v6016_v25 }
 0x3a0   :  { %v6019_v13 = vpop.xlane.xlu1 %2057  ;;  %v1206_v41 = vpop.xlane.xlu0 %1205 }
 0x3a1   :  { %v1225_v4 = vsub.f32 %v5786_v3, %v1206_v41  ;;  %4483 = vpow2.f32 %v848_v63 }
 0x3a2   :  { %v6022_v50 = vpop.eup %4477 }
 0x3a3   :  { %v1253_v22 = vmul.f32 1.442695, %v1225_v4  ;;  %1281 = vadd.xlane.f32.xlu0 %v6022_v50  ;;  %v1668_v4 = vmul.f32 1.442695, %v1647_v45  ;;  %v7225_v45 = vld [vmem:[#allocation27_spill] sm:$0xff] }
 0x3a4   :  { %v807_v9 = vpop.xlane.xlu1 %806 }
 0x3a5   :  { %v823_v29 = vsub.f32 %v5795_v26, %v807_v9  ;;  %4485 = vpow2.f32 %v1253_v22  ;;  %v1649_v26 = vsub.f32 %v5561_v34, %v5932_v55  ;;  %v2087_v34 = vmul.f32 1.442695, %v2067_v51 }
 0x3a6   :  { %v6026_v54 = vpop.eup %4479 }
 0x3a7   :  { %v854_v21 = vmul.f32 1.442695, %v823_v29  ;;  %882 = vadd.xlane.f32.xlu0 %v6026_v54  ;;  %v1672_v22 = vmul.f32 1.442695, %v1649_v26  ;;  %v6044_v29 = vpop.xlane.xlu0 %1634 }
 0x3a8   :  { %v1212_v32 = vpop.xlane.xlu1 %1211 }
 0x3a9   :  { %4487 = vpow2.f32 %v854_v21  ;;  %v1228_v3 = vsub.f32 %v5809_v33, %v1212_v32  ;;  %v2068_v21 = vsub.f32 %v7225_v45, %v5906_v62  ;;  %v7230_v62 = vld [vmem:[#allocation31_spill] sm:$0xff] }
 0x3aa   :  { %v6032_v63 = vpop.eup %4481  ;;  %v2070_v26 = vsub.f32 %v7230_v62, %v5941_v58 }
 0x3ab   :  { %v1259_v41 = vmul.f32 1.442695, %v1228_v3  ;;  %1287 = vadd.xlane.f32.xlu1 %v6032_v63  ;;  %v2089_v32 = vmul.f32 1.442695, %v2068_v21  ;;  %v2069_v3 = vsub.f32 %v7227_v52, %v5956_v35 }
 0x3ac   :  { %v2093_v45 = vmul.f32 1.442695, %v2070_v26  ;;  %v6074_v52 = vpop.xlane.xlu1 %1640 }
 0x3ad   :  { %4489 = vpow2.f32 %v1259_v41  ;;  %v6054_v41 = vpop.xlane.xlu0 %2055  ;;  %v2091_v40 = vmul.f32 1.442695, %v2069_v3 }
 0x3ae   :  { %v6037_v9 = vpop.eup %4483  ;;  %4491 = vpow2.f32 %v1668_v4  ;;  %7228 = vst [vmem:[#allocation30_spill] sm:$0xff] %v6054_v41 }
 0x3af   :  { %880 = vadd.xlane.f32.xlu0 %v6037_v9  ;;  %4493 = vpow2.f32 %v1672_v22 }
 0x3b0   :  { %4495 = vpow2.f32 %v2087_v34  ;;  %v7233_v34 = vld [vmem:[#allocation3_spill] sm:$0xff]  ;;  %v6082_v26 = vpop.xlane.xlu1 %2061 }
 0x3b1   :  { %4497 = vpow2.f32 %v2089_v32  ;;  %v805_v22 = vpop.xlane.xlu0 %804  ;;  %7237 = vst [vmem:[#allocation57_spill] sm:$0xff] %v6082_v26 }
 0x3b2   :  { %v6042_v33 = vpop.eup %4485  ;;  %4499 = vpow2.f32 %v2091_v40 }
 0x3b3   :  { %1285 = vadd.xlane.f32.xlu1 %v6042_v33  ;;  %4501 = vpow2.f32 %v2093_v45 }
 0x3b5   :  { %v1210_v35 = vpop.xlane.xlu0 %1209 }
 0x3b6   :  { %v6049_v55 = vpop.eup %4487 }
 0x3b7   :  { %7226 = vst [vmem:[#allocation26_spill] sm:$0xff] %v6049_v55  ;;  %886 = vadd.xlane.f32.xlu0 %v6049_v55 }
 0x3b9   :  { %v6076_v3 = vpop.xlane.xlu0 %1638 }
 0x3ba   :  { %v6056_v4 = vpop.eup %4489 }
 0x3bb   :  { %7229 = vst [vmem:[#allocation27_spill] sm:$0xff] %v6056_v4  ;;  %1291 = vadd.xlane.f32.xlu0 %v6056_v4  ;;  %v6061_v51 = vpop.eup %4491 }
 0x3bc   :  { %7231 = vst [vmem:[#allocation35_spill] sm:$0xff] %v6061_v51  ;;  %v6064_v21 = vpop.eup %4493 }
 0x3bd   :  { %7232 = vst [vmem:[#allocation31_spill] sm:$0xff] %v6064_v21  ;;  %v6069_v32 = vpop.eup %4495  ;;  %v6084_v40 = vpop.xlane.xlu0 %2059 }
 0x3be   :  { %7234 = vst [vmem:[#allocation3_spill] sm:$0xff] %v6069_v32  ;;  %v6072_v58 = vpop.eup %4497  ;;  %7238 = vst [vmem:[#allocation58_spill] sm:$0xff] %v6084_v40 }
 0x3bf   :  { %1700 = vadd.xlane.f32.xlu0 %v6061_v51  ;;  %7235 = vst [vmem:[#allocation55_spill] sm:$0xff] %v6072_v58  ;;  %v6079_v62 = vpop.eup %4499 }
 0x3c0   :  { %7236 = vst [vmem:[#allocation56_spill] sm:$0xff] %v6079_v62  ;;  %v6086_v45 = vpop.eup %4501 }
 0x3c1   :  { %7239 = vst [vmem:[#allocation59_spill] sm:$0xff] %v6086_v45 }
 0x3c3   :  { %1704 = vadd.xlane.f32.xlu0 %v6064_v21 }
 0x3c4   :  { %2193 = vrot.lane.b32.xlu1 %v7233_v34, %s4799_s21  ;;  %v822_v34 = vsub.f32 %v5829_v2, %v805_v22 }
 0x3c7   :  { %2119 = vadd.xlane.f32.xlu0 %v6069_v32  ;;  %v852_v32 = vmul.f32 1.442695, %v822_v34 }
 0x3cb   :  { %2121 = vadd.xlane.f32.xlu0 %v6072_v58  ;;  %v1227_v58 = vsub.f32 %v5841_v6, %v1210_v35 }
 0x3cd   :  { %v1257_v26 = vmul.f32 1.442695, %v1227_v58 }
 0x3cf   :  { %2123 = vadd.xlane.f32.xlu0 %v6079_v62  ;;  %v7240_v62 = vld [vmem:[#allocation33_spill] sm:$0xff] }
 0x3d0   :  { %v1648_v55 = vsub.f32 %v7240_v62, %v5947_v53 }
 0x3d2   :  { %v1670_v41 = vmul.f32 1.442695, %v1648_v55 }
 0x3d3   :  { %2125 = vadd.xlane.f32.xlu0 %v6086_v45 }
 0x3d4   :  { %v859_v21 = vpop.xlane.xlu1 %858 }
 0x3d5   :  { %4503 = vrcp.f32 %v859_v21  ;;  %v857_v51 = vpop.xlane.xlu0 %856 }
 0x3d6   :  { %4505 = vrcp.f32 %v857_v51 }
 0x3d7   :  { %4507 = vpow2.f32 %v852_v32 }
 0x3d8   :  { %v863_v4 = vpop.xlane.xlu1 %862  ;;  %4509 = vpow2.f32 %v1257_v26  ;;  %v7244_v26 = vld [vmem:[#allocation5_spill] sm:$0xff] }
 0x3dc   :  { %v1262_v40 = vpop.xlane.xlu1 %1261 }
 0x3dd   :  { %4511 = vrcp.f32 %v1262_v40 }
 0x3e0   :  { %v6093_v2 = vpop.xlane.xlu0 %1692 }
 0x3e1   :  { %v1264_v22 = vpop.xlane.xlu1 %1263 }
 0x3e2   :  { %v4504_v45 = vpop.eup %4503  ;;  %4513 = vrcp.f32 %v1264_v22 }
 0x3e3   :  { %v4506_v21 = vpop.eup %4505  ;;  %4515 = vpow2.f32 %v1670_v41  ;;  %v905_v51 = vmul.f32 %v4504_v45, %v5864_v49  ;;  %v7246_v45 = vld [vmem:[#allocation6_spill] sm:$0xff] }
 0x3e4   :  { %v6096_v6 = vpop.xlane.xlu0 %1696  ;;  %v904_v35 = vmul.f32 %v4506_v21, %v5867_v5  ;;  %v6099_v58 = vpop.eup %4507  ;;  %4517 = vrcp.f32 %v863_v4 }
 0x3e5   :  { %7241 = vst [vmem:[#allocation33_spill] sm:$0xff] %v6096_v6  ;;  %v1268_v53 = vpop.xlane.xlu1 %1267  ;;  %7242 = vst [vmem:[#allocation60_spill] sm:$0xff] %v6099_v58  ;;  %v6108_v41 = vpop.eup %4509 }
 0x3e6   :  { %v920_v32 = vpack.c.bf16 %v905_v51, %v904_v35  ;;  %7245 = vst [vmem:[#allocation5_spill] sm:$0xff] %v6108_v41 }
 0x3e8   :  { %4120 = vmatprep.mubr.bf16.mxu1 %v920_v32  ;;  %v6101_v55 = vpop.xlane.xlu0 %2111  ;;  %884 = vadd.xlane.f32.xlu1 %v6099_v58 }
 0x3e9   :  { %7243 = vst [vmem:[#allocation61_spill] sm:$0xff] %v6101_v55  ;;  %v6103_v62 = vpop.xlane.xlu1 %1690  ;;  %1770 = vrot.lane.b32.xlu0 %v7244_v26, %s4798_s4 }
 0x3ea   :  { %v4512_v5 = vpop.eup %4511 }
 0x3eb   :  { %v1309_v51 = vmul.f32 %v4512_v5, %v5878_v17 }
 0x3ec   :  { %v6110_v49 = vpop.xlane.xlu0 %2113  ;;  %1289 = vadd.xlane.f32.xlu1 %v6108_v41 }
 0x3ed   :  { %v861_v40 = vpop.xlane.xlu1 %860  ;;  %1768 = vrot.lane.b32.xlu0 %v7246_v45, %s4798_s4 }
 0x3ee   :  { %4519 = vrcp.f32 %v861_v40  ;;  %v7249_v40 = vld [vmem:[#allocation36_spill] sm:$0xff] }
 0x3ef   :  { %v4514_v34 = vpop.eup %4513  ;;  %4521 = vrcp.f32 %v1268_v53  ;;  %v1651_v58 = vsub.f32 %v7249_v40, %v5962_v28 }
 0x3f0   :  { %v6115_v22 = vpop.eup %4515  ;;  %v6117_v21 = vpop.xlane.xlu0 %2117  ;;  %v1310_v4 = vmul.f32 %v4514_v34, %v5884_v43 }
 0x3f1   :  { %7247 = vst [vmem:[#allocation6_spill] sm:$0xff] %v6115_v22  ;;  %7248 = vst [vmem:[#allocation62_spill] sm:$0xff] %v6117_v21  ;;  %v1266_v35 = vpop.xlane.xlu1 %1265  ;;  %1702 = vadd.xlane.f32.xlu1 %v6115_v22  ;;  %v4518_v55 = vpop.eup %4517  ;;  %v1676_v17 = vmul.f32 1.442695, %v1651_v58  ;;  %v7251_v58 = vld [vmem:[#allocation11_spill] sm:$0xff] }
 0x3f2   :  { %4523 = vrcp.f32 %v1266_v35  ;;  %v1325_v32 = vpack.c.bf16 %v1310_v4, %v1309_v51  ;;  %v907_v51 = vmul.f32 %v4518_v55, %v5873_v16 }
 0x3f4   :  { %4152 = vmatprep.mubr.bf16.mxu0 %v1325_v32  ;;  %v6122_v6 = vpop.xlane.xlu0 %1694 }
 0x3f5   :  { %v6124_v41 = vpop.xlane.xlu1 %2115 }
 0x3f8   :  { %v867_v53 = vpop.xlane.xlu0 %866 }
 0x3f9   :  { %v865_v21 = vpop.xlane.xlu1 %864  ;;  %4525 = vrcp.f32 %v867_v53  ;;  %v7250_v53 = vld [vmem:[#allocation9_spill] sm:$0xff] }
 0x3fa   :  { %4527 = vrcp.f32 %v865_v21  ;;  %v7252_v21 = vld [vmem:[#allocation10_spill] sm:$0xff] }
 0x3fb   :  { %v4520_v43 = vpop.eup %4519  ;;  %4529 = vpow2.f32 %v1676_v17  ;;  %v7253_v17 = vld [vmem:[#allocation8_spill] sm:$0xff] }
 0x3fc   :  { %v1272_v5 = vpop.xlane.xlu0 %1271  ;;  %v906_v34 = vmul.f32 %v4520_v43, %v5911_v57  ;;  %v4522_v4 = vpop.eup %4521 }
 0x3fd   :  { %4531 = vrcp.f32 %v1272_v5  ;;  %v1312_v40 = vmul.f32 %v4522_v4, %v5892_v30  ;;  %v7254_v30 = vld [vmem:[#allocation12_spill] sm:$0xff] }
 0x3fe   :  { %v921_v35 = vpack.c.bf16 %v907_v51, %v906_v34 }
 0x3ff   :  { %v4524_v32 = vpop.eup %4523 }
 0x400   :  { %4121 = vmatmul.mubr.bf16.vlgmr.msra.gmra.mxu1 %v921_v35  ;;  %v1270_v22 = vpop.xlane.xlu0 %1269  ;;  %v1311_v28 = vmul.f32 %v4524_v32, %v5919_v18  ;;  %v6136_v55 = vpop.xlane.xlu1 %1698 }
 0x401   :  { %4169 = vmatpush3.bf16.msra.mxu1 %v7250_v53  ;;  %4533 = vrcp.f32 %v1270_v22 }
 0x402   :  { %4170 = vmatprep.subr.bf16.mxu1 %v7251_v58  ;;  %2191 = vrot.lane.b32.xlu1 %v7244_v26, %s4799_s21  ;;  %v1326_v16 = vpack.c.bf16 %v1312_v40, %v1311_v28  ;;  %v7255_v28 = vld [vmem:[#allocation39_spill] sm:$0xff] }
 0x404   :  { %4153 = vmatmul.mubr.bf16.vlgmr.msra.gmra.mxu0 %v1326_v16  ;;  %v871_v57 = vpop.xlane.xlu0 %870 }
 0x405   :  { %4171 = vmatpush3.bf16.msra.mxu1 %v7251_v58  ;;  %4201 = vmatpush3.bf16.msra.mxu0 %v7252_v21  ;;  %4535 = vrcp.f32 %v871_v57  ;;  %v7256_v57 = vld [vmem:[#allocation45_spill] sm:$0xff] }
 0x406   :  { %v4526_v18 = vpop.eup %4525  ;;  %4172 = vmatprep.subr.bf16.mxu1 %v7253_v17  ;;  %4202 = vmatprep.subr.bf16.mxu0 %v7254_v30  ;;  %v1652_v21 = vsub.f32 %v7256_v57, %v6001_v31 }
 0x407   :  { %v4528_v22 = vpop.eup %4527  ;;  %v909_v43 = vmul.f32 %v4526_v18, %v5935_v46 }
 0x408   :  { %v1276_v5 = vpop.xlane.xlu0 %1275  ;;  %v908_v26 = vmul.f32 %v4528_v22, %v5937_v10  ;;  %v869_v34 = vpop.xlane.xlu1 %868  ;;  %v1650_v10 = vsub.f32 %v7255_v28, %v5977_v44  ;;  %v1678_v22 = vmul.f32 1.442695, %v1652_v21 }
 0x409   :  { %4173 = vmatpush3.bf16.msra.mxu1 %v7253_v17  ;;  %4203 = vmatpush3.bf16.msra.mxu0 %v7254_v30  ;;  %4537 = vrcp.f32 %v869_v34  ;;  %v6146_v4 = vpop.eup %4529 }
 0x40a   :  { %v922_v51 = vpack.c.bf16 %v909_v43, %v908_v26  ;;  %v4532_v35 = vpop.eup %4531  ;;  %4539 = vrcp.f32 %v1276_v5  ;;  %v1674_v16 = vmul.f32 1.442695, %v1650_v10  ;;  %v7257_v43 = vld [vmem:[#allocation42_spill] sm:$0xff]  ;;  %v7259_v10 = vld [vmem:[#allocation37_spill] sm:$0xff] }
 0x40b   :  { %v1314_v53 = vmul.f32 %v4532_v35, %v5944_v12  ;;  %v1653_v5 = vsub.f32 %v7257_v43, %v5989_v11  ;;  %v7258_v35 = vld [vmem:[#allocation41_spill] sm:$0xff] }
 0x40c   :  { %4124 = vmatprep.mubr.bf16.mxu1 %v922_v51  ;;  %1708 = vadd.xlane.f32.xlu0 %v6146_v4  ;;  %v1274_v32 = vpop.xlane.xlu0 %1273 }
 0x40d   :  { %4541 = vrcp.f32 %v1274_v32  ;;  %v2071_v32 = vsub.f32 %v7258_v35, %v5983_v14 }
 0x40e   :  { %v4534_v46 = vpop.eup %4533  ;;  %4543 = vpow2.f32 %v1674_v16 }
 0x40f   :  { %v1313_v40 = vmul.f32 %v4534_v46, %v5950_v37  ;;  %v1680_v46 = vmul.f32 1.442695, %v1653_v5  ;;  %v7262_v5 = vld [vmem:[#allocation2_spill] sm:$0xff] }
 0x410   :  { %v875_v17 = vpop.xlane.xlu1 %874 }
 0x411   :  { %v1327_v58 = vpack.c.bf16 %v1314_v53, %v1313_v40  ;;  %4545 = vrcp.f32 %v875_v17  ;;  %v2072_v40 = vsub.f32 %v7259_v10, %v5971_v61  ;;  %v2095_v53 = vmul.f32 1.442695, %v2071_v32  ;;  %v7260_v61 = vld [vmem:[#allocation7_spill] sm:$0xff] }
 0x412   :  { %v4536_v18 = vpop.eup %4535 }
 0x413   :  { %4156 = vmatprep.mubr.bf16.mxu0 %v1327_v58  ;;  %v911_v37 = vmul.f32 %v4536_v18, %v5959_v38  ;;  %v2097_v14 = vmul.f32 1.442695, %v2072_v40  ;;  %v2073_v58 = vsub.f32 %v5755_v1, %v6007_v27 }
 0x414   :  { %v1280_v26 = vpop.xlane.xlu0 %1279 }
 0x415   :  { %v2099_v18 = vmul.f32 1.442695, %v2073_v58 }
 0x416   :  { %v4538_v30 = vpop.eup %4537 }
 0x417   :  { %v910_v44 = vmul.f32 %v4538_v30, %v5967_v0  ;;  %v4540_v12 = vpop.eup %4539 }
 0x418   :  { %v873_v34 = vpop.xlane.xlu1 %872  ;;  %v1316_v28 = vmul.f32 %v4540_v12, %v5965_v59 }
 0x419   :  { %4547 = vrcp.f32 %v873_v34  ;;  %v923_v51 = vpack.c.bf16 %v911_v37, %v910_v44 }
 0x41a   :  { %v4542_v31 = vpop.eup %4541  ;;  %4549 = vpow2.f32 %v1678_v22 }
 0x41b   :  { %4551 = vrcp.f32 %v1280_v26  ;;  %4125 = vmatmul.mubr.bf16.gmra.mxu1 %v923_v51  ;;  %v1315_v11 = vmul.f32 %v4542_v31, %v5974_v24  ;;  %v6169_v16 = vpop.eup %4543  ;;  %v1654_v31 = vsub.f32 %v5799_v8, %v6044_v29 }
 0x41c   :  { %v1278_v0 = vpop.xlane.xlu0 %1277 }
 0x41d   :  { %4553 = vrcp.f32 %v1278_v0  ;;  %v1328_v38 = vpack.c.bf16 %v1316_v28, %v1315_v11 }
 0x41e   :  { %4555 = vpow2.f32 %v1680_v46  ;;  %v4546_v24 = vpop.eup %4545  ;;  %v1682_v46 = vmul.f32 1.442695, %v1654_v31 }
 0x41f   :  { %4157 = vmatmul.mubr.bf16.gmra.mxu0 %v1328_v38  ;;  %4557 = vpow2.f32 %v2095_v53  ;;  %v913_v27 = vmul.f32 %v4546_v24, %v5980_v56 }
 0x420   :  { %v879_v57 = vpop.xlane.xlu1 %878  ;;  %4559 = vpow2.f32 %v2097_v14 }
 0x421   :  { %4561 = vrcp.f32 %v879_v57 }
 0x422   :  { %2189 = vrot.lane.b32.xlu0 %v7246_v45, %s4799_s21  ;;  %v7261_v45 = vld [vmem:[#allocation43_spill] sm:$0xff] }
 0x423   :  { %v2074_v30 = vsub.f32 %v7261_v45, %v5995_v36 }
 0x424   :  { %v1284_v59 = vpop.xlane.xlu0 %1283 }
 0x425   :  { %v2101_v12 = vmul.f32 1.442695, %v2074_v30 }
 0x426   :  { %1706 = vadd.xlane.f32.xlu1 %v6169_v16  ;;  %1766 = vrot.lane.b32.xlu0 %v7260_v61, %s4798_s4  ;;  %v4548_v21 = vpop.eup %4547 }
 0x427   :  { %v6174_v17 = vpop.eup %4549  ;;  %v912_v1 = vmul.f32 %v4548_v21, %v5992_v23 }
 0x428   :  { %v4552_v22 = vpop.eup %4551  ;;  %v877_v43 = vpop.xlane.xlu0 %876 }
 0x429   :  { %4563 = vrcp.f32 %v877_v43  ;;  %v924_v44 = vpack.c.bf16 %v913_v27, %v912_v1  ;;  %v1318_v23 = vmul.f32 %v4552_v22, %v5986_v42 }
 0x42a   :  { %1710 = vadd.xlane.f32.xlu1 %v6174_v17  ;;  %1764 = vrot.lane.b32.xlu0 %v7262_v5, %s4798_s4  ;;  %v4554_v37 = vpop.eup %4553  ;;  %4565 = vpow2.f32 %v2099_v18 }
 0x42b   :  { %4567 = vrcp.f32 %v1284_v59  ;;  %4128 = vmatprep.mubr.bf16.mxu1 %v924_v44  ;;  %v1317_v36 = vmul.f32 %v4554_v37, %v5998_v60  ;;  %v6185_v26 = vpop.eup %4555 }
 0x42c   :  { %v1282_v56 = vpop.xlane.xlu0 %1281  ;;  %v6188_v51 = vpop.eup %4557 }
 0x42d   :  { %4569 = vrcp.f32 %v1282_v56  ;;  %v1329_v34 = vpack.c.bf16 %v1318_v23, %v1317_v36  ;;  %v6193_v35 = vpop.eup %4559  ;;  %v1655_v56 = vsub.f32 %v5765_v39, %v6013_v7  ;;  %v7263_v39 = vld [vmem:[#allocation30_spill] sm:$0xff]  ;;  %v7264_v7 = vld [vmem:[#allocation13_spill] sm:$0xff] }
 0x42e   :  { %1712 = vadd.xlane.f32.xlu1 %v6185_v26  ;;  %4571 = vpow2.f32 %v2101_v12  ;;  %v4562_v60 = vpop.eup %4561 }
 0x42f   :  { %4160 = vmatprep.mubr.bf16.mxu0 %v1329_v34  ;;  %v915_v0 = vmul.f32 %v4562_v60, %v6004_v19  ;;  %v2076_v34 = vsub.f32 %v5782_v48, %v6019_v13  ;;  %v1657_v60 = vsub.f32 %v5825_v15, %v6074_v52  ;;  %v7267_v48 = vld [vmem:[#allocation57_spill] sm:$0xff]  ;;  %v7268_v15 = vld [vmem:[#allocation15_spill] sm:$0xff] }
 0x430   :  { %v883_v42 = vpop.xlane.xlu0 %882  ;;  %v2078_v13 = vsub.f32 %v7268_v15, %v7267_v48 }
 0x431   :  { %4573 = vrcp.f32 %v883_v42 }
 0x432   :  { %2127 = vadd.xlane.f32.xlu1 %v6188_v51 }
 0x434   :  { %v1288_v10 = vpop.xlane.xlu1 %1287 }
 0x436   :  { %2129 = vadd.xlane.f32.xlu1 %v6193_v35  ;;  %v4564_v32 = vpop.eup %4563 }
 0x437   :  { %v6196_v11 = vpop.eup %4565  ;;  %v914_v28 = vmul.f32 %v4564_v32, %v6016_v25  ;;  %v7265_v32 = vld [vmem:[#allocation58_spill] sm:$0xff] }
 0x438   :  { %v4568_v38 = vpop.eup %4567  ;;  %v881_v40 = vpop.xlane.xlu0 %880 }
 0x439   :  { %4575 = vrcp.f32 %v881_v40  ;;  %v925_v8 = vpack.c.bf16 %v915_v0, %v914_v28  ;;  %v1320_v14 = vmul.f32 %v4568_v38, %v6010_v47  ;;  %v2109_v40 = vmul.f32 1.442695, %v2078_v13 }
 0x43a   :  { %2131 = vadd.xlane.f32.xlu1 %v6196_v11  ;;  %v4570_v29 = vpop.eup %4569  ;;  %4577 = vpow2.f32 %v1682_v46  ;;  %v7266_v46 = vld [vmem:[#allocation17_spill] sm:$0xff] }
 0x43b   :  { %4579 = vrcp.f32 %v1288_v10  ;;  %4129 = vmatmul.mubr.bf16.gmra.mxu1 %v925_v8  ;;  %v1319_v53 = vmul.f32 %v4570_v29, %v6022_v50  ;;  %v6203_v58 = vpop.eup %4571  ;;  %v2077_v28 = vsub.f32 %v7266_v46, %v7265_v32  ;;  %v7269_v29 = vld [vmem:[#allocation61_spill] sm:$0xff]  ;;  %v7277_v46 = vld [vmem:[#allocation48_spill] sm:$0xff] }
 0x43c   :  { %v1286_v25 = vpop.xlane.xlu1 %1285 }
 0x43d   :  { %4581 = vrcp.f32 %v1286_v25  ;;  %v1330_v19 = vpack.c.bf16 %v1320_v14, %v1319_v53  ;;  %v2107_v38 = vmul.f32 1.442695, %v2077_v28 }
 0x43e   :  { %2133 = vadd.xlane.f32.xlu1 %v6203_v58  ;;  %v4574_v21 = vpop.eup %4573 }
 0x43f   :  { %4161 = vmatmul.mubr.bf16.gmra.mxu0 %v1330_v19  ;;  %v917_v30 = vmul.f32 %v4574_v21, %v6026_v54 }
 0x440   :  { %v887_v59 = vpop.xlane.xlu0 %886  ;;  %v2194_v24 = vpop.permute.xlu1 %2193 }
 0x441   :  { %4204 = vmatprep.subr.bf16.mxu0 %v2194_v24 }
 0x442   :  { %4205 = vmatpush3.bf16.msra.mxu0 %v2194_v24 }
 0x444   :  { %v1292_v57 = vpop.xlane.xlu0 %1291 }
 0x446   :  { %v4576_v18 = vpop.eup %4575 }
 0x447   :  { %v6206_v45 = vpop.eup %4577  ;;  %v916_v47 = vmul.f32 %v4576_v18, %v6037_v9  ;;  %v7270_v18 = vld [vmem:[#allocation49_spill] sm:$0xff] }
 0x448   :  { %v6208_v50 = vpop.xlane.xlu0 %1700  ;;  %v4580_v1 = vpop.eup %4579 }
 0x449   :  { %1714 = vadd.xlane.f32.xlu0 %v6206_v45  ;;  %v926_v27 = vpack.c.bf16 %v917_v30, %v916_v47  ;;  %v1322_v37 = vmul.f32 %v4580_v1, %v6032_v63  ;;  %v7271_v1 = vld [vmem:[#allocation60_spill] sm:$0xff] }
 0x44a   :  { %v4582_v22 = vpop.eup %4581 }
 0x44b   :  { %4132 = vmatprep.mubr.bf16.mxu1 %v926_v27  ;;  %v1321_v44 = vmul.f32 %v4582_v22, %v6042_v33  ;;  %v1684_v33 = vmul.f32 1.442695, %v1655_v56  ;;  %v7272_v22 = vld [vmem:[#allocation26_spill] sm:$0xff] }
 0x44c   :  { %v6213_v43 = vpop.xlane.xlu0 %1704 }
 0x44d   :  { %v1331_v12 = vpack.c.bf16 %v1322_v37, %v1321_v44  ;;  %4583 = vpow2.f32 %v1684_v33 }
 0x44f   :  { %2187 = vrot.lane.b32.xlu1 %v7260_v61, %s4799_s21  ;;  %4164 = vmatprep.mubr.bf16.mxu0 %v1331_v12  ;;  %v1656_v61 = vsub.f32 %v5847_v20, %v6076_v3  ;;  %v2105_v20 = vmul.f32 1.442695, %v2076_v34  ;;  %v1688_v3 = vmul.f32 1.442695, %v1657_v60  ;;  %v7273_v12 = vld [vmem:[#allocation23_spill] sm:$0xff] }
 0x450   :  { %v6219_v9 = vpop.xlane.xlu0 %2119 }
 0x451   :  { %v1686_v42 = vmul.f32 1.442695, %v1656_v61 }
 0x453   :  { %4585 = vpow2.f32 %v1686_v42  ;;  %v7275_v42 = vld [vmem:[#allocation5_spill] sm:$0xff] }
 0x454   :  { %v6221_v54 = vpop.xlane.xlu0 %2121  ;;  %4587 = vpow2.f32 %v2105_v20 }
 0x455   :  { %4589 = vpow2.f32 %v1688_v3 }
 0x458   :  { %v6223_v36 = vpop.xlane.xlu0 %2123 }
 0x45a   :  { %v6244_v52 = vpop.eup %4583 }
 0x45c   :  { %v6225_v23 = vpop.xlane.xlu0 %2125 }
 0x45f   :  { %2185 = vrot.lane.b32.xlu0 %v7262_v5, %s4799_s21  ;;  %v2075_v5 = vsub.f32 %v7264_v7, %v7263_v39  ;;  %v7276_v7 = vld [vmem:[#allocation27_spill] sm:$0xff] }
 0x460   :  { %v1771_v63 = vpop.permute.xlu0 %1770  ;;  %v6249_v8 = vpop.eup %4585 }
 0x461   :  { %4174 = vmatprep.subr.bf16.mxu1 %v1771_v63  ;;  %v2103_v0 = vmul.f32 1.442695, %v2075_v5  ;;  %v6253_v53 = vpop.eup %4587 }
 0x462   :  { %4175 = vmatpush3.bf16.msra.mxu1 %v1771_v63 }
 0x463   :  { %4591 = vpow2.f32 %v2103_v0  ;;  %v7278_v0 = vld [vmem:[#allocation4_spill] sm:$0xff] }
 0x464   :  { %v1769_v31 = vpop.permute.xlu0 %1768  ;;  %4593 = vpow2.f32 %v2107_v38 }
 0x465   :  { %4176 = vmatprep.subr.bf16.mxu1 %v1769_v31  ;;  %4595 = vrcp.f32 %v6103_v62 }
 0x466   :  { %4177 = vmatpush3.bf16.msra.mxu1 %v1769_v31  ;;  %4597 = vrcp.f32 %v887_v59  ;;  %v7274_v31 = vld [vmem:[#allocation50_spill] sm:$0xff] }
 0x467   :  { %4599 = vrcp.f32 %v6093_v2  ;;  %v6255_v2 = vpop.eup %4589 }
 0x470   :  { %v6259_v25 = vpop.eup %4591 }
 0x471   :  { %v885_v10 = vpop.xlane.xlu1 %884 }
 0x472   :  { %4601 = vrcp.f32 %v885_v10 }
 0x473   :  { %1716 = vadd.xlane.f32.xlu1 %v6244_v52  ;;  %4603 = vrcp.f32 %v6110_v49  ;;  %v6262_v49 = vpop.eup %4593 }
 0x474   :  { %4605 = vrcp.f32 %v1292_v57  ;;  %v4596_v19 = vpop.eup %4595 }
 0x475   :  { %4607 = vrcp.f32 %v7269_v29  ;;  %v1290_v62 = vpop.xlane.xlu1 %1289  ;;  %v4598_v59 = vpop.eup %4597  ;;  %v1738_v47 = vmul.f32 %v4596_v19, %v7270_v18 }
 0x476   :  { %4609 = vrcp.f32 %v1290_v62  ;;  %v4600_v57 = vpop.eup %4599  ;;  %v919_v44 = vmul.f32 %v4598_v59, %v7272_v22 }
 0x477   :  { %1718 = vadd.xlane.f32.xlu1 %v6249_v8  ;;  %4611 = vpow2.f32 %v2109_v40  ;;  %v1739_v56 = vmul.f32 %v4600_v57, %v7273_v12 }
 0x478   :  { %4613 = vrcp.f32 %v6124_v41 }
 0x479   :  { %v1754_v34 = vpack.c.bf16 %v1739_v56, %v1738_v47  ;;  %4615 = vrcp.f32 %v6221_v54  ;;  %v7279_v56 = vld [vmem:[#allocation62_spill] sm:$0xff] }
 0x47a   :  { %v6257_v14 = vpop.xlane.xlu1 %1702  ;;  %4617 = vrcp.f32 %v7279_v56  ;;  %v7288_v56 = vld [vmem:[#allocation35_spill] sm:$0xff] }
 0x47b   :  { %1720 = vadd.xlane.f32.xlu1 %v6255_v2  ;;  %4619 = vrcp.f32 %v6219_v9 }
 0x47e   :  { %v2192_v24 = vpop.permute.xlu1 %2191  ;;  %2135 = vadd.xlane.f32.xlu0 %v6259_v25 }
 0x47f   :  { %4206 = vmatprep.subr.bf16.mxu0 %v2192_v24  ;;  %2137 = vadd.xlane.f32.xlu1 %v6253_v53  ;;  %v4602_v21 = vpop.eup %4601 }
 0x480   :  { %4207 = vmatpush3.bf16.msra.mxu0 %v2192_v24  ;;  %v4604_v30 = vpop.eup %4603  ;;  %v918_v27 = vmul.f32 %v4602_v21, %v7271_v1 }
 0x481   :  { %v4606_v37 = vpop.eup %4605  ;;  %v2160_v60 = vmul.f32 %v4604_v30, %v7274_v31 }
 0x482   :  { %v4608_v63 = vpop.eup %4607  ;;  %v927_v33 = vpack.c.bf16 %v919_v44, %v918_v27  ;;  %v1324_v5 = vmul.f32 %v4606_v37, %v7276_v7 }
 0x483   :  { %2139 = vadd.xlane.f32.xlu1 %v6262_v49  ;;  %v4610_v61 = vpop.eup %4609  ;;  %v2159_v28 = vmul.f32 %v4608_v63, %v7277_v46 }
 0x484   :  { %4133 = vmatmul.mubr.bf16.gmra.mxu1 %v927_v33  ;;  %v1323_v39 = vmul.f32 %v4610_v61, %v7275_v42  ;;  %v6274_v32 = vpop.eup %4611  ;;  %v7280_v33 = vld [vmem:[#allocation33_spill] sm:$0xff] }
 0x485   :  { %4184 = vmatprep.mubr.bf16.mxu1 %v1754_v34  ;;  %v2175_v3 = vpack.c.bf16 %v2160_v60, %v2159_v28  ;;  %4621 = vrcp.f32 %v7280_v33 }
 0x486   :  { %v1332_v20 = vpack.c.bf16 %v1324_v5, %v1323_v39  ;;  %4623 = vrcp.f32 %v6122_v6  ;;  %v4614_v6 = vpop.eup %4613  ;;  %v7281_v39 = vld [vmem:[#allocation53_spill] sm:$0xff]  ;;  %v7282_v5 = vld [vmem:[#allocation55_spill] sm:$0xff] }
 0x487   :  { %2141 = vadd.xlane.f32.xlu1 %v6274_v32  ;;  %4625 = vrcp.f32 %v6208_v50 }
 0x488   :  { %4165 = vmatmul.mubr.bf16.gmra.mxu0 %v1332_v20  ;;  %4627 = vrcp.f32 %v6225_v23  ;;  %v4616_v23 = vpop.eup %4615  ;;  %v7283_v20 = vld [vmem:[#allocation51_spill] sm:$0xff] }
 0x489   :  { %4216 = vmatprep.mubr.bf16.mxu0 %v2175_v3  ;;  %v4618_v60 = vpop.eup %4617  ;;  %v2164_v46 = vmul.f32 %v4616_v23, %v7282_v5 }
 0x48a   :  { %v4620_v42 = vpop.eup %4619  ;;  %v2162_v3 = vmul.f32 %v4618_v60, %v7283_v20  ;;  %v7292_v20 = vld [vmem:[#allocation31_spill] sm:$0xff] }
 0x492   :  { %v4622_v28 = vpop.eup %4621 }
 0x494   :  { %2183 = vrot.lane.b32.xlu0 %v7278_v0, %s4799_s21 }
 0x495   :  { %v6280_v38 = vpop.xlane.xlu0 %1708 }
 0x498   :  { %1762 = vrot.lane.b32.xlu1 %v7278_v0, %s4798_s4  ;;  %v4624_v0 = vpop.eup %4623 }
 0x499   :  { %v2190_v48 = vpop.permute.xlu0 %2189 }
 0x49a   :  { %4208 = vmatprep.subr.bf16.mxu0 %v2190_v48 }
 0x49b   :  { %4209 = vmatpush3.bf16.msra.mxu0 %v2190_v48  ;;  %v7284_v48 = vld [vmem:[#allocation3_spill] sm:$0xff] }
 0x49d   :  { %v1767_v15 = vpop.permute.xlu0 %1766 }
 0x49e   :  { %4178 = vmatprep.subr.bf16.mxu1 %v1767_v15 }
 0x49f   :  { %4179 = vmatpush3.bf16.msra.mxu1 %v1767_v15  ;;  %v2163_v15 = vmul.f32 %v4620_v42, %v7284_v48 }
 0x4a1   :  { %v1765_v13 = vpop.permute.xlu0 %1764 }
 0x4a2   :  { %4180 = vmatprep.subr.bf16.mxu1 %v1765_v13 }
 0x4a3   :  { %4181 = vmatpush3.bf16.msra.mxu1 %v1765_v13  ;;  %v4626_v13 = vpop.eup %4625 }
 0x4a4   :  { %v1743_v33 = vmul.f32 %v4626_v13, %v7288_v56 }
 0x4af   :  { %v1707_v10 = vpop.xlane.xlu1 %1706 }
 0x4b3   :  { %v6284_v40 = vpop.xlane.xlu1 %1710 }
 0x4b7   :  { %v6286_v29 = vpop.xlane.xlu1 %1712 }
 0x4bb   :  { %v2128_v62 = vpop.xlane.xlu1 %2127 }
 0x4bf   :  { %v2130_v19 = vpop.xlane.xlu1 %2129 }
 0x4c0   :  { %4629 = vrcp.f32 %v2130_v19  ;;  %v2177_v19 = vpack.c.bf16 %v2164_v46, %v2163_v15 }
 0x4c1   :  { %4631 = vrcp.f32 %v6223_v36 }
 0x4c2   :  { %4633 = vrcp.f32 %v2128_v62  ;;  %v4628_v62 = vpop.eup %4627 }
 0x4c3   :  { %v6288_v59 = vpop.xlane.xlu1 %2131  ;;  %4635 = vrcp.f32 %v6136_v55  ;;  %v2161_v55 = vmul.f32 %v4614_v6, %v7281_v39  ;;  %v7290_v6 = vld [vmem:[#allocation54_spill] sm:$0xff] }
 0x4c4   :  { %v4154_v24 = vpop.f32.mrf.mxu0  ;;  %4637 = vrcp.f32 %v6257_v14 }
 0x4c5   :  { %2324 = vrot.lane.b32.xlu1 %v4154_v24, %s4804_s1  ;;  %4639 = vrcp.f32 %v1707_v10  ;;  %v2176_v10 = vpack.c.bf16 %v2162_v3, %v2161_v55 }
 0x4c6   :  { %v1399_v21 = vpop.f32.mrf.mxu0 }
 0x4c7   :  { %v2134_v57 = vpop.xlane.xlu1 %2133 }
 0x4c8   :  { %v4155_v47 = vpop.f32.mrf.mxu0  ;;  %4641 = vrcp.f32 %v2134_v57 }
 0x4c9   :  { %2320 = vrot.lane.b32.xlu1 %v1399_v21, %s4804_s1 }
 0x4ca   :  { %v1402_v30 = vpop.f32.mrf.mxu0 }
 0x4cb   :  { %v2188_v18 = vpop.permute.xlu1 %2187 }
 0x4cc   :  { %4210 = vmatprep.subr.bf16.mxu0 %v2188_v18 }
 0x4cd   :  { %2326 = vrot.lane.b32.xlu1 %v4155_v47, %s4804_s1  ;;  %4211 = vmatpush3.bf16.msra.mxu0 %v2188_v18  ;;  %v4630_v24 = vpop.eup %4629  ;;  %v7285_v18 = vld [vmem:[#allocation59_spill] sm:$0xff] }
 0x4d1   :  { %2322 = vrot.lane.b32.xlu1 %v1402_v30, %s4804_s1  ;;  %v7286_v30 = vld [vmem:[#allocation52_spill] sm:$0xff] }
 0x4d2   :  { %v6294_v1 = vpop.xlane.xlu0 %1714 }
 0x4d6   :  { %v2186_v27 = vpop.permute.xlu0 %2185 }
 0x4d7   :  { %4212 = vmatprep.subr.bf16.mxu0 %v2186_v27 }
 0x4d8   :  { %4213 = vmatpush3.bf16.msra.mxu0 %v2186_v27  ;;  %v1740_v27 = vmul.f32 %v4624_v0, %v7286_v30 }
 0x4df   :  { %v4158_v22 = vpop.f32.mrf.mxu0 }
 0x4e0   :  { %2332 = vrot.lane.b32.xlu0 %v4158_v22, %s4804_s1 }
 0x4e1   :  { %v1415_v44 = vpop.f32.mrf.mxu0 }
 0x4e3   :  { %v4159_v37 = vpop.f32.mrf.mxu0 }
 0x4e4   :  { %2328 = vrot.lane.b32.xlu0 %v1415_v44, %s4804_s1  ;;  %2334 = vrot.lane.b32.xlu1 %v4159_v37, %s4804_s1  ;;  %v7287_v37 = vld [vmem:[#allocation56_spill] sm:$0xff] }
 0x4e5   :  { %v1418_v12 = vpop.f32.mrf.mxu0 }
 0x4e8   :  { %2330 = vrot.lane.b32.xlu1 %v1418_v12, %s4804_s1 }
 0x4fc   :  { %v1717_v63 = vpop.xlane.xlu1 %1716 }
 0x4ff   :  { %v4162_v34 = vpop.f32.mrf.mxu0 }
 0x500   :  { %v6306_v61 = vpop.xlane.xlu1 %1718  ;;  %2340 = vrot.lane.b32.xlu0 %v4162_v34, %s4804_s1 }
 0x501   :  { %v1431_v41 = vpop.f32.mrf.mxu0 }
 0x503   :  { %v4163_v9 = vpop.f32.mrf.mxu0 }
 0x504   :  { %v6312_v54 = vpop.xlane.xlu1 %1720  ;;  %2336 = vrot.lane.b32.xlu0 %v1431_v41, %s4804_s1  ;;  %2342 = vrot.lane.b32.xlu1 %v4163_v9, %s4804_s1 }
 0x505   :  { %v1434_v36 = vpop.f32.mrf.mxu0 }
 0x507   :  { %v2136_v50 = vpop.xlane.xlu0 %2135 }
 0x508   :  { %v2138_v31 = vpop.xlane.xlu1 %2137  ;;  %4643 = vrcp.f32 %v2136_v50  ;;  %2338 = vrot.lane.b32.xlu1 %v1434_v36, %s4804_s1 }
 0x509   :  { %4645 = vrcp.f32 %v2138_v31 }
 0x50a   :  { %4647 = vrcp.f32 %v6288_v59  ;;  %v4632_v59 = vpop.eup %4631 }
 0x50b   :  { %v2184_v7 = vpop.permute.xlu0 %2183  ;;  %4649 = vrcp.f32 %v6213_v43  ;;  %v4634_v21 = vpop.eup %4633  ;;  %v2166_v43 = vmul.f32 %v4628_v62, %v7285_v18  ;;  %v2165_v12 = vmul.f32 %v4632_v59, %v7287_v37 }
 0x50c   :  { %v2140_v14 = vpop.xlane.xlu1 %2139  ;;  %4214 = vmatprep.subr.bf16.mxu0 %v2184_v7  ;;  %4651 = vrcp.f32 %v6280_v38  ;;  %v4636_v47 = vpop.eup %4635  ;;  %v2168_v38 = vmul.f32 %v4630_v24, %v6193_v35  ;;  %v2167_v9 = vmul.f32 %v4634_v21, %v6188_v51 }
 0x50d   :  { %4215 = vmatpush3.bf16.msra.mxu0 %v2184_v7  ;;  %4653 = vrcp.f32 %v6286_v29  ;;  %v4638_v22 = vpop.eup %4637  ;;  %v7289_v29 = vld [vmem:[#allocation24_spill] sm:$0xff]  ;;  %v2178_v35 = vpack.c.bf16 %v2166_v43, %v2165_v12  ;;  %v1742_v50 = vmul.f32 %v4636_v47, %v7290_v6 }
 0x50e   :  { %v4640_v34 = vpop.eup %4639  ;;  %v1741_v41 = vmul.f32 %v4622_v28, %v7289_v29  ;;  %v2179_v60 = vpack.c.bf16 %v2168_v38, %v2167_v9 }
 0x50f   :  { %v1756_v42 = vpack.c.bf16 %v1743_v33, %v1742_v50 }
 0x510   :  { %v2142_v57 = vpop.xlane.xlu1 %2141  ;;  %4217 = vmatmul.mubr.bf16.vlgmr.msra.gmra.mxu0 %v2176_v10  ;;  %v1755_v31 = vpack.c.bf16 %v1741_v41, %v1740_v27  ;;  %v6359_v27 = vpop.f32.mrf.mxu1 }
 0x511   :  { %4220 = vmatprep.mubr.bf16.mxu0 %v2177_v19  ;;  %4655 = vrcp.f32 %v2142_v57 }
 0x512   :  { %4657 = vrcp.f32 %v1717_v63  ;;  %v4642_v63 = vpop.eup %4641  ;;  %v6361_v38 = vpop.f32.mrf.mxu1 }
 0x513   :  { %4659 = vrcp.f32 %v2140_v14  ;;  %v2170_v51 = vmul.f32 %v4642_v63, %v6203_v58  ;;  %v1746_v14 = vmul.f32 %v4640_v34, %v6169_v16 }
 0x514   :  { %v1763_v44 = vpop.permute.xlu1 %1762  ;;  %4661 = vrcp.f32 %v6284_v40 }
 0x515   :  { %4182 = vmatprep.subr.bf16.mxu1 %v1763_v44  ;;  %4663 = vrcp.f32 %v6294_v1  ;;  %v4644_v23 = vpop.eup %4643  ;;  %v7291_v1 = vld [vmem:[#allocation6_spill] sm:$0xff] }
 0x516   :  { %4183 = vmatpush3.bf16.msra.mxu1 %v1763_v44  ;;  %v4646_v36 = vpop.eup %4645  ;;  %4665 = vrcp.f32 %v6312_v54  ;;  %v1744_v7 = vmul.f32 %v4638_v22, %v7291_v1  ;;  %v2171_v5 = vmul.f32 %v4644_v23, %v6259_v25 }
 0x517   :  { %v4648_v39 = vpop.eup %4647  ;;  %v2172_v46 = vmul.f32 %v4646_v36, %v6253_v53  ;;  %4667 = vrcp.f32 %v6306_v61  ;;  %v2590_v36 = vld [vmem:[%s7038_s6 + $0x30] sm:$0xff] }
 0x518   :  { %4221 = vmatmul.mubr.bf16.gmra.mxu0 %v2178_v35  ;;  %v4650_v40 = vpop.eup %4649  ;;  %v2169_v28 = vmul.f32 %v4648_v39, %v6196_v11  ;;  %v2588_v39 = vld [vmem:[%s7038_s6 + $0x20] sm:$0xff] }
 0x519   :  { %4185 = vmatmul.mubr.bf16.vlgmr.msra.gmra.mxu1 %v1755_v31  ;;  %4224 = vmatprep.mubr.bf16.mxu0 %v2179_v60  ;;  %v4652_v55 = vpop.eup %4651  ;;  %v1745_v3 = vmul.f32 %v4650_v40, %v7292_v20  ;;  %v2181_v13 = vpack.c.bf16 %v2172_v46, %v2171_v5  ;;  %v2586_v5 = vld [vmem:[%s7038_s6 + $0x10] sm:$0xff]  ;;  %v2587_v46 = vld [vmem:[%s7038_s6 + $0x18] sm:$0xff] }
 0x51a   :  { %4188 = vmatprep.mubr.bf16.mxu1 %v1756_v42  ;;  %v4654_v0 = vpop.eup %4653  ;;  %v2180_v48 = vpack.c.bf16 %v2170_v51, %v2169_v28  ;;  %v1747_v58 = vmul.f32 %v4652_v55, %v6146_v4  ;;  %v2591_v42 = vld [vmem:[%s7038_s6 + $0x38] sm:$0xff]  ;;  %v2589_v51 = vld [vmem:[%s7038_s6 + $0x28] sm:$0xff]  ;;  %v2584_v28 = vld [vmem:[%s7038_s6] sm:$0xff] }
 0x51b   :  { %v1757_v54 = vpack.c.bf16 %v1745_v3, %v1744_v7  ;;  %v1749_v61 = vmul.f32 %v4654_v0, %v6185_v26  ;;  %v2606_v40 = vpack.c.bf16 %v2591_v42, %v2590_v36  ;;  %v2605_v55 = vpack.c.bf16 %v2589_v51, %v2588_v39  ;;  %v2585_v0 = vld [vmem:[%s7038_s6 + $0x8] sm:$0xff] }
 0x51c   :  { %v1758_v25 = vpack.c.bf16 %v1747_v58, %v1746_v14  ;;  %v2604_v3 = vpack.c.bf16 %v2587_v46, %v2586_v5 }
 0x51d   :  { %4232 = vmatprep.subr.bf16.mxu1 %v2606_v40 }
 0x51e   :  { %v4656_v15 = vpop.eup %4655  ;;  %4233 = vmatpush3.bf16.msra.mxu1 %v2606_v40 }
 0x51f   :  { %v4658_v10 = vpop.eup %4657  ;;  %v2174_v16 = vmul.f32 %v4656_v15, %v6274_v32  ;;  %4234 = vmatprep.subr.bf16.mxu1 %v2605_v55 }
 0x520   :  { %4225 = vmatmul.mubr.bf16.gmra.mxu0 %v2180_v48  ;;  %v4660_v62 = vpop.eup %4659  ;;  %v1751_v4 = vmul.f32 %v4658_v10, %v6244_v52  ;;  %v2603_v48 = vpack.c.bf16 %v2585_v0, %v2584_v28 }
 0x521   :  { %4189 = vmatmul.mubr.bf16.gmra.mxu1 %v1757_v54  ;;  %4228 = vmatprep.mubr.bf16.mxu0 %v2181_v13  ;;  %v4662_v11 = vpop.eup %4661  ;;  %v2173_v19 = vmul.f32 %v4660_v62, %v6262_v49 }
 0x522   :  { %4192 = vmatprep.mubr.bf16.mxu1 %v1758_v25  ;;  %v4664_v53 = vpop.eup %4663  ;;  %v1748_v24 = vmul.f32 %v4662_v11, %v6174_v17  ;;  %4235 = vmatpush3.bf16.msra.mxu1 %v2605_v55 }
 0x523   :  { %v2182_v57 = vpack.c.bf16 %v2174_v16, %v2173_v19  ;;  %v1750_v59 = vmul.f32 %v4664_v53, %v6206_v45  ;;  %v4666_v18 = vpop.eup %4665  ;;  %4236 = vmatprep.subr.bf16.mxu1 %v2604_v3 }
 0x524   :  { %v1759_v21 = vpack.c.bf16 %v1749_v61, %v1748_v24  ;;  %v4668_v47 = vpop.eup %4667  ;;  %v1753_v32 = vmul.f32 %v4666_v18, %v6255_v2  ;;  %v6363_v2 = vpop.f32.mrf.mxu1 }
 0x525   :  { %v1760_v43 = vpack.c.bf16 %v1751_v4, %v1750_v59  ;;  %v1752_v26 = vmul.f32 %v4668_v47, %v6249_v8 }
 0x526   :  { %v6365_v8 = vpop.f32.mrf.mxu1  ;;  %4237 = vmatpush3.bf16.msra.mxu1 %v2604_v3 }
 0x527   :  { %v1761_v30 = vpack.c.bf16 %v1753_v32, %v1752_v26  ;;  %4238 = vmatprep.subr.bf16.mxu1 %v2603_v48 }
 0x528   :  { %4229 = vmatmul.mubr.bf16.gmra.mxu0 %v2182_v57  ;;  %v6367_v22 = vpop.f32.mrf.mxu1 }
 0x529   :  { %4193 = vmatmul.mubr.bf16.gmra.mxu1 %v1759_v21 }
 0x52a   :  { %4196 = vmatprep.mubr.bf16.mxu1 %v1760_v43  ;;  %v6369_v44 = vpop.f32.mrf.mxu1  ;;  %4239 = vmatpush3.bf16.msra.mxu1 %v2603_v48 }
 0x52c   :  { %v6371_v37 = vpop.f32.mrf.mxu1 }
 0x52e   :  { %v6373_v12 = vpop.f32.mrf.mxu1 }
 0x530   :  { %v6375_v56 = vpop.f32.mrf.mxu1 }
 0x531   :  { %4197 = vmatmul.mubr.bf16.gmra.mxu1 %v1761_v30 }
 0x532   :  { %v6377_v33 = vpop.f32.mrf.mxu1 }
 0x534   :  { %v6379_v34 = vpop.f32.mrf.mxu1 }
 0x536   :  { %v6381_v29 = vpop.f32.mrf.mxu1 }
 0x544   :  { %v6383_v41 = vpop.f32.mrf.mxu1 }
 0x546   :  { %v6385_v9 = vpop.f32.mrf.mxu1 }
 0x548   :  { %v4166_v49 = vpop.f32.mrf.mxu0  ;;  %v6387_v63 = vpop.f32.mrf.mxu1 }
 0x549   :  { %2348 = vrot.lane.b32.xlu0 %v4166_v49, %s4804_s1  ;;  %v6448_v49 = vld [vmem:[%s7039_s8] sm:$0xff] }
 0x54a   :  { %v1447_v17 = vpop.f32.mrf.mxu0  ;;  %v6389_v35 = vpop.f32.mrf.mxu1  ;;  %4282 = vmatprep.subr.mxu1 %v6448_v49 }
 0x54c   :  { %v4167_v52 = vpop.f32.mrf.mxu0 }
 0x54d   :  { %2344 = vrot.lane.b32.xlu0 %v1447_v17, %s4804_s1  ;;  %2350 = vrot.lane.b32.xlu1 %v4167_v52, %s4804_s1  ;;  %v2325_v17 = vpop.permute.xlu1 %2324 }
 0x54e   :  { %v1450_v45 = vpop.f32.mrf.mxu0 }
 0x551   :  { %2346 = vrot.lane.b32.xlu1 %v1450_v45, %s4804_s1  ;;  %v2321_v52 = vpop.permute.xlu1 %2320 }
 0x555   :  { %v2327_v45 = vpop.permute.xlu1 %2326 }
 0x556   :  { %v2500_v0 = vsel %vm2496_vm13, %v6363_v2, %v2327_v45  ;;  %v6485_v2 = vld [vmem:[%s7040_s5] ss:$0 sm:$0xff] }
 0x5d0   :  { %v4218_v6 = vpop.f32.mrf.mxu0 }
 0x5d2   :  { %v2241_v31 = vpop.f32.mrf.mxu0 }
 0x5d4   :  { %v4219_v1 = vpop.f32.mrf.mxu0 }
 0x5d6   :  { %v2244_v14 = vpop.f32.mrf.mxu0 }
 0x5d8   :  { %v4222_v58 = vpop.f32.mrf.mxu0 }
 0x5d9   :  { %v4186_v50 = vpop.f32.mrf.mxu1 }
 0x5da   :  { %2388 = vrot.lane.b32.xlu0 %v4186_v50, %s4805_s2  ;;  %v2257_v54 = vpop.f32.mrf.mxu0  ;;  %v2333_v50 = vpop.permute.xlu0 %2332 }
 0x5db   :  { %v1820_v23 = vpop.f32.mrf.mxu1 }
 0x5dc   :  { %2384 = vrot.lane.b32.xlu1 %v1820_v23, %s4805_s2  ;;  %v4223_v10 = vpop.f32.mrf.mxu0 }
 0x5dd   :  { %v4187_v60 = vpop.f32.mrf.mxu1 }
 0x5de   :  { %2452 = vrot.lane.b32.xlu0 %v4218_v6, %s4806_s15  ;;  %v2260_v62 = vpop.f32.mrf.mxu0  ;;  %v2323_v6 = vpop.permute.xlu1 %2322 }
 0x5df   :  { %v1823_v7 = vpop.f32.mrf.mxu1 }
 0x5e0   :  { %2390 = vrot.lane.b32.xlu1 %v4187_v60, %s4805_s2  ;;  %v4226_v16 = vpop.f32.mrf.mxu0 }
 0x5e1   :  { %v4190_v20 = vpop.f32.mrf.mxu1 }
 0x5e2   :  { %2448 = vrot.lane.b32.xlu0 %v2241_v31, %s4806_s15  ;;  %v2273_v61 = vpop.f32.mrf.mxu0  ;;  %v2335_v23 = vpop.permute.xlu1 %2334 }
 0x5e3   :  { %v1836_v15 = vpop.f32.mrf.mxu1  ;;  %v2329_v31 = vpop.permute.xlu0 %2328  ;;  %v2504_v45 = vsel %vm2496_vm13, %v6371_v37, %v2335_v23 }
 0x5e4   :  { %2454 = vrot.lane.b32.xlu1 %v4219_v1, %s4806_s15  ;;  %v4227_v4 = vpop.f32.mrf.mxu0 }
 0x5e5   :  { %v4191_v13 = vpop.f32.mrf.mxu1 }
 0x5e6   :  { %2396 = vrot.lane.b32.xlu0 %v4190_v20, %s4805_s2  ;;  %v2276_v57 = vpop.f32.mrf.mxu0  ;;  %v6453_v60 = vpop.permute.xlu1 %2330 }
 0x5e7   :  { %v1839_v25 = vpop.f32.mrf.mxu1  ;;  %v6455_v36 = vpop.permute.xlu0 %2340 }
 0x5e8   :  { %2386 = vrot.lane.b32.xlu1 %v1823_v7, %s4805_s2  ;;  %v4230_v21 = vpop.f32.mrf.mxu0 }
 0x5e9   :  { %v4194_v11 = vpop.f32.mrf.mxu1 }
 0x5ea   :  { %2460 = vrot.lane.b32.xlu0 %v4222_v58, %s4806_s15  ;;  %v2289_v43 = vpop.f32.mrf.mxu0  ;;  %v6457_v42 = vpop.permute.xlu1 %2342  ;;  %v2497_v58 = vsel %vm2496_vm13, %v6361_v38, %v2321_v52 }
 0x5eb   :  { %v1852_v53 = vpop.f32.mrf.mxu1  ;;  %v6459_v39 = vpop.permute.xlu0 %2336 }
 0x5ec   :  { %2450 = vrot.lane.b32.xlu1 %v2244_v14, %s4806_s15  ;;  %v4231_v32 = vpop.f32.mrf.mxu0 }
 0x5ed   :  { %v4195_v19 = vpop.f32.mrf.mxu1 }
 0x5ee   :  { %2392 = vrot.lane.b32.xlu0 %v1836_v15, %s4805_s2  ;;  %v2292_v30 = vpop.f32.mrf.mxu0  ;;  %v6461_v40 = vpop.permute.xlu1 %2338 }
 0x5ef   :  { %v1855_v24 = vpop.f32.mrf.mxu1  ;;  %v6463_v51 = vpop.permute.xlu0 %2348 }
 0x5f0   :  { %2398 = vrot.lane.b32.xlu1 %v4191_v13, %s4805_s2 }
 0x5f1   :  { %v4198_v59 = vpop.f32.mrf.mxu1 }
 0x5f2   :  { %2456 = vrot.lane.b32.xlu0 %v2257_v54, %s4806_s15  ;;  %v6465_v55 = vpop.permute.xlu1 %2350  ;;  %v2499_v54 = vsel %vm2496_vm13, %v6359_v27, %v2325_v17  ;;  %v2498_v27 = vsel %vm2496_vm13, %v6365_v8, %v2323_v6 }
 0x5f3   :  { %v1868_v18 = vpop.f32.mrf.mxu1  ;;  %v6467_v1 = vpop.permute.xlu0 %2344 }
 0x5f4   :  { %2462 = vrot.lane.b32.xlu1 %v4223_v10, %s4806_s15 }
 0x5f5   :  { %v4199_v47 = vpop.f32.mrf.mxu1 }
 0x5f6   :  { %2404 = vrot.lane.b32.xlu0 %v4194_v11, %s4805_s2  ;;  %v6469_v7 = vpop.permute.xlu1 %2346 }
 0x5f7   :  { %v1871_v26 = vpop.f32.mrf.mxu1 }
 0x5f8   :  { %2394 = vrot.lane.b32.xlu1 %v1839_v25, %s4805_s2 }
 0x5fa   :  { %2468 = vrot.lane.b32.xlu0 %v4226_v16, %s4806_s15 }
 0x5fc   :  { %2458 = vrot.lane.b32.xlu1 %v2260_v62, %s4806_s15 }
 0x5fe   :  { %2400 = vrot.lane.b32.xlu0 %v1852_v53, %s4805_s2 }
 0x600   :  { %2406 = vrot.lane.b32.xlu1 %v4195_v19, %s4805_s2 }
 0x602   :  { %2464 = vrot.lane.b32.xlu0 %v2273_v61, %s4806_s15 }
 0x604   :  { %2470 = vrot.lane.b32.xlu1 %v4227_v4, %s4806_s15 }
 0x606   :  { %2412 = vrot.lane.b32.xlu0 %v4198_v59, %s4805_s2 }
 0x608   :  { %2402 = vrot.lane.b32.xlu1 %v1855_v24, %s4805_s2 }
 0x60a   :  { %2408 = vrot.lane.b32.xlu0 %v1868_v18, %s4805_s2 }
 0x60c   :  { %2466 = vrot.lane.b32.xlu1 %v2276_v57, %s4806_s15 }
 0x60e   :  { %2472 = vrot.lane.b32.xlu0 %v2289_v43, %s4806_s15 }
 0x610   :  { %2414 = vrot.lane.b32.xlu1 %v4199_v47, %s4805_s2 }
 0x612   :  { %2476 = vrot.lane.b32.xlu0 %v4230_v21, %s4806_s15 }
 0x614   :  { %2410 = vrot.lane.b32.xlu1 %v1871_v26, %s4805_s2 }
 0x618   :  { %2474 = vrot.lane.b32.xlu1 %v2292_v30, %s4806_s15 }
 0x61c   :  { %2478 = vrot.lane.b32.xlu1 %v4231_v32, %s4806_s15 }
 0x64c   :  { %v2389_v5 = vpop.permute.xlu0 %2388 }
 0x64d   :  { %v2515_v62 = vsel %vm7295_vm0, %v2499_v54, %v2389_v5  ;;  %v2501_v5 = vsel %vm2496_vm13, %v6369_v44, %v2329_v31  ;;  %v2502_v44 = vsel %vm2496_vm13, %v6373_v12, %v6453_v60 }
 0x64e   :  { %v2385_v46 = vpop.permute.xlu1 %2384 }
 0x64f   :  { %v2513_v13 = vsel %vm7294_vm7, %v2497_v58, %v2385_v46 }
 0x650   :  { %v2453_v28 = vpop.permute.xlu0 %2452 }
 0x651   :  { %v2532_v38 = vsel %vm7123_vm9, %v2515_v62, %v2453_v28  ;;  %v2503_v28 = vsel %vm2496_vm13, %v6367_v22, %v2333_v50 }
 0x652   :  { %v2391_v14 = vpop.permute.xlu1 %2390  ;;  %v2554_v24 = vadd.f32 %v6485_v2, %v2532_v38 }
 0x653   :  { %v2516_v15 = vsel %vm7293_vm10, %v2500_v0, %v2391_v14  ;;  %vm7296_vm10 = vmmov %vm7295_vm0  ;;  %vm7297_vm0 = vcmask 523264  }
 0x654   :  { %v2449_v20 = vpop.permute.xlu0 %2448  ;;  %v2570_v26 = vmax.f32 %v2554_v24, 0.0  ;;  %vm7298_vm7 = vmmov %vm7297_vm0  ;;  %v2507_v24 = vsel %vm2496_vm13, %v6375_v56, %v6455_v36 }
 0x655   :  { %v2530_v11 = vsel %vm7123_vm9, %v2513_v13, %v2449_v20 }
 0x656   :  { %v2455_v3 = vpop.permute.xlu1 %2454  ;;  %v2552_v61 = vadd.f32 %v6485_v2, %v2530_v11 }
 0x657   :  { %v2533_v10 = vsel %vm7123_vm9, %v2516_v15, %v2455_v3 }
 0x658   :  { %v2397_v48 = vpop.permute.xlu0 %2396  ;;  %v2555_v53 = vadd.f32 %v6485_v2, %v2533_v10  ;;  %v2568_v43 = vmax.f32 %v2552_v61, 0.0 }
 0x65a   :  { %v2387_v25 = vpop.permute.xlu1 %2386  ;;  %v2571_v18 = vmax.f32 %v2555_v53, 0.0  ;;  %v2508_v53 = vsel %vm2496_vm13, %v6379_v34, %v6457_v42 }
 0x65b   :  { %v2514_v19 = vsel %vm7296_vm10, %v2498_v27, %v2387_v25 }
 0x65c   :  { %v2461_v16 = vpop.permute.xlu0 %2460  ;;  %v2596_v17 = vpack.c.bf16 %v2571_v18, %v2570_v26 }
 0x65e   :  { %v2451_v4 = vpop.permute.xlu1 %2450 }
 0x65f   :  { %v2531_v57 = vsel %vm7123_vm9, %v2514_v19, %v2451_v4  ;;  %vm7299_vm9 = vmmov %vm7296_vm10  ;;  %v2505_v19 = vsel %vm2496_vm13, %v6377_v33, %v6459_v39  ;;  %v2506_v33 = vsel %vm2496_vm13, %v6381_v29, %v6461_v40  ;;  %v2509_v40 = vsel %vm2496_vm13, %v6385_v9, %v6467_v1 }
 0x660   :  { %v2553_v59 = vadd.f32 %v6485_v2, %v2531_v57  ;;  %v2393_v21 = vpop.permute.xlu0 %2392 }
 0x661   :  { %v2517_v14 = vsel %vm7299_vm9, %v2501_v5, %v2393_v21 }
 0x662   :  { %v2569_v47 = vmax.f32 %v2553_v59, 0.0  ;;  %v2399_v32 = vpop.permute.xlu1 %2398 }
 0x663   :  { %v2520_v46 = vsel %vm7296_vm10, %v2504_v45, %v2399_v32 }
 0x664   :  { %v2595_v8 = vpack.c.bf16 %v2569_v47, %v2568_v43  ;;  %v2457_v30 = vpop.permute.xlu0 %2456 }
 0x666   :  { %v2463_v52 = vpop.permute.xlu1 %2462  ;;  %4240 = vmatprep.mubr.msk.bf16.mxu1 %vm7297_vm0, %v2595_v8  ;;  %vm7301_vm0 = vmmov %vm7299_vm9 }
 0x667   :  { %4241 = vmatmul.mubr.msk.bf16.vlgmr.msra.gmra.mxu1 %vm7298_vm7, %v2596_v17  ;;  %v2537_v20 = vsel %vm7300_vm1, %v2520_v46, %v2463_v52  ;;  %v2519_v0 = vsel %vm7301_vm0, %v2503_v28, %v2397_v48  ;;  %vm7302_vm7 = vmmov %vm7300_vm1 }
 0x668   :  { %v2405_v6 = vpop.permute.xlu0 %2404  ;;  %4283 = vmatpush3.msra.mxu1 %v6448_v49  ;;  %v2534_v37 = vsel %vm7302_vm7, %v2517_v14, %v2457_v30  ;;  %v2536_v23 = vsel %vm7303_vm14, %v2519_v0, %v2461_v16  ;;  %v2559_v31 = vadd.f32 %v6485_v2, %v2537_v20  ;;  %vm7304_vm10 = vmmov %vm7301_vm0  ;;  %vm7305_vm14 = vcmask 523264  }
 0x669   :  { %v2556_v22 = vadd.f32 %v6485_v2, %v2534_v37  ;;  %v2558_v15 = vadd.f32 %v6485_v2, %v2536_v23  ;;  %vm7306_vm9 = vmmov %vm7305_vm14  ;;  %v2511_v0 = vsel %vm2496_vm13, %v6383_v41, %v6463_v51  ;;  %v2510_v37 = vsel %vm2496_vm13, %v6389_v35, %v6469_v7 }
 0x66a   :  { %v2395_v3 = vpop.permute.xlu1 %2394  ;;  %v2575_v10 = vmax.f32 %v2559_v31, 0.0  ;;  %vm7307_vm7 = vmmov %vm7301_vm0  ;;  %v2512_v41 = vsel %vm2496_vm13, %v6387_v63, %v6465_v55  ;;  %v2592_v63 = vld [vmem:[%s7041_s7] sm:$0xff]  ;;  %vm2728_vm13 = vcmask 64512  }
 0x66b   :  { %v2518_v50 = vsel %vm7304_vm10, %v2502_v44, %v2395_v3  ;;  %v2572_v25 = vmax.f32 %v2556_v22, 0.0  ;;  %v2574_v38 = vmax.f32 %v2558_v15, 0.0  ;;  %vm7308_vm10 = vmmov %vm7300_vm1  ;;  %4256 = vmatprep.subr.mxu0 %v2592_v63 }
 0x66c   :  { %v2469_v49 = vpop.permute.xlu0 %2468  ;;  %4257 = vmatpush3.msra.mxu0 %v2592_v63 }
 0x66d   :  { %v2598_v16 = vpack.c.bf16 %v2575_v10, %v2574_v38 }
 0x66e   :  { %v2459_v58 = vpop.permute.xlu1 %2458 }
 0x66f   :  { %v2535_v48 = vsel %vm7300_vm1, %v2518_v50, %v2459_v58  ;;  %vm7309_vm1 = vmmov %vm7301_vm0 }
 0x670   :  { %v2557_v54 = vadd.f32 %v6485_v2, %v2535_v48  ;;  %v2401_v13 = vpop.permute.xlu0 %2400  ;;  %v2523_v18 = vsel %vm7309_vm1, %v2507_v24, %v2405_v6  ;;  %vm7314_vm1 = vcmask 523264  }
 0x671   :  { %v2521_v57 = vsel %vm7307_vm7, %v2505_v19, %v2401_v13 }
 0x672   :  { %v2573_v62 = vmax.f32 %v2557_v54, 0.0  ;;  %v2407_v11 = vpop.permute.xlu1 %2406 }
 0x673   :  { %v2524_v4 = vsel %vm7301_vm0, %v2508_v53, %v2407_v11 }
 0x674   :  { %v2597_v12 = vpack.c.bf16 %v2573_v62, %v2572_v25  ;;  %v2465_v60 = vpop.permute.xlu0 %2464 }
 0x676   :  { %v2471_v27 = vpop.permute.xlu1 %2470  ;;  %4244 = vmatprep.mubr.msk.bf16.mxu1 %vm7305_vm14, %v2597_v12  ;;  %vm7310_vm14 = vmmov %vm7308_vm10 }
 0x677   :  { %4245 = vmatmul.mubr.msk.bf16.gmra.mxu1 %vm7306_vm9, %v2598_v16  ;;  %v2541_v59 = vsel %vm7308_vm10, %v2524_v4, %v2471_v27  ;;  %v2538_v34 = vsel %vm7310_vm14, %v2521_v57, %v2465_v60  ;;  %vm7311_vm9 = vmmov %vm7308_vm10 }
 0x678   :  { %v2413_v61 = vpop.permute.xlu0 %2412  ;;  %v2540_v42 = vsel %vm7311_vm9, %v2523_v18, %v2469_v49  ;;  %v2563_v39 = vadd.f32 %v6485_v2, %v2541_v59  ;;  %v2560_v56 = vadd.f32 %v6485_v2, %v2538_v34  ;;  %vm7312_vm7 = vmmov %vm7311_vm9 }
 0x679   :  { %v2562_v32 = vadd.f32 %v6485_v2, %v2540_v42  ;;  %vm7313_vm10 = vmmov %vm7301_vm0  ;;  %v2527_v9 = vsel %vm7301_vm0, %v2511_v0, %v2413_v61 }
 0x67a   :  { %v2403_v21 = vpop.permute.xlu1 %2402  ;;  %v2579_v30 = vmax.f32 %v2563_v39, 0.0  ;;  %v2576_v17 = vmax.f32 %v2560_v56, 0.0  ;;  %vm7315_vm14 = vmmov %vm7312_vm7 }
 0x67b   :  { %v2522_v36 = vsel %vm7301_vm0, %v2506_v33, %v2403_v21  ;;  %v2578_v5 = vmax.f32 %v2562_v32, 0.0  ;;  %vm7316_vm9 = vmmov %vm7314_vm1 }
 0x67c   :  { %v2409_v43 = vpop.permute.xlu0 %2408 }
 0x67d   :  { %v2600_v46 = vpack.c.bf16 %v2579_v30, %v2578_v5  ;;  %v2525_v28 = vsel %vm7313_vm10, %v2509_v40, %v2409_v43  ;;  %vm7318_vm10 = vmmov %vm7315_vm14 }
 0x67e   :  { %v2467_v47 = vpop.permute.xlu1 %2466 }
 0x67f   :  { %v2539_v26 = vsel %vm7312_vm7, %v2522_v36, %v2467_v47  ;;  %vm7317_vm7 = vmmov %vm7301_vm0 }
 0x680   :  { %v2561_v8 = vadd.f32 %v6485_v2, %v2539_v26  ;;  %v2473_v45 = vpop.permute.xlu0 %2472 }
 0x681   :  { %v2542_v20 = vsel %vm7315_vm14, %v2525_v28, %v2473_v45  ;;  %vm7320_vm14 = vmmov %vm7301_vm0  ;;  %vm7322_vm0 = vcmask 523264  }
 0x682   :  { %v2577_v52 = vmax.f32 %v2561_v8, 0.0  ;;  %v2415_v6 = vpop.permute.xlu1 %2414  ;;  %v2564_v1 = vadd.f32 %v6485_v2, %v2542_v20 }
 0x683   :  { %v2528_v35 = vsel %vm7320_vm14, %v2512_v41, %v2415_v6 }
 0x684   :  { %v2599_v29 = vpack.c.bf16 %v2577_v52, %v2576_v17  ;;  %v2477_v3 = vpop.permute.xlu0 %2476  ;;  %v2580_v51 = vmax.f32 %v2564_v1, 0.0 }
 0x685   :  { %v2544_v44 = vsel %vm7318_vm10, %v2527_v9, %v2477_v3 }
 0x686   :  { %v2411_v14 = vpop.permute.xlu1 %2410  ;;  %4248 = vmatprep.mubr.msk.bf16.mxu1 %vm7314_vm1, %v2599_v29  ;;  %vm7319_vm1 = vmmov %vm7318_vm10  ;;  %v2566_v7 = vadd.f32 %v6485_v2, %v2544_v44 }
 0x687   :  { %4249 = vmatmul.mubr.msk.bf16.gmra.mxu1 %vm7316_vm9, %v2600_v46  ;;  %v2526_v23 = vsel %vm7317_vm7, %v2510_v37, %v2411_v14  ;;  %vm7321_vm9 = vmmov %vm7319_vm1 }
 0x688   :  { %v2582_v13 = vmax.f32 %v2566_v7, 0.0  ;;  %vm7323_vm7 = vmmov %vm7322_vm0 }
 0x68a   :  { %v2475_v49 = vpop.permute.xlu1 %2474 }
 0x68b   :  { %v2543_v31 = vsel %vm7319_vm1, %v2526_v23, %v2475_v49 }
 0x68c   :  { %v2565_v22 = vadd.f32 %v6485_v2, %v2543_v31 }
 0x68e   :  { %v2581_v50 = vmax.f32 %v2565_v22, 0.0  ;;  %v2479_v58 = vpop.permute.xlu1 %2478 }
 0x68f   :  { %v2545_v15 = vsel %vm7321_vm9, %v2528_v35, %v2479_v58 }
 0x690   :  { %v2601_v48 = vpack.c.bf16 %v2581_v50, %v2580_v51  ;;  %v2567_v54 = vadd.f32 %v6485_v2, %v2545_v15 }
 0x692   :  { %v2583_v10 = vmax.f32 %v2567_v54, 0.0  ;;  %4252 = vmatprep.mubr.msk.bf16.mxu1 %vm7322_vm0, %v2601_v48 }
 0x694   :  { %v2602_v25 = vpack.c.bf16 %v2583_v10, %v2582_v13 }
 0x696   :  { %4253 = vmatmul.mubr.msk.bf16.gmra.mxu1 %vm7323_vm7, %v2602_v25 }
 0x727   :  { %v4242_v55 = vpop.f32.mrf.mxu1 }
 0x729   :  { %v2665_v62 = vpop.f32.mrf.mxu1 }
 0x72a   :  { %4258 = vmatprep.mubr.msk.f32.mxu0 %vm2728_vm13, %v2665_v62  ;;  %4284 = vmatprep.mubr.msk.f32.mxu1 %vm2728_vm13, %v2665_v62 }
 0x72b   :  { %v4243_v2 = vpop.f32.mrf.mxu1 }
 0x72c   :  { %v6579_v11 = vpack.c.bf16 %v4243_v2, %v4242_v55 }
 0x72d   :  { %v2668_v38 = vpop.f32.mrf.mxu1 }
 0x72e   :  { %v6581_v12 = vpack.c.bf16 %v2668_v38, %v2665_v62  ;;  %4259 = vmatmul.mubr.msk.f32.vlgmr.msra.gmra.mxu0 %vm2728_vm13, %v2668_v38  ;;  %4285 = vmatmul.mubr.msk.f32.vlgmr.msra.gmra.mxu1 %vm2728_vm13, %v2668_v38 }
 0x72f   :  { %4261 = vmatprep.mubr.msk.f32.mxu0 %vm2728_vm13, %v4242_v55  ;;  %4287 = vmatprep.mubr.msk.f32.mxu1 %vm2728_vm13, %v4242_v55 }
 0x732   :  { %4262 = vmatmul.mubr.msk.f32.gmra.mxu0 %vm2728_vm13, %v4243_v2  ;;  %4288 = vmatmul.mubr.msk.f32.gmra.mxu1 %vm2728_vm13, %v4243_v2  ;;  %v7324_v2 = vld [vmem:[#allocation16_spill] sm:$0xff] }
 0x737   :  { %v4246_v60 = vpop.f32.mrf.mxu1 }
 0x739   :  { %v2681_v16 = vpop.f32.mrf.mxu1 }
 0x73a   :  { %4264 = vmatprep.mubr.msk.f32.mxu0 %vm2728_vm13, %v2681_v16  ;;  %4290 = vmatprep.mubr.msk.f32.mxu1 %vm2728_vm13, %v2681_v16 }
 0x73b   :  { %v4247_v27 = vpop.f32.mrf.mxu1 }
 0x73c   :  { %v3418_v39 = vpack.c.bf16 %v4247_v27, %v4246_v60 }
 0x73d   :  { %v2684_v53 = vpop.f32.mrf.mxu1 }
 0x73e   :  { %4265 = vmatmul.mubr.msk.f32.gmra.mxu0 %vm2728_vm13, %v2684_v53  ;;  %4291 = vmatmul.mubr.msk.f32.gmra.mxu1 %vm2728_vm13, %v2684_v53  ;;  %v3417_v56 = vpack.c.bf16 %v2684_v53, %v2681_v16 }
 0x73f   :  { %4267 = vmatprep.mubr.msk.f32.mxu0 %vm2728_vm13, %v4246_v60  ;;  %4293 = vmatprep.mubr.msk.f32.mxu1 %vm2728_vm13, %v4246_v60 }
 0x742   :  { %4268 = vmatmul.mubr.msk.f32.gmra.mxu0 %vm2728_vm13, %v4247_v27  ;;  %4294 = vmatmul.mubr.msk.f32.gmra.mxu1 %vm2728_vm13, %v4247_v27 }
 0x747   :  { %v4250_v61 = vpop.f32.mrf.mxu1 }
 0x749   :  { %v2697_v19 = vpop.f32.mrf.mxu1 }
 0x74a   :  { %4270 = vmatprep.mubr.msk.f32.mxu0 %vm2728_vm13, %v2697_v19  ;;  %4296 = vmatprep.mubr.msk.f32.mxu1 %vm2728_vm13, %v2697_v19 }
 0x74b   :  { %v4251_v4 = vpop.f32.mrf.mxu1 }
 0x74c   :  { %v3420_v43 = vpack.c.bf16 %v4251_v4, %v4250_v61 }
 0x74d   :  { %v2700_v24 = vpop.f32.mrf.mxu1 }
 0x74e   :  { %4271 = vmatmul.mubr.msk.f32.gmra.mxu0 %vm2728_vm13, %v2700_v24  ;;  %4297 = vmatmul.mubr.msk.f32.gmra.mxu1 %vm2728_vm13, %v2700_v24  ;;  %v3419_v33 = vpack.c.bf16 %v2700_v24, %v2697_v19 }
 0x74f   :  { %4273 = vmatprep.mubr.msk.f32.mxu0 %vm2728_vm13, %v4250_v61  ;;  %4299 = vmatprep.mubr.msk.f32.mxu1 %vm2728_vm13, %v4250_v61 }
 0x752   :  { %4274 = vmatmul.mubr.msk.f32.gmra.mxu0 %vm2728_vm13, %v4251_v4  ;;  %4300 = vmatmul.mubr.msk.f32.gmra.mxu1 %vm2728_vm13, %v4251_v4 }
 0x756   :  { %v4254_v57 = vpop.f32.mrf.mxu1 }
 0x758   :  { %v2713_v59 = vpop.f32.mrf.mxu1 }
 0x759   :  { %4276 = vmatprep.mubr.msk.f32.mxu0 %vm2728_vm13, %v2713_v59  ;;  %4302 = vmatprep.mubr.msk.f32.mxu1 %vm2728_vm13, %v2713_v59 }
 0x75a   :  { %v4255_v21 = vpop.f32.mrf.mxu1 }
 0x75b   :  { %v3422_v18 = vpack.c.bf16 %v4255_v21, %v4254_v57 }
 0x75c   :  { %v2716_v34 = vpop.f32.mrf.mxu1 }
 0x75d   :  { %v3421_v42 = vpack.c.bf16 %v2716_v34, %v2713_v59  ;;  %4277 = vmatmul.mubr.msk.f32.gmra.mxu0 %vm2728_vm13, %v2716_v34  ;;  %4303 = vmatmul.mubr.msk.f32.gmra.mxu1 %vm2728_vm13, %v2716_v34  ;;  %v7341_v34 = vld [vmem:[#allocation44_spill] sm:$0xff] }
 0x75e   :  { %4308 = vmatprep.subr.bf16.mxu0 %v3422_v18  ;;  %4279 = vmatprep.mubr.msk.f32.mxu0 %vm2728_vm13, %v4254_v57 }
 0x75f   :  { %4305 = vmatprep.mubr.msk.f32.mxu1 %vm2728_vm13, %v4254_v57  ;;  %4309 = vmatpush3.bf16.msra.mxu0 %v3422_v18 }
 0x760   :  { %4310 = vmatprep.subr.bf16.mxu0 %v3421_v42 }
 0x761   :  { %4280 = vmatmul.mubr.msk.f32.gmra.mxu0 %vm2728_vm13, %v4255_v21  ;;  %4306 = vmatmul.mubr.msk.f32.gmra.mxu1 %vm2728_vm13, %v4255_v21 }
 0x763   :  { %4311 = vmatpush3.bf16.msra.mxu0 %v3421_v42 }
 0x764   :  { %4312 = vmatprep.subr.bf16.mxu0 %v3420_v43 }
 0x767   :  { %4313 = vmatpush3.bf16.msra.mxu0 %v3420_v43 }
 0x768   :  { %4314 = vmatprep.subr.bf16.mxu0 %v3419_v33 }
 0x76b   :  { %4315 = vmatpush3.bf16.msra.mxu0 %v3419_v33 }
 0x76c   :  { %4316 = vmatprep.subr.bf16.mxu0 %v3418_v39 }
 0x76f   :  { %4317 = vmatpush3.bf16.msra.mxu0 %v3418_v39 }
 0x770   :  { %4318 = vmatprep.subr.bf16.mxu0 %v3417_v56 }
 0x773   :  { %4319 = vmatpush3.bf16.msra.mxu0 %v3417_v56  ;;  %v7343_v56 = vld [vmem:[#allocation46_spill] sm:$0xff] }
 0x774   :  { %4320 = vmatprep.subr.bf16.mxu0 %v6579_v11 }
 0x777   :  { %4321 = vmatpush3.bf16.msra.mxu0 %v6579_v11  ;;  %v7325_v11 = vsub.s32 0, %v7324_v2 }
 0x778   :  { %4322 = vmatprep.subr.bf16.mxu0 %v6581_v12 }
 0x77b   :  { %4323 = vmatpush3.bf16.msra.mxu0 %v6581_v12 }
 0x7ee   :  { %v4286_v36 = vpop.f32.mrf.mxu1  ;;  %v4260_v20 = vpop.f32.mrf.mxu0 }
 0x7ef   :  { %3106 = vperm.xlu1 %4411, %v4286_v36  }
 0x7f0   :  { %v2988_v47 = vpop.f32.mrf.mxu1  ;;  %v2843_v3 = vpop.f32.mrf.mxu0 }
 0x7f1   :  { %3101 = vperm.xlu0 %4412, %v2988_v47  }
 0x7f2   :  { %v4289_v32 = vpop.f32.mrf.mxu1  ;;  %v4263_v0 = vpop.f32.mrf.mxu0 }
 0x7f4   :  { %v2998_v26 = vpop.f32.mrf.mxu1  ;;  %v2853_v37 = vpop.f32.mrf.mxu0 }
 0x7f5   :  { %3116 = vperm.xlu0 %4412, %v4289_v32   ;;  %3111 = vperm.xlu1 %4411, %v2998_v26  }
 0x7fe   :  { %v4292_v8 = vpop.f32.mrf.mxu1  ;;  %v4266_v9 = vpop.f32.mrf.mxu0 }
 0x7ff   :  { %3126 = vperm.xlu0 %4412, %v4292_v8  }
 0x800   :  { %v3008_v30 = vpop.f32.mrf.mxu1  ;;  %v2863_v1 = vpop.f32.mrf.mxu0 }
 0x801   :  { %3121 = vperm.xlu1 %4411, %v3008_v30  }
 0x802   :  { %v4295_v17 = vpop.f32.mrf.mxu1  ;;  %v4269_v23 = vpop.f32.mrf.mxu0 }
 0x803   :  { %3136 = vperm.xlu0 %4412, %v4295_v17  }
 0x804   :  { %v3018_v52 = vpop.f32.mrf.mxu1  ;;  %v2873_v49 = vpop.f32.mrf.mxu0 }
 0x805   :  { %3131 = vperm.xlu1 %4411, %v3018_v52  }
 0x80e   :  { %v4298_v45 = vpop.f32.mrf.mxu1  ;;  %v4272_v44 = vpop.f32.mrf.mxu0 }
 0x80f   :  { %3146 = vperm.xlu0 %4412, %v4298_v45  }
 0x810   :  { %v3028_v6 = vpop.f32.mrf.mxu1  ;;  %v2883_v31 = vpop.f32.mrf.mxu0 }
 0x811   :  { %3141 = vperm.xlu1 %4411, %v3028_v6  }
 0x812   :  { %v4301_v5 = vpop.f32.mrf.mxu1  ;;  %v4275_v22 = vpop.f32.mrf.mxu0 }
 0x813   :  { %3156 = vperm.xlu0 %4412, %v4301_v5  }
 0x814   :  { %v3038_v29 = vpop.f32.mrf.mxu1  ;;  %v2893_v41 = vpop.f32.mrf.mxu0 }
 0x815   :  { %3151 = vperm.xlu1 %4411, %v3038_v29  }
 0x81d   :  { %v4304_v40 = vpop.f32.mrf.mxu1  ;;  %v4278_v51 = vpop.f32.mrf.mxu0 }
 0x81e   :  { %3166 = vperm.xlu0 %4412, %v4304_v40  }
 0x81f   :  { %v3048_v46 = vpop.f32.mrf.mxu1  ;;  %v2903_v35 = vpop.f32.mrf.mxu0 }
 0x820   :  { %3161 = vperm.xlu1 %4411, %v3048_v46  }
 0x821   :  { %v4307_v28 = vpop.f32.mrf.mxu1  ;;  %v4281_v7 = vpop.f32.mrf.mxu0 }
 0x822   :  { %3176 = vperm.xlu0 %4412, %v4307_v28  }
 0x823   :  { %v3058_v14 = vpop.f32.mrf.mxu1  ;;  %v2913_v50 = vpop.f32.mrf.mxu0 }
 0x824   :  { %3171 = vperm.xlu1 %4411, %v3058_v14  }
 0x84d   :  { %3067 = vxpose.xlu1.b32.start [1/16] (narrow) %v2843_v3, 8 }
 0x851   :  { %3068 = vxpose.xlu1.b32.cont [2/16] (narrow) %v4260_v20, 8 }
 0x855   :  { %3069 = vxpose.xlu1.b32.cont [3/16] (narrow) %v2853_v37, 8 }
 0x859   :  { %3070 = vxpose.xlu1.b32.cont [4/16] (narrow) %v4263_v0, 8 }
 0x85d   :  { %3071 = vxpose.xlu1.b32.cont [5/16] (narrow) %v2863_v1, 8 }
 0x861   :  { %3072 = vxpose.xlu1.b32.cont [6/16] (narrow) %v4266_v9, 8 }
 0x865   :  { %3073 = vxpose.xlu1.b32.cont [7/16] (narrow) %v2873_v49, 8 }
 0x869   :  { %3074 = vxpose.xlu1.b32.cont [8/16] (narrow) %v4269_v23, 8 }
 0x86a   :  { %v3107_v58 = vpop.permute.xlu1 %3106 }
 0x86c   :  { %v3102_v55 = vpop.permute.xlu0 %3101 }
 0x86d   :  { %3075 = vxpose.xlu1.b32.cont [9/16] (narrow) %v2883_v31, 8 }
 0x870   :  { %v3112_v15 = vpop.permute.xlu1 %3111  ;;  %v3117_v16 = vpop.permute.xlu0 %3116 }
 0x871   :  { %3076 = vxpose.xlu1.b32.cont [10/16] (narrow) %v4272_v44, 8 }
 0x875   :  { %3077 = vxpose.xlu1.b32.cont [11/16] (narrow) %v2893_v41, 8 }
 0x879   :  { %3078 = vxpose.xlu1.b32.cont [12/16] (narrow) %v4275_v22, 8 }
 0x87a   :  { %v3127_v18 = vpop.permute.xlu0 %3126 }
 0x87c   :  { %v3122_v48 = vpop.permute.xlu1 %3121 }
 0x87d   :  { %3079 = vxpose.xlu1.b32.cont [13/16] (narrow) %v2903_v35, 8 }
 0x87e   :  { %v3137_v8 = vpop.permute.xlu0 %3136 }
 0x880   :  { %v3132_v54 = vpop.permute.xlu1 %3131 }
 0x881   :  { %3080 = vxpose.xlu1.b32.cont [14/16] (narrow) %v4278_v51, 8 }
 0x885   :  { %3081 = vxpose.xlu1.b32.cont [15/16] (narrow) %v2913_v50, 8 }
 0x889   :  { %3082 = vxpose.xlu1.b32.end [16/16] (narrow) %v4281_v7, 8 }
 0x88a   :  { %v3147_v14 = vpop.permute.xlu0 %3146 }
 0x88c   :  { %v3142_v13 = vpop.permute.xlu1 %3141 }
 0x88e   :  { %v3157_v22 = vpop.permute.xlu0 %3156 }
 0x890   :  { %v6617_v10 = vpop.permute.xlu1 %3151 }
 0x89b   :  { %v6619_v25 = vpop.permute.xlu1 %3161 }
 0x89f   :  { %v6621_v63 = vpop.permute.xlu1 %3171 }
 0x8c9   :  { %v3083_v62 = vpop.trf.xlu1 }
 0x8ca   :  { %v6625_v38 = vrot.slane %v3083_v62, %v7325_v11  ;;  %v7335_v62 = vld [vmem:[#allocation34_spill] sm:$0xff] }
 0x8cc   :  { %v3183_v12 = vadd.f32 %v6625_v38, %v3102_v55  ;;  %v3184_v60 = vadd.f32 %v6625_v38, %v3107_v58  ;;  %v3186_v61 = vadd.f32 %v6625_v38, %v3117_v16  ;;  %v3185_v21 = vadd.f32 %v6625_v38, %v3112_v15  ;;  %v3167_v55 = vpop.permute.xlu0 %3166  ;;  %v7337_v16 = vld [vmem:[#allocation38_spill] sm:$0xff] }
 0x8cd   :  { %v3188_v39 = vadd.f32 %v6625_v38, %v3127_v18  ;;  %v3187_v26 = vadd.f32 %v6625_v38, %v3122_v48  ;;  %v3190_v6 = vadd.f32 %v6625_v38, %v3137_v8  ;;  %v3189_v28 = vadd.f32 %v6625_v38, %v3132_v54 }
 0x8ce   :  { %vm3199_vm10 = vcmp.gt.f32.partialorder %v3183_v12, 0.0  ;;  %v3215_v27 = vmul.f32 0.2, %v3183_v12  ;;  %v3216_v53 = vmul.f32 0.2, %v3184_v60  ;;  %vm3200_vm1 = vcmp.gt.f32.partialorder %v3184_v60, 0.0 }
 0x8cf   :  { %v3218_v59 = vmul.f32 0.2, %v3186_v61  ;;  %vm3202_vm14 = vcmp.gt.f32.partialorder %v3186_v61, 0.0  ;;  %v3217_v33 = vmul.f32 0.2, %v3185_v21  ;;  %vm3204_vm9 = vcmp.gt.f32.partialorder %v3188_v39, 0.0 }
 0x8d0   :  { %v3231_v19 = vsel %vm3199_vm10, %v3183_v12, %v3215_v27  ;;  %v3232_v57 = vsel %vm3200_vm1, %v3184_v60, %v3216_v53  ;;  %v3220_v32 = vmul.f32 0.2, %v3188_v39  ;;  %v3219_v45 = vmul.f32 0.2, %v3187_v26  ;;  %v3177_v18 = vpop.permute.xlu0 %3176 }
 0x8d1   :  { %v6632_v24 = vsel %vm5310_vm3, %v3231_v19, -1e+30  ;;  %v6638_v42 = vsel %vm5296_vm2, %v3232_v57, -1e+30  ;;  %v3234_v43 = vsel %vm3202_vm14, %v3186_v61, %v3218_v59  ;;  %vm3201_vm3 = vcmp.gt.f32.partialorder %v3185_v21, 0.0  ;;  %v7339_v19 = vld [vmem:[#allocation40_spill] sm:$0xff] }
 0x8d2   :  { %3263 = vmax.xlane.f32.xlu0 %v6632_v24  ;;  %v6644_v36 = vsel %vm5314_vm4, %v3234_v43, -1e+30  ;;  %v3233_v47 = vsel %vm3201_vm3, %v3185_v21, %v3217_v33  ;;  %v3236_v52 = vsel %vm3204_vm9, %v3188_v39, %v3220_v32  ;;  %vm3203_vm2 = vcmp.gt.f32.partialorder %v3187_v26, 0.0 }
 0x8d3   :  { %v6650_v17 = vsel %vm5387_vm6, %v3233_v47, -1e+30  ;;  %v6656_v29 = vsel %vm5433_vm11, %v3236_v52, -1e+30  ;;  %v3235_v40 = vsel %vm3203_vm2, %v3187_v26, %v3219_v45  ;;  %v3222_v46 = vmul.f32 0.2, %v3190_v6 }
 0x8d4   :  { %vm3206_vm4 = vcmp.gt.f32.partialorder %v3190_v6, 0.0  ;;  %v6662_v3 = vsel %vm5468_vm5, %v3235_v40, -1e+30  ;;  %v3221_v37 = vmul.f32 0.2, %v3189_v28  ;;  %v3192_v9 = vadd.f32 %v6625_v38, %v3147_v14  ;;  %v7345_v26 = vld [vmem:[#allocation14_spill] sm:$0xff] }
 0x8d5   :  { %v3238_v0 = vsel %vm3206_vm4, %v3190_v6, %v3222_v46  ;;  %vm3205_vm6 = vcmp.gt.f32.partialorder %v3189_v28, 0.0  ;;  %v3191_v31 = vadd.f32 %v6625_v38, %v3142_v13  ;;  %v3194_v50 = vadd.f32 %v6625_v38, %v3157_v22  ;;  %v7347_v52 = vld [vmem:[#allocation47_spill] sm:$0xff] }
 0x8d6   :  { %3265 = vmax.xlane.f32.xlu0 %v6638_v42  ;;  %v6668_v23 = vsel %vm5503_vm12, %v3238_v0, -1e+30  ;;  %v3237_v49 = vsel %vm3205_vm6, %v3189_v28, %v3221_v37  ;;  %v3224_v44 = vmul.f32 0.2, %v3192_v9  ;;  %vm3208_vm11 = vcmp.gt.f32.partialorder %v3192_v9, 0.0 }
 0x8d7   :  { %v6674_v51 = vsel %vm5540_vm8, %v3237_v49, -1e+30  ;;  %v3223_v7 = vmul.f32 0.2, %v3191_v31  ;;  %vm3207_vm5 = vcmp.gt.f32.partialorder %v3191_v31, 0.0  ;;  %v3193_v13 = vadd.f32 %v6625_v38, %v6617_v10 }
 0x8d8   :  { %v3240_v35 = vsel %vm3208_vm11, %v3192_v9, %v3224_v44  ;;  %v3226_v54 = vmul.f32 0.2, %v3194_v50  ;;  %vm3210_vm12 = vcmp.gt.f32.partialorder %v3194_v50, 0.0  ;;  %vm7336_vm8 = vnez %v7335_v62 }
 0x8d9   :  { %v6680_v15 = vsel %vm5580_vm15, %v3240_v35, -1e+30  ;;  %v3239_v48 = vsel %vm3207_vm5, %v3191_v31, %v3223_v7  ;;  %v3225_v12 = vmul.f32 0.2, %v3193_v13  ;;  %v3196_v60 = vadd.f32 %v6625_v38, %v3167_v55 }
 0x8da   :  { %3269 = vmax.xlane.f32.xlu0 %v6644_v36  ;;  %v6687_v2 = vsel %vm7336_vm8, %v3239_v48, -1e+30  ;;  %v3242_v11 = vsel %vm3210_vm12, %v3194_v50, %v3226_v54  ;;  %vm3209_vm15 = vcmp.gt.f32.partialorder %v3193_v13, 0.0  ;;  %vm7338_vm0 = vnez %v7337_v16 }
 0x8db   :  { %v6693_v27 = vsel %vm7338_vm0, %v3242_v11, -1e+30  ;;  %v3241_v10 = vsel %vm3209_vm15, %v3193_v13, %v3225_v12  ;;  %v3228_v53 = vmul.f32 0.2, %v3196_v60  ;;  %v3195_v61 = vadd.f32 %v6625_v38, %v6619_v25 }
 0x8dc   :  { %vm3212_vm7 = vcmp.gt.f32.partialorder %v3196_v60, 0.0  ;;  %vm7340_vm10 = vnez %v7339_v19  ;;  %v3197_v21 = vadd.f32 %v6625_v38, %v6621_v63  ;;  %vm7342_vm14 = vnez %v7341_v34 }
 0x8dd   :  { %v6700_v4 = vsel %vm7340_vm10, %v3241_v10, -1e+30  ;;  %v3244_v57 = vsel %vm3212_vm7, %v3196_v60, %v3228_v53  ;;  %v3227_v59 = vmul.f32 0.2, %v3195_v61  ;;  %vm3211_vm1 = vcmp.gt.f32.partialorder %v3195_v61, 0.0 }
 0x8de   :  { %3267 = vmax.xlane.f32.xlu0 %v6650_v17  ;;  %v6707_v43 = vsel %vm7342_vm14, %v3244_v57, -1e+30  ;;  %v3229_v33 = vmul.f32 0.2, %v3197_v21  ;;  %v3198_v39 = vadd.f32 %v6625_v38, %v3177_v18  ;;  %vm3213_vm3 = vcmp.gt.f32.partialorder %v3197_v21, 0.0 }
 0x8df   :  { %v3243_v25 = vsel %vm3211_vm1, %v3195_v61, %v3227_v59  ;;  %vm7344_vm9 = vnez %v7343_v56  ;;  %vm7346_vm4 = vnez %v7345_v26  ;;  %vm7348_vm6 = vnez %v7347_v52 }
 0x8e0   :  { %v6713_v47 = vsel %vm7344_vm9, %v3243_v25, -1e+30  ;;  %v3245_v63 = vsel %vm3213_vm3, %v3197_v21, %v3229_v33  ;;  %v3230_v32 = vmul.f32 0.2, %v3198_v39  ;;  %vm3214_vm2 = vcmp.gt.f32.partialorder %v3198_v39, 0.0 }
 0x8e1   :  { %v6718_v8 = vsel %vm7346_vm4, %v3245_v63, -1e+30 }
 0x8e2   :  { %3273 = vmax.xlane.f32.xlu0 %v6656_v29  ;;  %v3246_v30 = vsel %vm3214_vm2, %v3198_v39, %v3230_v32 }
 0x8e3   :  { %v6723_v38 = vsel %vm7348_vm6, %v3246_v30, -1e+30 }
 0x8e6   :  { %3271 = vmax.xlane.f32.xlu0 %v6662_v3 }
 0x8ea   :  { %3277 = vmax.xlane.f32.xlu0 %v6668_v23 }
 0x8ee   :  { %3275 = vmax.xlane.f32.xlu0 %v6674_v51 }
 0x8f2   :  { %3281 = vmax.xlane.f32.xlu0 %v6680_v15 }
 0x8f6   :  { %3279 = vmax.xlane.f32.xlu0 %v6687_v2 }
 0x8fa   :  { %3285 = vmax.xlane.f32.xlu0 %v6693_v27 }
 0x8fe   :  { %3283 = vmax.xlane.f32.xlu0 %v6700_v4 }
 0x902   :  { %3289 = vmax.xlane.f32.xlu0 %v6707_v43 }
 0x906   :  { %3287 = vmax.xlane.f32.xlu0 %v6713_v47 }
 0x90a   :  { %3291 = vmax.xlane.f32.xlu0 %v6718_v8 }
 0x90e   :  { %3293 = vmax.xlane.f32.xlu0 %v6723_v38 }
 0x95b   :  { %v3264_v45 = vpop.xlane.xlu0 %3263 }
 0x95c   :  { %v3295_v6 = vsub.f32 %v6632_v24, %v3264_v45 }
 0x95e   :  { %v3311_v5 = vmul.f32 1.442695, %v3295_v6 }
 0x95f   :  { %v3266_v40 = vpop.xlane.xlu0 %3265 }
 0x960   :  { %4669 = vpow2.f32 %v3311_v5  ;;  %v3296_v46 = vsub.f32 %v6638_v42, %v3266_v40 }
 0x962   :  { %v3313_v28 = vmul.f32 1.442695, %v3296_v46 }
 0x963   :  { %v3270_v14 = vpop.xlane.xlu0 %3269 }
 0x964   :  { %4671 = vpow2.f32 %v3313_v28  ;;  %v3298_v20 = vsub.f32 %v6644_v36, %v3270_v14 }
 0x966   :  { %v3317_v0 = vmul.f32 1.442695, %v3298_v20 }
 0x967   :  { %v3268_v37 = vpop.xlane.xlu0 %3267 }
 0x968   :  { %4673 = vpow2.f32 %v3317_v0  ;;  %v3297_v9 = vsub.f32 %v6650_v17, %v3268_v37 }
 0x96a   :  { %v3315_v1 = vmul.f32 1.442695, %v3297_v9 }
 0x96b   :  { %v3274_v49 = vpop.xlane.xlu0 %3273 }
 0x96c   :  { %4675 = vpow2.f32 %v3315_v1  ;;  %v3300_v24 = vsub.f32 %v6656_v29, %v3274_v49 }
 0x96d   :  { %v6731_v44 = vpop.eup %4669 }
 0x96e   :  { %v3321_v31 = vmul.f32 1.442695, %v3300_v24  ;;  %3343 = vadd.xlane.f32.xlu0 %v6731_v44 }
 0x96f   :  { %v3272_v42 = vpop.xlane.xlu0 %3271 }
 0x970   :  { %4677 = vpow2.f32 %v3321_v31  ;;  %v3299_v22 = vsub.f32 %v6662_v3, %v3272_v42 }
 0x971   :  { %v6735_v36 = vpop.eup %4671 }
 0x972   :  { %v3319_v41 = vmul.f32 1.442695, %v3299_v22  ;;  %3345 = vadd.xlane.f32.xlu0 %v6735_v36 }
 0x973   :  { %v3278_v17 = vpop.xlane.xlu0 %3277 }
 0x974   :  { %4679 = vpow2.f32 %v3319_v41  ;;  %v3302_v35 = vsub.f32 %v6668_v23, %v3278_v17 }
 0x975   :  { %v6739_v7 = vpop.eup %4673 }
 0x976   :  { %v3325_v29 = vmul.f32 1.442695, %v3302_v35  ;;  %3349 = vadd.xlane.f32.xlu1 %v6739_v7 }
 0x977   :  { %v3276_v50 = vpop.xlane.xlu0 %3275 }
 0x978   :  { %4681 = vpow2.f32 %v3325_v29  ;;  %v3301_v58 = vsub.f32 %v6674_v51, %v3276_v50 }
 0x979   :  { %v6743_v48 = vpop.eup %4675 }
 0x97a   :  { %v3323_v3 = vmul.f32 1.442695, %v3301_v58  ;;  %3347 = vadd.xlane.f32.xlu0 %v6743_v48 }
 0x97b   :  { %v3282_v54 = vpop.xlane.xlu0 %3281 }
 0x97c   :  { %4683 = vpow2.f32 %v3323_v3  ;;  %v3304_v13 = vsub.f32 %v6680_v15, %v3282_v54 }
 0x97d   :  { %v6747_v55 = vpop.eup %4677 }
 0x97e   :  { %v3329_v23 = vmul.f32 1.442695, %v3304_v13  ;;  %3353 = vadd.xlane.f32.xlu0 %v6747_v55 }
 0x97f   :  { %v3280_v62 = vpop.xlane.xlu0 %3279 }
 0x980   :  { %4685 = vpow2.f32 %v3329_v23  ;;  %v3303_v11 = vsub.f32 %v6687_v2, %v3280_v62 }
 0x981   :  { %v6751_v12 = vpop.eup %4679 }
 0x982   :  { %v3327_v51 = vmul.f32 1.442695, %v3303_v11  ;;  %3351 = vadd.xlane.f32.xlu0 %v6751_v12 }
 0x983   :  { %v3286_v60 = vpop.xlane.xlu0 %3285 }
 0x984   :  { %4687 = vpow2.f32 %v3327_v51  ;;  %v3306_v16 = vsub.f32 %v6693_v27, %v3286_v60 }
 0x985   :  { %v6755_v10 = vpop.eup %4681 }
 0x986   :  { %v3333_v15 = vmul.f32 1.442695, %v3306_v16  ;;  %3357 = vadd.xlane.f32.xlu0 %v6755_v10 }
 0x987   :  { %v3284_v53 = vpop.xlane.xlu0 %3283 }
 0x988   :  { %4689 = vpow2.f32 %v3333_v15  ;;  %v3305_v61 = vsub.f32 %v6700_v4, %v3284_v53 }
 0x989   :  { %v6759_v19 = vpop.eup %4683 }
 0x98a   :  { %v3331_v2 = vmul.f32 1.442695, %v3305_v61  ;;  %3355 = vadd.xlane.f32.xlu0 %v6759_v19 }
 0x98b   :  { %v3290_v57 = vpop.xlane.xlu0 %3289 }
 0x98c   :  { %4691 = vpow2.f32 %v3331_v2  ;;  %v3308_v59 = vsub.f32 %v6707_v43, %v3290_v57 }
 0x98d   :  { %v6763_v21 = vpop.eup %4685 }
 0x98e   :  { %v3337_v27 = vmul.f32 1.442695, %v3308_v59  ;;  %3361 = vadd.xlane.f32.xlu0 %v6763_v21 }
 0x98f   :  { %v3288_v18 = vpop.xlane.xlu0 %3287 }
 0x990   :  { %4693 = vpow2.f32 %v3337_v27  ;;  %v3307_v34 = vsub.f32 %v6713_v47, %v3288_v18 }
 0x991   :  { %v6767_v25 = vpop.eup %4687 }
 0x992   :  { %v3335_v4 = vmul.f32 1.442695, %v3307_v34  ;;  %3359 = vadd.xlane.f32.xlu0 %v6767_v25 }
 0x993   :  { %v3292_v33 = vpop.xlane.xlu0 %3291 }
 0x994   :  { %4695 = vpow2.f32 %v3335_v4  ;;  %v3309_v39 = vsub.f32 %v6718_v8, %v3292_v33 }
 0x995   :  { %v6771_v56 = vpop.eup %4689 }
 0x996   :  { %v3339_v43 = vmul.f32 1.442695, %v3309_v39  ;;  %3365 = vadd.xlane.f32.xlu0 %v6771_v56 }
 0x997   :  { %v3294_v63 = vpop.xlane.xlu0 %3293 }
 0x998   :  { %4697 = vpow2.f32 %v3339_v43  ;;  %v3310_v32 = vsub.f32 %v6723_v38, %v3294_v63 }
 0x999   :  { %v6775_v26 = vpop.eup %4691 }
 0x99a   :  { %v3341_v47 = vmul.f32 1.442695, %v3310_v32  ;;  %3363 = vadd.xlane.f32.xlu0 %v6775_v26 }
 0x99c   :  { %4699 = vpow2.f32 %v3341_v47 }
 0x99d   :  { %v6778_v30 = vpop.eup %4693 }
 0x99e   :  { %3369 = vadd.xlane.f32.xlu0 %v6778_v30 }
 0x9a1   :  { %v6781_v8 = vpop.eup %4695 }
 0x9a2   :  { %3367 = vadd.xlane.f32.xlu0 %v6781_v8 }
 0x9a5   :  { %v6784_v52 = vpop.eup %4697 }
 0x9a6   :  { %3371 = vadd.xlane.f32.xlu1 %v6784_v52 }
 0x9a9   :  { %v6787_v45 = vpop.eup %4699 }
 0x9aa   :  { %3373 = vadd.xlane.f32.xlu0 %v6787_v45 }
 0x9f7   :  { %v3344_v38 = vpop.xlane.xlu0 %3343 }
 0x9f8   :  { %4701 = vrcp.f32 %v3344_v38 }
 0x9fb   :  { %v3346_v6 = vpop.xlane.xlu0 %3345 }
 0x9fc   :  { %4703 = vrcp.f32 %v3346_v6 }
 0x9ff   :  { %v3350_v5 = vpop.xlane.xlu1 %3349 }
 0xa00   :  { %4705 = vrcp.f32 %v3350_v5 }
 0xa03   :  { %v3348_v40 = vpop.xlane.xlu0 %3347 }
 0xa04   :  { %4707 = vrcp.f32 %v3348_v40 }
 0xa05   :  { %v4702_v46 = vpop.eup %4701 }
 0xa06   :  { %v3391_v20 = vmul.f32 %v4702_v46, %v6731_v44 }
 0xa07   :  { %v3354_v28 = vpop.xlane.xlu0 %3353 }
 0xa08   :  { %4709 = vrcp.f32 %v3354_v28 }
 0xa09   :  { %v4704_v14 = vpop.eup %4703 }
 0xa0a   :  { %v3392_v0 = vmul.f32 %v4704_v14, %v6735_v36 }
 0xa0b   :  { %v3352_v37 = vpop.xlane.xlu0 %3351 }
 0xa0c   :  { %4711 = vrcp.f32 %v3352_v37  ;;  %v3407_v9 = vpack.c.bf16 %v3392_v0, %v3391_v20 }
 0xa0d   :  { %v4706_v1 = vpop.eup %4705 }
 0xa0e   :  { %4324 = vmatprep.mubr.bf16.mxu0 %v3407_v9  ;;  %v3394_v42 = vmul.f32 %v4706_v1, %v6739_v7 }
 0xa0f   :  { %v3358_v49 = vpop.xlane.xlu0 %3357 }
 0xa10   :  { %4713 = vrcp.f32 %v3358_v49 }
 0xa11   :  { %v4708_v24 = vpop.eup %4707 }
 0xa12   :  { %v3393_v31 = vmul.f32 %v4708_v24, %v6743_v48 }
 0xa13   :  { %v3356_v22 = vpop.xlane.xlu0 %3355 }
 0xa14   :  { %4715 = vrcp.f32 %v3356_v22  ;;  %v3408_v41 = vpack.c.bf16 %v3394_v42, %v3393_v31 }
 0xa15   :  { %v4710_v17 = vpop.eup %4709 }
 0xa16   :  { %4325 = vmatmul.mubr.bf16.vlgmr.msra.gmra.mxu0 %v3408_v41  ;;  %v3396_v29 = vmul.f32 %v4710_v17, %v6747_v55 }
 0xa17   :  { %v3362_v44 = vpop.xlane.xlu0 %3361 }
 0xa18   :  { %4717 = vrcp.f32 %v3362_v44 }
 0xa19   :  { %v4712_v35 = vpop.eup %4711 }
 0xa1a   :  { %v3395_v36 = vmul.f32 %v4712_v35, %v6751_v12 }
 0xa1b   :  { %v3360_v50 = vpop.xlane.xlu0 %3359 }
 0xa1c   :  { %4719 = vrcp.f32 %v3360_v50  ;;  %v3409_v58 = vpack.c.bf16 %v3396_v29, %v3395_v36 }
 0xa1d   :  { %v4714_v3 = vpop.eup %4713 }
 0xa1e   :  { %4328 = vmatprep.mubr.bf16.mxu0 %v3409_v58  ;;  %v3398_v13 = vmul.f32 %v4714_v3, %v6755_v10 }
 0xa1f   :  { %v3366_v48 = vpop.xlane.xlu0 %3365 }
 0xa20   :  { %4721 = vrcp.f32 %v3366_v48 }
 0xa21   :  { %v4716_v54 = vpop.eup %4715 }
 0xa22   :  { %v3397_v7 = vmul.f32 %v4716_v54, %v6759_v19 }
 0xa23   :  { %v3364_v23 = vpop.xlane.xlu0 %3363 }
 0xa24   :  { %4723 = vrcp.f32 %v3364_v23  ;;  %v3410_v62 = vpack.c.bf16 %v3398_v13, %v3397_v7 }
 0xa25   :  { %v4718_v11 = vpop.eup %4717 }
 0xa26   :  { %4329 = vmatmul.mubr.bf16.gmra.mxu0 %v3410_v62  ;;  %v3400_v60 = vmul.f32 %v4718_v11, %v6763_v21 }
 0xa27   :  { %v3370_v12 = vpop.xlane.xlu0 %3369 }
 0xa28   :  { %4725 = vrcp.f32 %v3370_v12 }
 0xa29   :  { %v4720_v51 = vpop.eup %4719 }
 0xa2a   :  { %v3399_v55 = vmul.f32 %v4720_v51, %v6767_v25 }
 0xa2b   :  { %v3368_v16 = vpop.xlane.xlu0 %3367 }
 0xa2c   :  { %4727 = vrcp.f32 %v3368_v16  ;;  %v3411_v15 = vpack.c.bf16 %v3400_v60, %v3399_v55 }
 0xa2d   :  { %v4722_v53 = vpop.eup %4721 }
 0xa2e   :  { %4332 = vmatprep.mubr.bf16.mxu0 %v3411_v15  ;;  %v3402_v2 = vmul.f32 %v4722_v53, %v6771_v56  ;;  %v3819_v56 = vld [vmem:[%s7042_s9] ss:$0 sm:$0xff] }
 0xa2f   :  { %v3372_v61 = vpop.xlane.xlu1 %3371 }
 0xa30   :  { %4729 = vrcp.f32 %v3372_v61 }
 0xa31   :  { %v4724_v19 = vpop.eup %4723 }
 0xa32   :  { %v3401_v10 = vmul.f32 %v4724_v19, %v6775_v26 }
 0xa33   :  { %v3374_v57 = vpop.xlane.xlu0 %3373 }
 0xa34   :  { %4731 = vrcp.f32 %v3374_v57  ;;  %v3412_v59 = vpack.c.bf16 %v3402_v2, %v3401_v10 }
 0xa35   :  { %v4726_v27 = vpop.eup %4725 }
 0xa36   :  { %4333 = vmatmul.mubr.bf16.gmra.mxu0 %v3412_v59  ;;  %v3404_v34 = vmul.f32 %v4726_v27, %v6778_v30 }
 0xa39   :  { %v4728_v18 = vpop.eup %4727 }
 0xa3a   :  { %v3403_v21 = vmul.f32 %v4728_v18, %v6781_v8 }
 0xa3c   :  { %v3413_v25 = vpack.c.bf16 %v3404_v34, %v3403_v21 }
 0xa3d   :  { %v4730_v4 = vpop.eup %4729 }
 0xa3e   :  { %4336 = vmatprep.mubr.bf16.mxu0 %v3413_v25  ;;  %v3405_v39 = vmul.f32 %v4730_v4, %v6784_v52 }
 0xa41   :  { %v4732_v33 = vpop.eup %4731 }
 0xa42   :  { %v3406_v43 = vmul.f32 %v4732_v33, %v6787_v45 }
 0xa44   :  { %v3414_v63 = vpack.c.bf16 %v3406_v43, %v3405_v39 }
 0xa46   :  { %4337 = vmatmul.mubr.bf16.gmra.mxu0 %v3414_v63 }
 0xad6   :  { %v4326_v32 = vpop.f32.mrf.mxu0 }
 0xad7   :  { %v6809_v26 = vadd.f32 %v4326_v32, %v3819_v56 }
 0xad8   :  { %v3463_v47 = vpop.f32.mrf.mxu0 }
 0xad9   :  { %v6811_v8 = vadd.f32 %v3819_v56, %v3463_v47  ;;  %v3532_v30 = vsel %vm2728_vm13, %v6809_v26, -inf }
 0xada   :  { %3533 = vmax.xlane.f32.xlu1 %v3532_v30  ;;  %v4327_v38 = vpop.f32.mrf.mxu0 }
 0xadb   :  { %v6815_v52 = vadd.f32 %v4327_v38, %v3819_v56  ;;  %v3526_v40 = vsel %vm2728_vm13, %v6811_v8, -inf }
 0xadc   :  { %v3466_v45 = vpop.f32.mrf.mxu0 }
 0xadd   :  { %v6817_v6 = vadd.f32 %v3819_v56, %v3466_v45  ;;  %v3535_v5 = vsel %vm2728_vm13, %v6815_v52, -inf }
 0xade   :  { %3536 = vmax.xlane.f32.xlu0 %v3535_v5  ;;  %3527 = vmax.xlane.f32.xlu1 %v3526_v40 }
 0xadf   :  { %v3529_v46 = vsel %vm2728_vm13, %v6817_v6, -inf }
 0xae2   :  { %3530 = vmax.xlane.f32.xlu0 %v3529_v46 }
 0xae6   :  { %v4330_v28 = vpop.f32.mrf.mxu0 }
 0xae7   :  { %v6825_v14 = vadd.f32 %v4330_v28, %v3819_v56 }
 0xae8   :  { %v3479_v20 = vpop.f32.mrf.mxu0 }
 0xae9   :  { %v6827_v0 = vadd.f32 %v3819_v56, %v3479_v20  ;;  %v3544_v37 = vsel %vm2728_vm13, %v6825_v14, -inf }
 0xaea   :  { %3545 = vmax.xlane.f32.xlu1 %v3544_v37  ;;  %v4331_v9 = vpop.f32.mrf.mxu0 }
 0xaeb   :  { %v6831_v1 = vadd.f32 %v4331_v9, %v3819_v56  ;;  %v3538_v42 = vsel %vm2728_vm13, %v6827_v0, -inf }
 0xaec   :  { %v3482_v49 = vpop.f32.mrf.mxu0 }
 0xaed   :  { %v6833_v24 = vadd.f32 %v3819_v56, %v3482_v49  ;;  %v3547_v31 = vsel %vm2728_vm13, %v6831_v1, -inf }
 0xaee   :  { %3548 = vmax.xlane.f32.xlu0 %v3547_v31  ;;  %3539 = vmax.xlane.f32.xlu1 %v3538_v42 }
 0xaef   :  { %v3541_v22 = vsel %vm2728_vm13, %v6833_v24, -inf }
 0xaf2   :  { %3542 = vmax.xlane.f32.xlu0 %v3541_v22 }
 0xaf6   :  { %v4334_v41 = vpop.f32.mrf.mxu0 }
 0xaf7   :  { %v6841_v17 = vadd.f32 %v4334_v41, %v3819_v56 }
 0xaf8   :  { %v3495_v44 = vpop.f32.mrf.mxu0 }
 0xaf9   :  { %v6843_v35 = vadd.f32 %v3819_v56, %v3495_v44  ;;  %v3556_v36 = vsel %vm2728_vm13, %v6841_v17, -inf }
 0xafa   :  { %3557 = vmax.xlane.f32.xlu1 %v3556_v36  ;;  %v4335_v29 = vpop.f32.mrf.mxu0 }
 0xafb   :  { %v6847_v50 = vadd.f32 %v4335_v29, %v3819_v56  ;;  %v3550_v54 = vsel %vm2728_vm13, %v6843_v35, -inf }
 0xafc   :  { %v3498_v58 = vpop.f32.mrf.mxu0 }
 0xafd   :  { %v6849_v3 = vadd.f32 %v3819_v56, %v3498_v58  ;;  %v3559_v48 = vsel %vm2728_vm13, %v6847_v50, -inf }
 0xafe   :  { %3560 = vmax.xlane.f32.xlu0 %v3559_v48  ;;  %3551 = vmax.xlane.f32.xlu1 %v3550_v54 }
 0xaff   :  { %v3553_v7 = vsel %vm2728_vm13, %v6849_v3, -inf }
 0xb02   :  { %3554 = vmax.xlane.f32.xlu0 %v3553_v7 }
 0xb06   :  { %v4338_v13 = vpop.f32.mrf.mxu0 }
 0xb07   :  { %v6859_v12 = vadd.f32 %v4338_v13, %v3819_v56 }
 0xb08   :  { %v3511_v23 = vpop.f32.mrf.mxu0 }
 0xb09   :  { %v6857_v62 = vadd.f32 %v3819_v56, %v3511_v23  ;;  %v3568_v53 = vsel %vm2728_vm13, %v6859_v12, -inf }
 0xb0a   :  { %v4339_v11 = vpop.f32.mrf.mxu0 }
 0xb0b   :  { %v3562_v51 = vsel %vm2728_vm13, %v6857_v62, -inf  ;;  %v6865_v16 = vadd.f32 %v4339_v11, %v3819_v56 }
 0xb0c   :  { %v3514_v55 = vpop.f32.mrf.mxu0  ;;  %3563 = vmax.xlane.f32.xlu1 %v3562_v51 }
 0xb0d   :  { %v6863_v60 = vadd.f32 %v3819_v56, %v3514_v55  ;;  %v3571_v61 = vsel %vm2728_vm13, %v6865_v16, -inf }
 0xb0f   :  { %v3565_v15 = vsel %vm2728_vm13, %v6863_v60, -inf }
 0xb10   :  { %3566 = vmax.xlane.f32.xlu0 %v3565_v15  ;;  %3569 = vmax.xlane.f32.xlu1 %v3568_v53 }
 0xb14   :  { %3572 = vmax.xlane.f32.xlu0 %v3571_v61 }
 0xb63   :  { %v3534_v19 = vpop.xlane.xlu1 %3533 }
 0xb64   :  { %v6874_v10 = vsub.f32 %v6809_v26, %v3534_v19 }
 0xb66   :  { %v3594_v2 = vmul.f32 1.442695, %v6874_v10 }
 0xb67   :  { %v3528_v57 = vpop.xlane.xlu1 %3527  ;;  %v3537_v59 = vpop.xlane.xlu0 %3536 }
 0xb68   :  { %4733 = vpow2.f32 %v3594_v2  ;;  %v6878_v27 = vsub.f32 %v6811_v8, %v3528_v57  ;;  %v6881_v18 = vsub.f32 %v6815_v52, %v3537_v59 }
 0xb6a   :  { %v3590_v21 = vmul.f32 1.442695, %v6878_v27  ;;  %v3596_v34 = vmul.f32 1.442695, %v6881_v18 }
 0xb6b   :  { %v3531_v25 = vpop.xlane.xlu0 %3530 }
 0xb6c   :  { %4735 = vpow2.f32 %v3590_v21  ;;  %v6886_v4 = vsub.f32 %v6817_v6, %v3531_v25 }
 0xb6d   :  { %4737 = vpow2.f32 %v3596_v34 }
 0xb6e   :  { %v3592_v33 = vmul.f32 1.442695, %v6886_v4 }
 0xb70   :  { %4739 = vpow2.f32 %v3592_v33 }
 0xb73   :  { %v3546_v39 = vpop.xlane.xlu1 %3545 }
 0xb74   :  { %v6890_v43 = vsub.f32 %v6825_v14, %v3546_v39 }
 0xb75   :  { %v4734_v63 = vpop.eup %4733 }
 0xb76   :  { %v3602_v56 = vmul.f32 1.442695, %v6890_v43  ;;  %v3628_v32 = vsel %vm2728_vm13, %v4734_v63, 0.0 }
 0xb77   :  { %v3540_v26 = vpop.xlane.xlu1 %3539  ;;  %3629 = vadd.xlane.f32.xlu1 %v3628_v32  ;;  %v3549_v47 = vpop.xlane.xlu0 %3548 }
 0xb78   :  { %4741 = vpow2.f32 %v3602_v56  ;;  %v6895_v8 = vsub.f32 %v6827_v0, %v3540_v26  ;;  %v6898_v30 = vsub.f32 %v6831_v1, %v3549_v47 }
 0xb79   :  { %v4736_v38 = vpop.eup %4735 }
 0xb7a   :  { %v4738_v52 = vpop.eup %4737  ;;  %v3598_v45 = vmul.f32 1.442695, %v6895_v8  ;;  %v3604_v6 = vmul.f32 1.442695, %v6898_v30  ;;  %v3622_v5 = vsel %vm2728_vm13, %v4736_v38, 0.0 }
 0xb7b   :  { %3623 = vadd.xlane.f32.xlu1 %v3622_v5  ;;  %v3631_v40 = vsel %vm2728_vm13, %v4738_v52, 0.0  ;;  %v3543_v46 = vpop.xlane.xlu0 %3542 }
 0xb7c   :  { %4743 = vpow2.f32 %v3598_v45  ;;  %3632 = vadd.xlane.f32.xlu0 %v3631_v40  ;;  %v6905_v28 = vsub.f32 %v6833_v24, %v3543_v46 }
 0xb7d   :  { %v4740_v14 = vpop.eup %4739  ;;  %4745 = vpow2.f32 %v3604_v6 }
 0xb7e   :  { %v3600_v20 = vmul.f32 1.442695, %v6905_v28  ;;  %v3625_v0 = vsel %vm2728_vm13, %v4740_v14, 0.0 }
 0xb80   :  { %4747 = vpow2.f32 %v3600_v20  ;;  %3626 = vadd.xlane.f32.xlu0 %v3625_v0 }
 0xb83   :  { %v3558_v37 = vpop.xlane.xlu1 %3557 }
 0xb84   :  { %v6910_v9 = vsub.f32 %v6841_v17, %v3558_v37 }
 0xb85   :  { %v4742_v1 = vpop.eup %4741 }
 0xb86   :  { %v3610_v49 = vmul.f32 1.442695, %v6910_v9  ;;  %v3640_v31 = vsel %vm2728_vm13, %v4742_v1, 0.0 }
 0xb87   :  { %v3552_v42 = vpop.xlane.xlu1 %3551  ;;  %3641 = vadd.xlane.f32.xlu1 %v3640_v31  ;;  %v3561_v24 = vpop.xlane.xlu0 %3560 }
 0xb88   :  { %4749 = vpow2.f32 %v3610_v49  ;;  %v6915_v22 = vsub.f32 %v6843_v35, %v3552_v42  ;;  %v6918_v41 = vsub.f32 %v6847_v50, %v3561_v24 }
 0xb89   :  { %v4744_v44 = vpop.eup %4743 }
 0xb8a   :  { %v4746_v36 = vpop.eup %4745  ;;  %v3606_v17 = vmul.f32 1.442695, %v6915_v22  ;;  %v3612_v29 = vmul.f32 1.442695, %v6918_v41  ;;  %v3634_v58 = vsel %vm2728_vm13, %v4744_v44, 0.0 }
 0xb8b   :  { %3635 = vadd.xlane.f32.xlu1 %v3634_v58  ;;  %v3643_v48 = vsel %vm2728_vm13, %v4746_v36, 0.0  ;;  %v3555_v54 = vpop.xlane.xlu0 %3554 }
 0xb8c   :  { %4751 = vpow2.f32 %v3606_v17  ;;  %3644 = vadd.xlane.f32.xlu0 %v3643_v48  ;;  %v6925_v35 = vsub.f32 %v6849_v3, %v3555_v54 }
 0xb8d   :  { %v4748_v7 = vpop.eup %4747  ;;  %4753 = vpow2.f32 %v3612_v29 }
 0xb8e   :  { %v3608_v50 = vmul.f32 1.442695, %v6925_v35  ;;  %v3637_v13 = vsel %vm2728_vm13, %v4748_v7, 0.0 }
 0xb90   :  { %4755 = vpow2.f32 %v3608_v50  ;;  %3638 = vadd.xlane.f32.xlu0 %v3637_v13 }
 0xb95   :  { %v4750_v23 = vpop.eup %4749  ;;  %v3564_v11 = vpop.xlane.xlu1 %3563 }
 0xb96   :  { %v6930_v51 = vsub.f32 %v6857_v62, %v3564_v11  ;;  %v3652_v55 = vsel %vm2728_vm13, %v4750_v23, 0.0 }
 0xb97   :  { %3653 = vadd.xlane.f32.xlu1 %v3652_v55 }
 0xb98   :  { %v3614_v15 = vmul.f32 1.442695, %v6930_v51 }
 0xb99   :  { %v4752_v3 = vpop.eup %4751  ;;  %v3570_v53 = vpop.xlane.xlu1 %3569 }
 0xb9a   :  { %v3567_v61 = vpop.xlane.xlu0 %3566  ;;  %v4754_v19 = vpop.eup %4753  ;;  %4757 = vpow2.f32 %v3614_v15  ;;  %v6935_v2 = vsub.f32 %v6859_v12, %v3570_v53  ;;  %v3646_v59 = vsel %vm2728_vm13, %v4752_v3, 0.0 }
 0xb9b   :  { %v6938_v57 = vsub.f32 %v6863_v60, %v3567_v61  ;;  %3647 = vadd.xlane.f32.xlu1 %v3646_v59  ;;  %v3655_v62 = vsel %vm2728_vm13, %v4754_v19, 0.0 }
 0xb9c   :  { %v3618_v21 = vmul.f32 1.442695, %v6935_v2  ;;  %3656 = vadd.xlane.f32.xlu0 %v3655_v62 }
 0xb9d   :  { %v3616_v34 = vmul.f32 1.442695, %v6938_v57  ;;  %v4756_v25 = vpop.eup %4755 }
 0xb9e   :  { %v3573_v33 = vpop.xlane.xlu0 %3572  ;;  %4759 = vpow2.f32 %v3618_v21  ;;  %v3649_v12 = vsel %vm2728_vm13, %v4756_v25, 0.0 }
 0xb9f   :  { %v6945_v39 = vsub.f32 %v6865_v16, %v3573_v33  ;;  %4761 = vpow2.f32 %v3616_v34 }
 0xba0   :  { %3650 = vadd.xlane.f32.xlu0 %v3649_v12 }
 0xba1   :  { %v3620_v60 = vmul.f32 1.442695, %v6945_v39 }
 0xba3   :  { %4763 = vpow2.f32 %v3620_v60 }
 0xba7   :  { %v4758_v63 = vpop.eup %4757 }
 0xba8   :  { %v3658_v56 = vsel %vm2728_vm13, %v4758_v63, 0.0 }
 0xba9   :  { %3659 = vadd.xlane.f32.xlu1 %v3658_v56 }
 0xbab   :  { %v4760_v32 = vpop.eup %4759 }
 0xbac   :  { %v4762_v26 = vpop.eup %4761  ;;  %v3664_v47 = vsel %vm2728_vm13, %v4760_v32, 0.0 }
 0xbad   :  { %3665 = vadd.xlane.f32.xlu1 %v3664_v47  ;;  %v3661_v38 = vsel %vm2728_vm13, %v4762_v26, 0.0 }
 0xbae   :  { %3662 = vadd.xlane.f32.xlu0 %v3661_v38 }
 0xbb0   :  { %v4764_v16 = vpop.eup %4763 }
 0xbb1   :  { %v3667_v52 = vsel %vm2728_vm13, %v4764_v16, 0.0 }
 0xbb2   :  { %3668 = vadd.xlane.f32.xlu0 %v3667_v52 }
 0xc00   :  { %v3630_v45 = vpop.xlane.xlu1 %3629 }
 0xc01   :  { %4765 = vlog2.f32 %v3630_v45 }
 0xc04   :  { %v3624_v6 = vpop.xlane.xlu1 %3623 }
 0xc05   :  { %4767 = vlog2.f32 %v3624_v6  ;;  %v3633_v5 = vpop.xlane.xlu0 %3632 }
 0xc06   :  { %4769 = vlog2.f32 %v3633_v5 }
 0xc09   :  { %v3627_v40 = vpop.xlane.xlu0 %3626 }
 0xc0a   :  { %4771 = vlog2.f32 %v3627_v40 }
 0xc0e   :  { %v4766_v46 = vpop.eup %4765 }
 0xc0f   :  { %v3675_v14 = vmul.f32 0.6931472, %v4766_v46 }
 0xc10   :  { %v3642_v20 = vpop.xlane.xlu1 %3641 }
 0xc11   :  { %v3704_v0 = vsub.f32 %v6874_v10, %v3675_v14  ;;  %4773 = vlog2.f32 %v3642_v20 }
 0xc12   :  { %v4768_v37 = vpop.eup %4767 }
 0xc13   :  { %v4770_v1 = vpop.eup %4769  ;;  %3720 = vst.msk [vmem:[%s7043_s10 + $0x10] sm:$0xff] %vm2728_vm13, %v3704_v0  ;;  %v3671_v49 = vmul.f32 0.6931472, %v4768_v37 }
 0xc14   :  { %v3677_v31 = vmul.f32 0.6931472, %v4770_v1  ;;  %v3636_v42 = vpop.xlane.xlu1 %3635 }
 0xc15   :  { %v3702_v24 = vsub.f32 %v6878_v27, %v3671_v49  ;;  %4775 = vlog2.f32 %v3636_v42  ;;  %v3645_v44 = vpop.xlane.xlu0 %3644 }
 0xc16   :  { %v3705_v36 = vsub.f32 %v6881_v18, %v3677_v31  ;;  %4777 = vlog2.f32 %v3645_v44 }
 0xc17   :  { %v4772_v17 = vpop.eup %4771  ;;  %3718 = vst.msk [vmem:[%s7043_s10] sm:$0xff] %vm2728_vm13, %v3702_v24 }
 0xc18   :  { %3721 = vst.msk [vmem:[%s7043_s10 + $0x18] sm:$0xff] %vm2728_vm13, %v3705_v36  ;;  %v3673_v10 = vmul.f32 0.6931472, %v4772_v17 }
 0xc19   :  { %v3639_v29 = vpop.xlane.xlu0 %3638 }
 0xc1a   :  { %v3703_v27 = vsub.f32 %v6886_v4, %v3673_v10  ;;  %4779 = vlog2.f32 %v3639_v29 }
 0xc1c   :  { %3719 = vst.msk [vmem:[%s7043_s10 + $0x8] sm:$0xff] %vm2728_vm13, %v3703_v27 }
 0xc1e   :  { %v4774_v18 = vpop.eup %4773 }
 0xc1f   :  { %v3683_v58 = vmul.f32 0.6931472, %v4774_v18 }
 0xc20   :  { %v3654_v48 = vpop.xlane.xlu1 %3653 }
 0xc21   :  { %v3708_v54 = vsub.f32 %v6890_v43, %v3683_v58  ;;  %4781 = vlog2.f32 %v3654_v48 }
 0xc22   :  { %v4776_v7 = vpop.eup %4775 }
 0xc23   :  { %v4778_v50 = vpop.eup %4777  ;;  %3724 = vst.msk [vmem:[%s7043_s10 + $0x30] sm:$0xff] %vm2728_vm13, %v3708_v54  ;;  %v3679_v4 = vmul.f32 0.6931472, %v4776_v7 }
 0xc24   :  { %v3685_v13 = vmul.f32 0.6931472, %v4778_v50  ;;  %v3648_v23 = vpop.xlane.xlu1 %3647 }
 0xc25   :  { %v3706_v11 = vsub.f32 %v6895_v8, %v3679_v4  ;;  %4783 = vlog2.f32 %v3648_v23  ;;  %v3657_v55 = vpop.xlane.xlu0 %3656 }
 0xc26   :  { %v3709_v15 = vsub.f32 %v6898_v30, %v3685_v13  ;;  %4785 = vlog2.f32 %v3657_v55 }
 0xc27   :  { %v4780_v3 = vpop.eup %4779  ;;  %3722 = vst.msk [vmem:[%s7043_s10 + $0x20] sm:$0xff] %vm2728_vm13, %v3706_v11 }
 0xc28   :  { %3725 = vst.msk [vmem:[%s7043_s10 + $0x38] sm:$0xff] %vm2728_vm13, %v3709_v15  ;;  %v3681_v43 = vmul.f32 0.6931472, %v4780_v3 }
 0xc29   :  { %v3651_v53 = vpop.xlane.xlu0 %3650 }
 0xc2a   :  { %v3707_v8 = vsub.f32 %v6905_v28, %v3681_v43  ;;  %4787 = vlog2.f32 %v3651_v53 }
 0xc2c   :  { %3723 = vst.msk [vmem:[%s7043_s10 + $0x28] sm:$0xff] %vm2728_vm13, %v3707_v8 }
 0xc2e   :  { %v4782_v30 = vpop.eup %4781 }
 0xc2f   :  { %v3691_v61 = vmul.f32 0.6931472, %v4782_v30 }
 0xc31   :  { %v3712_v19 = vsub.f32 %v6910_v9, %v3691_v61 }
 0xc32   :  { %v4784_v59 = vpop.eup %4783  ;;  %v3660_v62 = vpop.xlane.xlu1 %3659 }
 0xc33   :  { %v4786_v21 = vpop.eup %4785  ;;  %3728 = vst.msk [vmem:[%s7043_s10 + $0x50] sm:$0xff] %vm2728_vm13, %v3712_v19  ;;  %v3687_v34 = vmul.f32 0.6931472, %v4784_v59  ;;  %4789 = vlog2.f32 %v3660_v62 }
 0xc34   :  { %v3693_v28 = vmul.f32 0.6931472, %v4786_v21 }
 0xc35   :  { %v3710_v25 = vsub.f32 %v6915_v22, %v3687_v34 }
 0xc36   :  { %v3713_v33 = vsub.f32 %v6918_v41, %v3693_v28  ;;  %v3666_v12 = vpop.xlane.xlu1 %3665 }
 0xc37   :  { %v4788_v60 = vpop.eup %4787  ;;  %3726 = vst.msk [vmem:[%s7043_s10 + $0x40] sm:$0xff] %vm2728_vm13, %v3710_v25  ;;  %4791 = vlog2.f32 %v3666_v12  ;;  %v3663_v9 = vpop.xlane.xlu0 %3662 }
 0xc38   :  { %3729 = vst.msk [vmem:[%s7043_s10 + $0x58] sm:$0xff] %vm2728_vm13, %v3713_v33  ;;  %v3689_v63 = vmul.f32 0.6931472, %v4788_v60  ;;  %4793 = vlog2.f32 %v3663_v9 }
 0xc3a   :  { %v3711_v22 = vsub.f32 %v6925_v35, %v3689_v63 }
 0xc3b   :  { %v3669_v56 = vpop.xlane.xlu0 %3668 }
 0xc3c   :  { %3727 = vst.msk [vmem:[%s7043_s10 + $0x48] sm:$0xff] %vm2728_vm13, %v3711_v22  ;;  %4795 = vlog2.f32 %v3669_v56 }
 0xc40   :  { %v4790_v41 = vpop.eup %4789 }
 0xc41   :  { %v3695_v32 = vmul.f32 0.6931472, %v4790_v41 }
 0xc43   :  { %v3714_v26 = vsub.f32 %v6930_v51, %v3695_v32 }
 0xc44   :  { %v4792_v47 = vpop.eup %4791 }
 0xc45   :  { %v4794_v38 = vpop.eup %4793  ;;  %3730 = vst.msk [vmem:[%s7043_s10 + $0x60] sm:$0xff] %vm2728_vm13, %v3714_v26  ;;  %v3699_v16 = vmul.f32 0.6931472, %v4792_v47 }
 0xc46   :  { %v3697_v35 = vmul.f32 0.6931472, %v4794_v38 }
 0xc47   :  { %v3716_v52 = vsub.f32 %v6935_v2, %v3699_v16 }
 0xc48   :  { %v3715_v45 = vsub.f32 %v6938_v57, %v3697_v35 }
 0xc49   :  { %v4796_v6 = vpop.eup %4795  ;;  %3732 = vst.msk [vmem:[%s7043_s10 + $0x70] sm:$0xff] %vm2728_vm13, %v3716_v52 }
 0xc4a   :  { %3731 = vst.msk [vmem:[%s7043_s10 + $0x68] sm:$0xff] %vm2728_vm13, %v3715_v45  ;;  %v3701_v51 = vmul.f32 0.6931472, %v4796_v6 }
 0xc4c   :  { %v3717_v5 = vsub.f32 %v6945_v39, %v3701_v51 }
 0xc4e   :  { %3733 = vst.msk [vmem:[%s7043_s10 + $0x78] sm:$0xff] %vm2728_vm13, %v3717_v5 }

</bundles_post_ra>
